<compile_context>
chip_gen: v7x
topology: tpu7x:2x2x1
jax: 0.10.0
libtpu: 0.0.40
codegen_flags: <defaults>
</compile_context>

<pallas_src>
import jax
import jax.numpy as jnp
import numpy as np
from jax.experimental import pallas as pl
from jax.experimental.pallas import tpu as pltpu

EPS = 1e-8


# ---------------------------------------------------------------------------
# Compiler params helpers
# ---------------------------------------------------------------------------
def _vmem_limit_bytes():
    # Raise the scoped-VMEM budget above the 16/32 MiB defaults with per-chip
    # headroom (~96 MiB on v5e/v6e, ~48 MiB on v7x).
    try:
        return int(pltpu.get_tpu_info().vmem_capacity_bytes * 3 // 4)
    except Exception:
        return None


def _compiler_params():
    kw = dict(dimension_semantics=("parallel",))
    lim = _vmem_limit_bytes()
    if lim is not None:
        kw["vmem_limit_bytes"] = lim
    return pltpu.CompilerParams(**kw)


# ---------------------------------------------------------------------------
# In-kernel im2col helpers (pure value ops: slices + concatenates, no scratch)
# ---------------------------------------------------------------------------
def _shifted_tap(src, dh, dw):
    """src (H, W, C) -> value t with t[i, j, :] = src[i+dh, j+dw, :], 0 outside."""
    H, W, C = src.shape
    i0, i1 = max(0, -dh), H - max(0, dh)
    j0, j1 = max(0, -dw), W - max(0, dw)
    t = src[i0 + dh:i1 + dh, j0 + dw:j1 + dw, :]
    if i0 > 0:
        t = jnp.concatenate([jnp.zeros((i0, j1 - j0, C), src.dtype), t], axis=0)
    if i1 < H:
        t = jnp.concatenate([t, jnp.zeros((H - i1, j1 - j0, C), src.dtype)], axis=0)
    if j0 > 0:
        t = jnp.concatenate([jnp.zeros((H, j0, C), src.dtype), t], axis=1)
    if j1 < W:
        t = jnp.concatenate([t, jnp.zeros((H, W - j1, C), src.dtype)], axis=1)
    return t


def _im2col_3x3(src):
    """(H, W, C) -> (H*W, 9*C) im2col for a 3x3 'same' conv, column order (tap, chan)."""
    H, W, C = src.shape
    taps = [_shifted_tap(src, kh - 1, kw - 1) for kh in range(3) for kw in range(3)]
    return jnp.concatenate(taps, axis=-1).reshape(H * W, 9 * C)


# ---------------------------------------------------------------------------
# Pallas kernels
# ---------------------------------------------------------------------------
def _trunk_rgb_kernel(x_ref, nz_ref, prgb_ref,
                      s1_ref, d1_ref, s2_ref, d2_ref, srgb_ref,
                      w1_ref, nw1_ref, nb1_ref, w2_ref, nw2_ref, nb2_ref, wrgb_ref,
                      ox_ref, orgb_ref):
    """Fused conv1 -> noise -> lrelu -> conv2 -> noise -> lrelu -> RGB 1x1 + prev_rgb.

    x_ref    : (1, H, W, Cin)   upsampled NHWC input
    nz_ref   : (1, H, W, 1)     noise plane (already H/W-transposed)
    prgb_ref : (1, H, W, 3)     previous RGB (NHWC)
    s*_ref   : (1, 9*C, 1)/(1,F,1)  per-batch modulation (style+1), column layout
    d*_ref   : (1, 1, F)        per-batch demodulation factors, row layout
    w*_ref   : (9*C, F)         conv taps flattened row-major (tap, chan)
    nw/nb    : (1, F)           to_noise Linear weight / bias
    wrgb_ref : (F, 3)           RGB 1x1 conv weight
    ox_ref   : (1, H, W, F)     trunk activation out
    orgb_ref : (1, H, W, 3)     RGB out (pre-upsample)
    """
    H, W = x_ref.shape[1], x_ref.shape[2]
    F = ox_ref.shape[-1]
    nz = nz_ref[0].reshape(H * W, 1)                       # shared by both noise adds

    def modconv3x3(src, w_flat, s_col, d_row):
        # Style + demod folded into the weights (tiny VPU op), single big-K
        # MXU matmul over the im2col'd activation; bf16 MXU inputs, f32 acc.
        col = _im2col_3x3(src).astype(jnp.bfloat16)          # (H*W, 9*C)
        wm = (w_flat * s_col * d_row).astype(jnp.bfloat16)   # (9*C, F)
        return jnp.dot(col, wm, preferred_element_type=jnp.float32)

    def noise_lrelu(y, nw, nb):
        y = y + nz * nw + nb
        return jnp.where(y >= 0.0, y, 0.2 * y)

    y1 = noise_lrelu(modconv3x3(x_ref[0], w1_ref[...], s1_ref[0], d1_ref[0]),
                     nw1_ref[...], nb1_ref[...])
    y2 = noise_lrelu(modconv3x3(y1.reshape(H, W, F), w2_ref[...], s2_ref[0], d2_ref[0]),
                     nw2_ref[...], nb2_ref[...])
    ox_ref[0] = y2.reshape(H, W, F)

    # RGBBlock 1x1 modulated conv (demod=False) + prev_rgb add, fused so y2
    # never round-trips through HBM.
    wrgb = (wrgb_ref[...] * srgb_ref[0]).astype(jnp.bfloat16)        # (F, 3)
    rgb = jnp.dot(y2.astype(jnp.bfloat16), wrgb, preferred_element_type=jnp.float32)
    orgb_ref[0] = rgb.reshape(H, W, 3) + prgb_ref[0]


def _upsample_blur_kernel(x_ref, mwt_ref, mh_ref, o_ref):
    """Fused bilinear 2x upsample (align_corners=False) + [1,2,1]x[1,2,1]/16
    reflect-pad blur, per channel plane:  out_c = M_H @ x_c @ M_W^T.

    The W-direction pass is one batched matmul over all channels.
    x_ref : (1, C, H, W) channel-first RGB
    mwt   : (W, 2W) bf16   (blur(2W) @ upsample(W))^T
    mh    : (2H, H) bf16   blur(2H) @ upsample(H)
    o_ref : (1, C, 2H, 2W)
    """
    C, H, W = x_ref.shape[1], x_ref.shape[2], x_ref.shape[3]
    xf = x_ref[0].reshape(C * H, W).astype(jnp.bfloat16)
    t = jnp.dot(xf, mwt_ref[...], preferred_element_type=jnp.float32)   # (C*H, 2W)
    tb = t.astype(jnp.bfloat16)
    for c in range(C):                                                  # C == 3, static
        o_ref[0, c] = jnp.dot(mh_ref[...], tb[c * H:(c + 1) * H, :],
                              preferred_element_type=jnp.float32)


# ---------------------------------------------------------------------------
# pallas_call wrappers
# ---------------------------------------------------------------------------
def trunk_rgb_fused(xup_nhwc, noise_t, prev_rgb_nhwc,
                    s1t, d1, s2t, d2, srgb,
                    w1f, nw1, nb1, w2f, nw2, nb2, wrgb):
    B, H, W, Cin = xup_nhwc.shape
    F = w1f.shape[-1]
    K1, K2 = 9 * Cin, 9 * F
    return pl.pallas_call(
        _trunk_rgb_kernel,
        out_shape=(jax.ShapeDtypeStruct((B, H, W, F), jnp.float32),
                   jax.ShapeDtypeStruct((B, H, W, 3), jnp.float32)),
        grid=(B,),
        in_specs=[
            pl.BlockSpec((1, H, W, Cin), lambda b: (b, 0, 0, 0)),
            pl.BlockSpec((1, H, W, 1), lambda b: (b, 0, 0, 0)),
            pl.BlockSpec((1, H, W, 3), lambda b: (b, 0, 0, 0)),
            pl.BlockSpec((1, K1, 1), lambda b: (b, 0, 0)),
            pl.BlockSpec((1, 1, F), lambda b: (b, 0, 0)),
            pl.BlockSpec((1, K2, 1), lambda b: (b, 0, 0)),
            pl.BlockSpec((1, 1, F), lambda b: (b, 0, 0)),
            pl.BlockSpec((1, F, 1), lambda b: (b, 0, 0)),
            pl.BlockSpec((K1, F), lambda b: (0, 0)),
            pl.BlockSpec((1, F), lambda b: (0, 0)),
            pl.BlockSpec((1, F), lambda b: (0, 0)),
            pl.BlockSpec((K2, F), lambda b: (0, 0)),
            pl.BlockSpec((1, F), lambda b: (0, 0)),
            pl.BlockSpec((1, F), lambda b: (0, 0)),
            pl.BlockSpec((F, 3), lambda b: (0, 0)),
        ],
        out_specs=(pl.BlockSpec((1, H, W, F), lambda b: (b, 0, 0, 0)),
                   pl.BlockSpec((1, H, W, 3), lambda b: (b, 0, 0, 0))),
        compiler_params=_compiler_params(),
    )(xup_nhwc, noise_t, prev_rgb_nhwc, s1t, d1, s2t, d2, srgb,
      w1f, nw1, nb1, w2f, nw2, nb2, wrgb)


def _upsample_matrix(n):
    """(2n, n) matrix of nn.Upsample(scale_factor=2, bilinear, align_corners=False)."""
    u = np.zeros((2 * n, n), np.float32)
    for k in range(n):
        u[2 * k, max(k - 1, 0)] += 0.25
        u[2 * k, k] += 0.75
        u[2 * k + 1, k] += 0.75
        u[2 * k + 1, min(k + 1, n - 1)] += 0.25
    return u


def _blur_matrix(m):
    """(m, m) matrix of the normalized [1,2,1]/4 blur with reflect padding."""
    def refl(i):
        if i < 0:
            return -i
        if i >= m:
            return 2 * m - 2 - i
        return i
    b = np.zeros((m, m), np.float32)
    for i in range(m):
        b[i, refl(i - 1)] += 0.25
        b[i, i] += 0.5
        b[i, refl(i + 1)] += 0.25
    return b


def upsample_blur(x_nchw):
    B, C, H, W = x_nchw.shape
    mh = jnp.asarray(_blur_matrix(2 * H) @ _upsample_matrix(H), jnp.bfloat16)        # (2H, H)
    mwt = jnp.asarray((_blur_matrix(2 * W) @ _upsample_matrix(W)).T, jnp.bfloat16)   # (W, 2W)
    return pl.pallas_call(
        _upsample_blur_kernel,
        out_shape=jax.ShapeDtypeStruct((B, C, 2 * H, 2 * W), jnp.float32),
        grid=(B,),
        in_specs=[
            pl.BlockSpec((1, C, H, W), lambda b: (b, 0, 0, 0)),
            pl.BlockSpec((W, 2 * W), lambda b: (0, 0)),
            pl.BlockSpec((2 * H, H), lambda b: (0, 0)),
        ],
        out_specs=pl.BlockSpec((1, C, 2 * H, 2 * W), lambda b: (b, 0, 0, 0)),
        compiler_params=_compiler_params(),
    )(x_nchw, mwt, mh)


# ---------------------------------------------------------------------------
# Parameters (deterministic synthetic init — same shapes as the PyTorch module)
# ---------------------------------------------------------------------------
def init_generator_block_params(key, latent_dim, input_channels, filters):
    ks = jax.random.split(key, 14)

    def lin(kw, kb, in_f, out_f):
        w = jax.random.normal(kw, (in_f, out_f), jnp.float32) / jnp.sqrt(float(in_f))
        b = jax.random.normal(kb, (1, out_f), jnp.float32) * 0.1
        return w, b

    def conv(kc, in_c, out_c, ksz):
        w = jax.random.normal(kc, (ksz * ksz, in_c, out_c), jnp.float32)
        return w * jnp.sqrt(2.0 / float(in_c * ksz * ksz))

    p = {}
    p["style1_w"], p["style1_b"] = lin(ks[0], ks[1], latent_dim, input_channels)
    p["noise1_w"], p["noise1_b"] = lin(ks[2], ks[3], 1, filters)
    p["conv1_w"] = conv(ks[4], input_channels, filters, 3)
    p["style2_w"], p["style2_b"] = lin(ks[5], ks[6], latent_dim, filters)
    p["noise2_w"], p["noise2_b"] = lin(ks[7], ks[8], 1, filters)
    p["conv2_w"] = conv(ks[9], filters, filters, 3)
    p["rgb_style_w"], p["rgb_style_b"] = lin(ks[10], ks[11], latent_dim, filters)
    p["rgb_conv_w"] = conv(ks[12], filters, 3, 1).reshape(filters, 3)
    return p


# ---------------------------------------------------------------------------
# GeneratorBlock forward
# ---------------------------------------------------------------------------
def generator_block_forward(params, x, prev_rgb, istyle, inoise):
    """x: (B, Cin, h, w) NCHW.  prev_rgb: (B, 3, 2h, 2w) NCHW or None.
    istyle: (B, L).  inoise: (B, Hn, Wn, 1) with Hn, Wn >= 2h, 2w.
    Returns (x_out NCHW (B, filters, 2h, 2w), rgb NCHW (B, 3, 4h, 4w))."""
    B, Cin, h, w = x.shape
    F = params["conv1_w"].shape[-1]

    # GeneratorBlock.upsample (bilinear 2x, align_corners=False): two small
    # constant-matrix contractions emitted directly in NHWC (no gathers, no
    # separate transpose of the upsampled activation).
    uh = jnp.asarray(_upsample_matrix(h))                   # (H, h)
    uw = jnp.asarray(_upsample_matrix(w))                   # (W, w)
    xup = jnp.einsum('Hh,bchw->bcHw', uh, x)
    xup = jnp.einsum('bcHw,Ww->bHWc', xup, uw)              # (B, H, W, Cin) NHWC
    H, W = 2 * h, 2 * w
    # The reference's noise permute (0,3,2,1) only type-checks for square maps.
    assert H == W, "GeneratorBlock noise permute requires square feature maps"

    # PyTorch: to_noise(inoise).permute(0,3,2,1)  =>  noise plane transposed in H/W.
    nz_t = jnp.transpose(inoise[:, :H, :W, :], (0, 2, 1, 3))

    # Per-batch modulation (s) and demodulation (d) vectors (tiny, hoisted out
    # of the Pallas grid); Wsq = sum_k w[k]^2 is style-independent.
    s1 = istyle @ params["style1_w"] + params["style1_b"] + 1.0                 # (B, Cin)
    d1 = jax.lax.rsqrt((s1 * s1) @ jnp.sum(params["conv1_w"] ** 2, 0) + EPS)    # (B, F)
    s2 = istyle @ params["style2_w"] + params["style2_b"] + 1.0                 # (B, F)
    d2 = jax.lax.rsqrt((s2 * s2) @ jnp.sum(params["conv2_w"] ** 2, 0) + EPS)    # (B, F)
    s_rgb = istyle @ params["rgb_style_w"] + params["rgb_style_b"] + 1.0        # (B, F)

    if prev_rgb is None:
        prev_rgb = jnp.zeros((B, 3, H, W), jnp.float32)

    # Weights flattened to (9*C, F) with row order (tap, chan); style tiled to match.
    w1f = params["conv1_w"].reshape(9 * Cin, F)
    w2f = params["conv2_w"].reshape(9 * F, F)
    s1t = jnp.tile(s1, (1, 9))[:, :, None]                  # (B, 9*Cin, 1)
    s2t = jnp.tile(s2, (1, 9))[:, :, None]                  # (B, 9*F, 1)

    x2, rgb = trunk_rgb_fused(
        xup, nz_t, jnp.transpose(prev_rgb, (0, 2, 3, 1)),
        s1t, d1[:, None, :], s2t, d2[:, None, :], s_rgb[:, :, None],
        w1f, params["noise1_w"], params["noise1_b"],
        w2f, params["noise2_w"], params["noise2_b"], params["rgb_conv_w"])

    # RGBBlock upsample path: fused bilinear x2 + blur (channel-first planes).
    rgb = upsample_blur(jnp.transpose(rgb, (0, 3, 1, 2)))   # (B, 3, 2H, 2W)

    # NOTE: the NCHW return layout is part of the reference API; in a multi-block
    # pipeline keep x2 in NHWC between blocks and drop this transpose.
    return jnp.transpose(x2, (0, 3, 1, 2)), rgb


# ---------------------------------------------------------------------------
if __name__ == "__main__":
    B, LATENT, IN_CH, FILTERS = 2, 32, 4, 8
    h = w = 8                 # pre-upsample spatial (W=2w=16 is a multiple of 8)
    H, W = 2 * h, 2 * w       # spatial after the block's upsample

    key = jax.random.PRNGKey(0)
    k = jax.random.split(key, 8)

    x = jax.random.normal(k[0], (B, IN_CH, h, w), jnp.float32)      # NCHW, like PyTorch
    prev_rgb = jax.random.normal(k[1], (B, 3, H, W), jnp.float32)
    istyle = jax.random.normal(k[2], (B, LATENT), jnp.float32)
    inoise = jax.random.normal(k[3], (B, H, W, 1), jnp.float32)

    params = init_generator_block_params(k[4], LATENT, IN_CH, FILTERS)

    fwd = jax.jit(generator_block_forward)
    x_out, rgb_out = fwd(params, x, prev_rgb, istyle, inoise)
    jax.block_until_ready((x_out, rgb_out))

    assert x_out.shape == (B, FILTERS, H, W)
    assert rgb_out.shape == (B, 3, 2 * H, 2 * W)
    print("KERNEL_OK")
</pallas_src>

<mosaic_0001>
module attributes {stable_mosaic.version = 11 : i64} {
  func.func @_trunk_rgb_kernel(%arg0: i32, %arg1: memref<1x16x16x4xf32, #tpu.memory_space<vmem>>, %arg2: memref<1x16x16x1xf32, #tpu.memory_space<vmem>>, %arg3: memref<1x16x16x3xf32, #tpu.memory_space<vmem>>, %arg4: memref<1x36x1xf32, #tpu.memory_space<vmem>>, %arg5: memref<1x1x8xf32, #tpu.memory_space<vmem>>, %arg6: memref<1x72x1xf32, #tpu.memory_space<vmem>>, %arg7: memref<1x1x8xf32, #tpu.memory_space<vmem>>, %arg8: memref<1x8x1xf32, #tpu.memory_space<vmem>>, %arg9: memref<36x8xf32, #tpu.memory_space<vmem>>, %arg10: memref<1x8xf32, #tpu.memory_space<vmem>>, %arg11: memref<1x8xf32, #tpu.memory_space<vmem>>, %arg12: memref<72x8xf32, #tpu.memory_space<vmem>>, %arg13: memref<1x8xf32, #tpu.memory_space<vmem>>, %arg14: memref<1x8xf32, #tpu.memory_space<vmem>>, %arg15: memref<8x3xf32, #tpu.memory_space<vmem>>, %arg16: memref<1x16x16x8xf32, #tpu.memory_space<vmem>>, %arg17: memref<1x16x16x3xf32, #tpu.memory_space<vmem>>) attributes {dimension_semantics = [#tpu.dimension_semantics<parallel>], iteration_bounds = array<i64: 2>, scalar_prefetch = 0 : i64, scratch_operands = 0 : i64, tpu.core_type = #tpu.core_type<tc>, window_params = [{transform_indices = @transform_0, window_bounds = array<i64: 1, 16, 16, 4>}, {transform_indices = @transform_1, window_bounds = array<i64: 1, 16, 16, 1>}, {transform_indices = @transform_2, window_bounds = array<i64: 1, 16, 16, 3>}, {transform_indices = @transform_3, window_bounds = array<i64: 1, 36, 1>}, {transform_indices = @transform_4, window_bounds = array<i64: 1, 1, 8>}, {transform_indices = @transform_5, window_bounds = array<i64: 1, 72, 1>}, {transform_indices = @transform_6, window_bounds = array<i64: 1, 1, 8>}, {transform_indices = @transform_7, window_bounds = array<i64: 1, 8, 1>}, {pipeline_mode = #tpu.pipeline_mode<synchronous>, transform_indices = @transform_8, window_bounds = array<i64: 36, 8>}, {pipeline_mode = #tpu.pipeline_mode<synchronous>, transform_indices = @transform_9, window_bounds = array<i64: 1, 8>}, {pipeline_mode = #tpu.pipeline_mode<synchronous>, transform_indices = @transform_10, window_bounds = array<i64: 1, 8>}, {pipeline_mode = #tpu.pipeline_mode<synchronous>, transform_indices = @transform_11, window_bounds = array<i64: 72, 8>}, {pipeline_mode = #tpu.pipeline_mode<synchronous>, transform_indices = @transform_12, window_bounds = array<i64: 1, 8>}, {pipeline_mode = #tpu.pipeline_mode<synchronous>, transform_indices = @transform_13, window_bounds = array<i64: 1, 8>}, {pipeline_mode = #tpu.pipeline_mode<synchronous>, transform_indices = @transform_14, window_bounds = array<i64: 8, 3>}, {transform_indices = @transform_15, window_bounds = array<i64: 1, 16, 16, 8>}, {transform_indices = @transform_16, window_bounds = array<i64: 1, 16, 16, 3>}]} {
    %c0 = arith.constant 0 : index
    %c0_0 = arith.constant 0 : index
    %c0_1 = arith.constant 0 : index
    %c0_2 = arith.constant 0 : index
    %0 = vector.load %arg2[%c0, %c0_0, %c0_1, %c0_2] : memref<1x16x16x1xf32, #tpu.memory_space<vmem>>, vector<1x16x16x1xf32>
    %1 = vector.shape_cast %0 : vector<1x16x16x1xf32> to vector<16x16x1xf32>
    %2 = vector.shape_cast %1 : vector<16x16x1xf32> to vector<256x1xf32>
    %c0_3 = arith.constant 0 : index
    %c0_4 = arith.constant 0 : index
    %c0_5 = arith.constant 0 : index
    %c0_6 = arith.constant 0 : index
    %3 = vector.load %arg1[%c0_3, %c0_4, %c0_5, %c0_6] : memref<1x16x16x4xf32, #tpu.memory_space<vmem>>, vector<1x16x16x4xf32>
    %4 = vector.shape_cast %3 : vector<1x16x16x4xf32> to vector<16x16x4xf32>
    %c0_7 = arith.constant 0 : index
    %c0_8 = arith.constant 0 : index
    %5 = vector.load %arg9[%c0_7, %c0_8] : memref<36x8xf32, #tpu.memory_space<vmem>>, vector<36x8xf32>
    %c0_9 = arith.constant 0 : index
    %c0_10 = arith.constant 0 : index
    %c0_11 = arith.constant 0 : index
    %6 = vector.load %arg4[%c0_9, %c0_10, %c0_11] : memref<1x36x1xf32, #tpu.memory_space<vmem>>, vector<1x36x1xf32>
    %7 = vector.shape_cast %6 : vector<1x36x1xf32> to vector<36x1xf32>
    %c0_12 = arith.constant 0 : index
    %c0_13 = arith.constant 0 : index
    %c0_14 = arith.constant 0 : index
    %8 = vector.load %arg5[%c0_12, %c0_13, %c0_14] : memref<1x1x8xf32, #tpu.memory_space<vmem>>, vector<1x1x8xf32>
    %9 = vector.shape_cast %8 : vector<1x1x8xf32> to vector<1x8xf32>
    %10 = vector.extract_strided_slice %4 {offsets = [0, 0, 0], sizes = [15, 15, 4], strides = [1, 1, 1]} : vector<16x16x4xf32> to vector<15x15x4xf32>
    %cst = arith.constant 0.000000e+00 : f32
    %11 = vector.broadcast %cst : f32 to vector<1x15x4xf32>
    %12 = tpu.concatenate %11, %10 in 0 : vector<1x15x4xf32>, vector<15x15x4xf32> -> vector<16x15x4xf32>
    %cst_15 = arith.constant 0.000000e+00 : f32
    %13 = vector.broadcast %cst_15 : f32 to vector<16x1x4xf32>
    %14 = tpu.concatenate %13, %12 in 1 : vector<16x1x4xf32>, vector<16x15x4xf32> -> vector<16x16x4xf32>
    %15 = vector.extract_strided_slice %4 {offsets = [0, 0, 0], sizes = [15, 16, 4], strides = [1, 1, 1]} : vector<16x16x4xf32> to vector<15x16x4xf32>
    %cst_16 = arith.constant 0.000000e+00 : f32
    %16 = vector.broadcast %cst_16 : f32 to vector<1x16x4xf32>
    %17 = tpu.concatenate %16, %15 in 0 : vector<1x16x4xf32>, vector<15x16x4xf32> -> vector<16x16x4xf32>
    %18 = vector.extract_strided_slice %4 {offsets = [0, 1, 0], sizes = [15, 15, 4], strides = [1, 1, 1]} : vector<16x16x4xf32> to vector<15x15x4xf32>
    %cst_17 = arith.constant 0.000000e+00 : f32
    %19 = vector.broadcast %cst_17 : f32 to vector<1x15x4xf32>
    %20 = tpu.concatenate %19, %18 in 0 : vector<1x15x4xf32>, vector<15x15x4xf32> -> vector<16x15x4xf32>
    %cst_18 = arith.constant 0.000000e+00 : f32
    %21 = vector.broadcast %cst_18 : f32 to vector<16x1x4xf32>
    %22 = tpu.concatenate %20, %21 in 1 : vector<16x15x4xf32>, vector<16x1x4xf32> -> vector<16x16x4xf32>
    %23 = vector.extract_strided_slice %4 {offsets = [0, 0, 0], sizes = [16, 15, 4], strides = [1, 1, 1]} : vector<16x16x4xf32> to vector<16x15x4xf32>
    %cst_19 = arith.constant 0.000000e+00 : f32
    %24 = vector.broadcast %cst_19 : f32 to vector<16x1x4xf32>
    %25 = tpu.concatenate %24, %23 in 1 : vector<16x1x4xf32>, vector<16x15x4xf32> -> vector<16x16x4xf32>
    %26 = vector.extract_strided_slice %4 {offsets = [0, 1, 0], sizes = [16, 15, 4], strides = [1, 1, 1]} : vector<16x16x4xf32> to vector<16x15x4xf32>
    %cst_20 = arith.constant 0.000000e+00 : f32
    %27 = vector.broadcast %cst_20 : f32 to vector<16x1x4xf32>
    %28 = tpu.concatenate %26, %27 in 1 : vector<16x15x4xf32>, vector<16x1x4xf32> -> vector<16x16x4xf32>
    %29 = vector.extract_strided_slice %4 {offsets = [1, 0, 0], sizes = [15, 15, 4], strides = [1, 1, 1]} : vector<16x16x4xf32> to vector<15x15x4xf32>
    %cst_21 = arith.constant 0.000000e+00 : f32
    %30 = vector.broadcast %cst_21 : f32 to vector<1x15x4xf32>
    %31 = tpu.concatenate %29, %30 in 0 : vector<15x15x4xf32>, vector<1x15x4xf32> -> vector<16x15x4xf32>
    %cst_22 = arith.constant 0.000000e+00 : f32
    %32 = vector.broadcast %cst_22 : f32 to vector<16x1x4xf32>
    %33 = tpu.concatenate %32, %31 in 1 : vector<16x1x4xf32>, vector<16x15x4xf32> -> vector<16x16x4xf32>
    %34 = vector.extract_strided_slice %4 {offsets = [1, 0, 0], sizes = [15, 16, 4], strides = [1, 1, 1]} : vector<16x16x4xf32> to vector<15x16x4xf32>
    %cst_23 = arith.constant 0.000000e+00 : f32
    %35 = vector.broadcast %cst_23 : f32 to vector<1x16x4xf32>
    %36 = tpu.concatenate %34, %35 in 0 : vector<15x16x4xf32>, vector<1x16x4xf32> -> vector<16x16x4xf32>
    %37 = vector.extract_strided_slice %4 {offsets = [1, 1, 0], sizes = [15, 15, 4], strides = [1, 1, 1]} : vector<16x16x4xf32> to vector<15x15x4xf32>
    %cst_24 = arith.constant 0.000000e+00 : f32
    %38 = vector.broadcast %cst_24 : f32 to vector<1x15x4xf32>
    %39 = tpu.concatenate %37, %38 in 0 : vector<15x15x4xf32>, vector<1x15x4xf32> -> vector<16x15x4xf32>
    %cst_25 = arith.constant 0.000000e+00 : f32
    %40 = vector.broadcast %cst_25 : f32 to vector<16x1x4xf32>
    %41 = tpu.concatenate %39, %40 in 1 : vector<16x15x4xf32>, vector<16x1x4xf32> -> vector<16x16x4xf32>
    %42 = tpu.concatenate %14, %17, %22, %25, %4, %28, %33, %36, %41 in 2 : vector<16x16x4xf32>, vector<16x16x4xf32>, vector<16x16x4xf32>, vector<16x16x4xf32>, vector<16x16x4xf32>, vector<16x16x4xf32>, vector<16x16x4xf32>, vector<16x16x4xf32>, vector<16x16x4xf32> -> vector<16x16x36xf32>
    %43 = vector.shape_cast %42 : vector<16x16x36xf32> to vector<256x36xf32>
    %44 = arith.truncf %43 : vector<256x36xf32> to vector<256x36xbf16>
    %45 = vector.broadcast %7 : vector<36x1xf32> to vector<36x8xf32>
    %46 = arith.mulf %5, %45 : vector<36x8xf32>
    %47 = vector.broadcast %9 : vector<1x8xf32> to vector<36x8xf32>
    %48 = arith.mulf %46, %47 : vector<36x8xf32>
    %49 = arith.truncf %48 : vector<36x8xf32> to vector<36x8xbf16>
    %cst_26 = arith.constant dense<0.000000e+00> : vector<256x8xf32>
    %50 = tpu.matmul %44, %49, %cst_26 {dimension_numbers = #tpu.dot_dimension_numbers<[1], [0], [0], [1], [0, 0, 1, 1], [], []>} : vector<256x36xbf16>, vector<36x8xbf16>, vector<256x8xf32> -> vector<256x8xf32>
    %c0_27 = arith.constant 0 : index
    %c0_28 = arith.constant 0 : index
    %51 = vector.load %arg10[%c0_27, %c0_28] : memref<1x8xf32, #tpu.memory_space<vmem>>, vector<1x8xf32>
    %c0_29 = arith.constant 0 : index
    %c0_30 = arith.constant 0 : index
    %52 = vector.load %arg11[%c0_29, %c0_30] : memref<1x8xf32, #tpu.memory_space<vmem>>, vector<1x8xf32>
    %53 = vector.broadcast %2 : vector<256x1xf32> to vector<256x8xf32>
    %54 = vector.broadcast %51 : vector<1x8xf32> to vector<256x8xf32>
    %55 = arith.mulf %53, %54 : vector<256x8xf32>
    %56 = arith.addf %50, %55 : vector<256x8xf32>
    %57 = vector.broadcast %52 : vector<1x8xf32> to vector<256x8xf32>
    %58 = arith.addf %56, %57 : vector<256x8xf32>
    %cst_31 = arith.constant 0.000000e+00 : f32
    %59 = vector.broadcast %cst_31 : f32 to vector<256x8xf32>
    %60 = arith.cmpf oge, %58, %59 : vector<256x8xf32>
    %cst_32 = arith.constant 2.000000e-01 : f32
    %61 = vector.broadcast %cst_32 : f32 to vector<256x8xf32>
    %62 = arith.mulf %61, %58 : vector<256x8xf32>
    %63 = arith.select %60, %58, %62 : vector<256x8xi1>, vector<256x8xf32>
    %64 = vector.shape_cast %63 : vector<256x8xf32> to vector<16x16x8xf32>
    %c0_33 = arith.constant 0 : index
    %c0_34 = arith.constant 0 : index
    %65 = vector.load %arg12[%c0_33, %c0_34] : memref<72x8xf32, #tpu.memory_space<vmem>>, vector<72x8xf32>
    %c0_35 = arith.constant 0 : index
    %c0_36 = arith.constant 0 : index
    %c0_37 = arith.constant 0 : index
    %66 = vector.load %arg6[%c0_35, %c0_36, %c0_37] : memref<1x72x1xf32, #tpu.memory_space<vmem>>, vector<1x72x1xf32>
    %67 = vector.shape_cast %66 : vector<1x72x1xf32> to vector<72x1xf32>
    %c0_38 = arith.constant 0 : index
    %c0_39 = arith.constant 0 : index
    %c0_40 = arith.constant 0 : index
    %68 = vector.load %arg7[%c0_38, %c0_39, %c0_40] : memref<1x1x8xf32, #tpu.memory_space<vmem>>, vector<1x1x8xf32>
    %69 = vector.shape_cast %68 : vector<1x1x8xf32> to vector<1x8xf32>
    %70 = vector.extract_strided_slice %64 {offsets = [0, 0, 0], sizes = [15, 15, 8], strides = [1, 1, 1]} : vector<16x16x8xf32> to vector<15x15x8xf32>
    %cst_41 = arith.constant 0.000000e+00 : f32
    %71 = vector.broadcast %cst_41 : f32 to vector<1x15x8xf32>
    %72 = tpu.concatenate %71, %70 in 0 : vector<1x15x8xf32>, vector<15x15x8xf32> -> vector<16x15x8xf32>
    %cst_42 = arith.constant 0.000000e+00 : f32
    %73 = vector.broadcast %cst_42 : f32 to vector<16x1x8xf32>
    %74 = tpu.concatenate %73, %72 in 1 : vector<16x1x8xf32>, vector<16x15x8xf32> -> vector<16x16x8xf32>
    %75 = vector.extract_strided_slice %64 {offsets = [0, 0, 0], sizes = [15, 16, 8], strides = [1, 1, 1]} : vector<16x16x8xf32> to vector<15x16x8xf32>
    %cst_43 = arith.constant 0.000000e+00 : f32
    %76 = vector.broadcast %cst_43 : f32 to vector<1x16x8xf32>
    %77 = tpu.concatenate %76, %75 in 0 : vector<1x16x8xf32>, vector<15x16x8xf32> -> vector<16x16x8xf32>
    %78 = vector.extract_strided_slice %64 {offsets = [0, 1, 0], sizes = [15, 15, 8], strides = [1, 1, 1]} : vector<16x16x8xf32> to vector<15x15x8xf32>
    %cst_44 = arith.constant 0.000000e+00 : f32
    %79 = vector.broadcast %cst_44 : f32 to vector<1x15x8xf32>
    %80 = tpu.concatenate %79, %78 in 0 : vector<1x15x8xf32>, vector<15x15x8xf32> -> vector<16x15x8xf32>
    %cst_45 = arith.constant 0.000000e+00 : f32
    %81 = vector.broadcast %cst_45 : f32 to vector<16x1x8xf32>
    %82 = tpu.concatenate %80, %81 in 1 : vector<16x15x8xf32>, vector<16x1x8xf32> -> vector<16x16x8xf32>
    %83 = vector.extract_strided_slice %64 {offsets = [0, 0, 0], sizes = [16, 15, 8], strides = [1, 1, 1]} : vector<16x16x8xf32> to vector<16x15x8xf32>
    %cst_46 = arith.constant 0.000000e+00 : f32
    %84 = vector.broadcast %cst_46 : f32 to vector<16x1x8xf32>
    %85 = tpu.concatenate %84, %83 in 1 : vector<16x1x8xf32>, vector<16x15x8xf32> -> vector<16x16x8xf32>
    %86 = vector.extract_strided_slice %64 {offsets = [0, 1, 0], sizes = [16, 15, 8], strides = [1, 1, 1]} : vector<16x16x8xf32> to vector<16x15x8xf32>
    %cst_47 = arith.constant 0.000000e+00 : f32
    %87 = vector.broadcast %cst_47 : f32 to vector<16x1x8xf32>
    %88 = tpu.concatenate %86, %87 in 1 : vector<16x15x8xf32>, vector<16x1x8xf32> -> vector<16x16x8xf32>
    %89 = vector.extract_strided_slice %64 {offsets = [1, 0, 0], sizes = [15, 15, 8], strides = [1, 1, 1]} : vector<16x16x8xf32> to vector<15x15x8xf32>
    %cst_48 = arith.constant 0.000000e+00 : f32
    %90 = vector.broadcast %cst_48 : f32 to vector<1x15x8xf32>
    %91 = tpu.concatenate %89, %90 in 0 : vector<15x15x8xf32>, vector<1x15x8xf32> -> vector<16x15x8xf32>
    %cst_49 = arith.constant 0.000000e+00 : f32
    %92 = vector.broadcast %cst_49 : f32 to vector<16x1x8xf32>
    %93 = tpu.concatenate %92, %91 in 1 : vector<16x1x8xf32>, vector<16x15x8xf32> -> vector<16x16x8xf32>
    %94 = vector.extract_strided_slice %64 {offsets = [1, 0, 0], sizes = [15, 16, 8], strides = [1, 1, 1]} : vector<16x16x8xf32> to vector<15x16x8xf32>
    %cst_50 = arith.constant 0.000000e+00 : f32
    %95 = vector.broadcast %cst_50 : f32 to vector<1x16x8xf32>
    %96 = tpu.concatenate %94, %95 in 0 : vector<15x16x8xf32>, vector<1x16x8xf32> -> vector<16x16x8xf32>
    %97 = vector.extract_strided_slice %64 {offsets = [1, 1, 0], sizes = [15, 15, 8], strides = [1, 1, 1]} : vector<16x16x8xf32> to vector<15x15x8xf32>
    %cst_51 = arith.constant 0.000000e+00 : f32
    %98 = vector.broadcast %cst_51 : f32 to vector<1x15x8xf32>
    %99 = tpu.concatenate %97, %98 in 0 : vector<15x15x8xf32>, vector<1x15x8xf32> -> vector<16x15x8xf32>
    %cst_52 = arith.constant 0.000000e+00 : f32
    %100 = vector.broadcast %cst_52 : f32 to vector<16x1x8xf32>
    %101 = tpu.concatenate %99, %100 in 1 : vector<16x15x8xf32>, vector<16x1x8xf32> -> vector<16x16x8xf32>
    %102 = tpu.concatenate %74, %77, %82, %85, %64, %88, %93, %96, %101 in 2 : vector<16x16x8xf32>, vector<16x16x8xf32>, vector<16x16x8xf32>, vector<16x16x8xf32>, vector<16x16x8xf32>, vector<16x16x8xf32>, vector<16x16x8xf32>, vector<16x16x8xf32>, vector<16x16x8xf32> -> vector<16x16x72xf32>
    %103 = vector.shape_cast %102 : vector<16x16x72xf32> to vector<256x72xf32>
    %104 = arith.truncf %103 : vector<256x72xf32> to vector<256x72xbf16>
    %105 = vector.broadcast %67 : vector<72x1xf32> to vector<72x8xf32>
    %106 = arith.mulf %65, %105 : vector<72x8xf32>
    %107 = vector.broadcast %69 : vector<1x8xf32> to vector<72x8xf32>
    %108 = arith.mulf %106, %107 : vector<72x8xf32>
    %109 = arith.truncf %108 : vector<72x8xf32> to vector<72x8xbf16>
    %cst_53 = arith.constant dense<0.000000e+00> : vector<256x8xf32>
    %110 = tpu.matmul %104, %109, %cst_53 {dimension_numbers = #tpu.dot_dimension_numbers<[1], [0], [0], [1], [0, 0, 1, 1], [], []>} : vector<256x72xbf16>, vector<72x8xbf16>, vector<256x8xf32> -> vector<256x8xf32>
    %c0_54 = arith.constant 0 : index
    %c0_55 = arith.constant 0 : index
    %111 = vector.load %arg13[%c0_54, %c0_55] : memref<1x8xf32, #tpu.memory_space<vmem>>, vector<1x8xf32>
    %c0_56 = arith.constant 0 : index
    %c0_57 = arith.constant 0 : index
    %112 = vector.load %arg14[%c0_56, %c0_57] : memref<1x8xf32, #tpu.memory_space<vmem>>, vector<1x8xf32>
    %113 = vector.broadcast %2 : vector<256x1xf32> to vector<256x8xf32>
    %114 = vector.broadcast %111 : vector<1x8xf32> to vector<256x8xf32>
    %115 = arith.mulf %113, %114 : vector<256x8xf32>
    %116 = arith.addf %110, %115 : vector<256x8xf32>
    %117 = vector.broadcast %112 : vector<1x8xf32> to vector<256x8xf32>
    %118 = arith.addf %116, %117 : vector<256x8xf32>
    %cst_58 = arith.constant 0.000000e+00 : f32
    %119 = vector.broadcast %cst_58 : f32 to vector<256x8xf32>
    %120 = arith.cmpf oge, %118, %119 : vector<256x8xf32>
    %cst_59 = arith.constant 2.000000e-01 : f32
    %121 = vector.broadcast %cst_59 : f32 to vector<256x8xf32>
    %122 = arith.mulf %121, %118 : vector<256x8xf32>
    %123 = arith.select %120, %118, %122 : vector<256x8xi1>, vector<256x8xf32>
    %124 = vector.shape_cast %123 : vector<256x8xf32> to vector<16x16x8xf32>
    %c0_60 = arith.constant 0 : index
    %c0_61 = arith.constant 0 : index
    %c0_62 = arith.constant 0 : index
    %c0_63 = arith.constant 0 : index
    %125 = vector.load %arg16[%c0_60, %c0_61, %c0_62, %c0_63] : memref<1x16x16x8xf32, #tpu.memory_space<vmem>>, vector<1x16x16x8xf32>
    %126 = vector.shape_cast %125 : vector<1x16x16x8xf32> to vector<16x16x8xf32>
    %127 = vector.shape_cast %124 : vector<16x16x8xf32> to vector<1x16x16x8xf32>
    tpu.vector_store %arg16[%c0_60, %c0_61, %c0_62, %c0_63], %127 {strides = array<i32>} : memref<1x16x16x8xf32, #tpu.memory_space<vmem>>, vector<1x16x16x8xf32>,
    %c0_64 = arith.constant 0 : index
    %c0_65 = arith.constant 0 : index
    %128 = vector.load %arg15[%c0_64, %c0_65] : memref<8x3xf32, #tpu.memory_space<vmem>>, vector<8x3xf32>
    %c0_66 = arith.constant 0 : index
    %c0_67 = arith.constant 0 : index
    %c0_68 = arith.constant 0 : index
    %129 = vector.load %arg8[%c0_66, %c0_67, %c0_68] : memref<1x8x1xf32, #tpu.memory_space<vmem>>, vector<1x8x1xf32>
    %130 = vector.shape_cast %129 : vector<1x8x1xf32> to vector<8x1xf32>
    %131 = vector.broadcast %130 : vector<8x1xf32> to vector<8x3xf32>
    %132 = arith.mulf %128, %131 : vector<8x3xf32>
    %133 = arith.truncf %132 : vector<8x3xf32> to vector<8x3xbf16>
    %134 = arith.truncf %123 : vector<256x8xf32> to vector<256x8xbf16>
    %cst_69 = arith.constant dense<0.000000e+00> : vector<256x3xf32>
    %135 = tpu.matmul %134, %133, %cst_69 {dimension_numbers = #tpu.dot_dimension_numbers<[1], [0], [0], [1], [0, 0, 1, 1], [], []>} : vector<256x8xbf16>, vector<8x3xbf16>, vector<256x3xf32> -> vector<256x3xf32>
    %136 = vector.shape_cast %135 : vector<256x3xf32> to vector<16x16x3xf32>
    %c0_70 = arith.constant 0 : index
    %c0_71 = arith.constant 0 : index
    %c0_72 = arith.constant 0 : index
    %c0_73 = arith.constant 0 : index
    %137 = vector.load %arg3[%c0_70, %c0_71, %c0_72, %c0_73] : memref<1x16x16x3xf32, #tpu.memory_space<vmem>>, vector<1x16x16x3xf32>
    %138 = vector.shape_cast %137 : vector<1x16x16x3xf32> to vector<16x16x3xf32>
    %139 = arith.addf %136, %138 : vector<16x16x3xf32>
    %c0_74 = arith.constant 0 : index
    %c0_75 = arith.constant 0 : index
    %c0_76 = arith.constant 0 : index
    %c0_77 = arith.constant 0 : index
    %140 = vector.load %arg17[%c0_74, %c0_75, %c0_76, %c0_77] : memref<1x16x16x3xf32, #tpu.memory_space<vmem>>, vector<1x16x16x3xf32>
    %141 = vector.shape_cast %140 : vector<1x16x16x3xf32> to vector<16x16x3xf32>
    %142 = vector.shape_cast %139 : vector<16x16x3xf32> to vector<1x16x16x3xf32>
    tpu.vector_store %arg17[%c0_74, %c0_75, %c0_76, %c0_77], %142 {strides = array<i32>} : memref<1x16x16x3xf32, #tpu.memory_space<vmem>>, vector<1x16x16x3xf32>,
    return
  }
  func.func @transform_0(%arg0: i32) -> (i32, i32, i32, i32) {
    %c0_i32 = arith.constant 0 : i32
    %c0_i32_0 = arith.constant 0 : i32
    %c0_i32_1 = arith.constant 0 : i32
    %c0_i32_2 = arith.constant 0 : i32
    return %arg0, %c0_i32, %c0_i32_0, %c0_i32_1 : i32, i32, i32, i32
  }
  func.func @transform_1(%arg0: i32) -> (i32, i32, i32, i32) {
    %c0_i32 = arith.constant 0 : i32
    %c0_i32_0 = arith.constant 0 : i32
    %c0_i32_1 = arith.constant 0 : i32
    %c0_i32_2 = arith.constant 0 : i32
    return %arg0, %c0_i32, %c0_i32_0, %c0_i32_1 : i32, i32, i32, i32
  }
  func.func @transform_2(%arg0: i32) -> (i32, i32, i32, i32) {
    %c0_i32 = arith.constant 0 : i32
    %c0_i32_0 = arith.constant 0 : i32
    %c0_i32_1 = arith.constant 0 : i32
    %c0_i32_2 = arith.constant 0 : i32
    return %arg0, %c0_i32, %c0_i32_0, %c0_i32_1 : i32, i32, i32, i32
  }
  func.func @transform_3(%arg0: i32) -> (i32, i32, i32) {
    %c0_i32 = arith.constant 0 : i32
    %c0_i32_0 = arith.constant 0 : i32
    %c0_i32_1 = arith.constant 0 : i32
    return %arg0, %c0_i32, %c0_i32_0 : i32, i32, i32
  }
  func.func @transform_4(%arg0: i32) -> (i32, i32, i32) {
    %c0_i32 = arith.constant 0 : i32
    %c0_i32_0 = arith.constant 0 : i32
    %c0_i32_1 = arith.constant 0 : i32
    return %arg0, %c0_i32, %c0_i32_0 : i32, i32, i32
  }
  func.func @transform_5(%arg0: i32) -> (i32, i32, i32) {
    %c0_i32 = arith.constant 0 : i32
    %c0_i32_0 = arith.constant 0 : i32
    %c0_i32_1 = arith.constant 0 : i32
    return %arg0, %c0_i32, %c0_i32_0 : i32, i32, i32
  }
  func.func @transform_6(%arg0: i32) -> (i32, i32, i32) {
    %c0_i32 = arith.constant 0 : i32
    %c0_i32_0 = arith.constant 0 : i32
    %c0_i32_1 = arith.constant 0 : i32
    return %arg0, %c0_i32, %c0_i32_0 : i32, i32, i32
  }
  func.func @transform_7(%arg0: i32) -> (i32, i32, i32) {
    %c0_i32 = arith.constant 0 : i32
    %c0_i32_0 = arith.constant 0 : i32
    %c0_i32_1 = arith.constant 0 : i32
    return %arg0, %c0_i32, %c0_i32_0 : i32, i32, i32
  }
  func.func @transform_8(%arg0: i32) -> (i32, i32) {
    %c0_i32 = arith.constant 0 : i32
    %c0_i32_0 = arith.constant 0 : i32
    %c0_i32_1 = arith.constant 0 : i32
    return %c0_i32, %c0_i32_0 : i32, i32
  }
  func.func @transform_9(%arg0: i32) -> (i32, i32) {
    %c0_i32 = arith.constant 0 : i32
    %c0_i32_0 = arith.constant 0 : i32
    %c0_i32_1 = arith.constant 0 : i32
    return %c0_i32, %c0_i32_0 : i32, i32
  }
  func.func @transform_10(%arg0: i32) -> (i32, i32) {
    %c0_i32 = arith.constant 0 : i32
    %c0_i32_0 = arith.constant 0 : i32
    %c0_i32_1 = arith.constant 0 : i32
    return %c0_i32, %c0_i32_0 : i32, i32
  }
  func.func @transform_11(%arg0: i32) -> (i32, i32) {
    %c0_i32 = arith.constant 0 : i32
    %c0_i32_0 = arith.constant 0 : i32
    %c0_i32_1 = arith.constant 0 : i32
    return %c0_i32, %c0_i32_0 : i32, i32
  }
  func.func @transform_12(%arg0: i32) -> (i32, i32) {
    %c0_i32 = arith.constant 0 : i32
    %c0_i32_0 = arith.constant 0 : i32
    %c0_i32_1 = arith.constant 0 : i32
    return %c0_i32, %c0_i32_0 : i32, i32
  }
  func.func @transform_13(%arg0: i32) -> (i32, i32) {
    %c0_i32 = arith.constant 0 : i32
    %c0_i32_0 = arith.constant 0 : i32
    %c0_i32_1 = arith.constant 0 : i32
    return %c0_i32, %c0_i32_0 : i32, i32
  }
  func.func @transform_14(%arg0: i32) -> (i32, i32) {
    %c0_i32 = arith.constant 0 : i32
    %c0_i32_0 = arith.constant 0 : i32
    %c0_i32_1 = arith.constant 0 : i32
    return %c0_i32, %c0_i32_0 : i32, i32
  }
  func.func @transform_15(%arg0: i32) -> (i32, i32, i32, i32) {
    %c0_i32 = arith.constant 0 : i32
    %c0_i32_0 = arith.constant 0 : i32
    %c0_i32_1 = arith.constant 0 : i32
    %c0_i32_2 = arith.constant 0 : i32
    return %arg0, %c0_i32, %c0_i32_0, %c0_i32_1 : i32, i32, i32, i32
  }
  func.func @transform_16(%arg0: i32) -> (i32, i32, i32, i32) {
    %c0_i32 = arith.constant 0 : i32
    %c0_i32_0 = arith.constant 0 : i32
    %c0_i32_1 = arith.constant 0 : i32
    %c0_i32_2 = arith.constant 0 : i32
    return %arg0, %c0_i32, %c0_i32_0, %c0_i32_1 : i32, i32, i32, i32
  }
}

module attributes {stable_mosaic.version = 11 : i64} {
  func.func @_upsample_blur_kernel(%arg0: i32, %arg1: memref<1x3x16x16xf32, #tpu.memory_space<vmem>>, %arg2: memref<16x32xbf16, #tpu.memory_space<vmem>>, %arg3: memref<32x16xbf16, #tpu.memory_space<vmem>>, %arg4: memref<1x3x32x32xf32, #tpu.memory_space<vmem>>) attributes {dimension_semantics = [#tpu.dimension_semantics<parallel>], iteration_bounds = array<i64: 2>, scalar_prefetch = 0 : i64, scratch_operands = 0 : i64, tpu.core_type = #tpu.core_type<tc>, window_params = [{transform_indices = @transform_0, window_bounds = array<i64: 1, 3, 16, 16>}, {pipeline_mode = #tpu.pipeline_mode<synchronous>, transform_indices = @transform_1, window_bounds = array<i64: 16, 32>}, {pipeline_mode = #tpu.pipeline_mode<synchronous>, transform_indices = @transform_2, window_bounds = array<i64: 32, 16>}, {transform_indices = @transform_3, window_bounds = array<i64: 1, 3, 32, 32>}]} {
    %c0 = arith.constant 0 : index
    %c0_0 = arith.constant 0 : index
    %c0_1 = arith.constant 0 : index
    %c0_2 = arith.constant 0 : index
    %0 = vector.load %arg1[%c0, %c0_0, %c0_1, %c0_2] : memref<1x3x16x16xf32, #tpu.memory_space<vmem>>, vector<1x3x16x16xf32>
    %1 = vector.shape_cast %0 : vector<1x3x16x16xf32> to vector<3x16x16xf32>
    %2 = vector.shape_cast %1 : vector<3x16x16xf32> to vector<48x16xf32>
    %3 = arith.truncf %2 : vector<48x16xf32> to vector<48x16xbf16>
    %c0_3 = arith.constant 0 : index
    %c0_4 = arith.constant 0 : index
    %4 = vector.load %arg2[%c0_3, %c0_4] : memref<16x32xbf16, #tpu.memory_space<vmem>>, vector<16x32xbf16>
    %cst = arith.constant dense<0.000000e+00> : vector<48x32xf32>
    %5 = tpu.matmul %3, %4, %cst {dimension_numbers = #tpu.dot_dimension_numbers<[1], [0], [0], [1], [0, 0, 1, 1], [], []>} : vector<48x16xbf16>, vector<16x32xbf16>, vector<48x32xf32> -> vector<48x32xf32>
    %6 = arith.truncf %5 : vector<48x32xf32> to vector<48x32xbf16>
    %c0_5 = arith.constant 0 : index
    %c0_6 = arith.constant 0 : index
    %7 = vector.load %arg3[%c0_5, %c0_6] : memref<32x16xbf16, #tpu.memory_space<vmem>>, vector<32x16xbf16>
    %8 = vector.extract_strided_slice %6 {offsets = [0, 0], sizes = [16, 32], strides = [1, 1]} : vector<48x32xbf16> to vector<16x32xbf16>
    %cst_7 = arith.constant dense<0.000000e+00> : vector<32x32xf32>
    %9 = tpu.matmul %7, %8, %cst_7 {dimension_numbers = #tpu.dot_dimension_numbers<[1], [0], [0], [1], [0, 0, 1, 1], [], []>} : vector<32x16xbf16>, vector<16x32xbf16>, vector<32x32xf32> -> vector<32x32xf32>
    %c0_8 = arith.constant 0 : index
    %c0_9 = arith.constant 0 : index
    %c0_10 = arith.constant 0 : index
    %c0_11 = arith.constant 0 : index
    %10 = vector.load %arg4[%c0_8, %c0_9, %c0_10, %c0_11] : memref<1x3x32x32xf32, #tpu.memory_space<vmem>>, vector<1x1x32x32xf32>
    %11 = vector.shape_cast %10 : vector<1x1x32x32xf32> to vector<32x32xf32>
    %12 = vector.shape_cast %9 : vector<32x32xf32> to vector<1x1x32x32xf32>
    tpu.vector_store %arg4[%c0_8, %c0_9, %c0_10, %c0_11], %12 {strides = array<i32>} : memref<1x3x32x32xf32, #tpu.memory_space<vmem>>, vector<1x1x32x32xf32>,
    %c0_12 = arith.constant 0 : index
    %c0_13 = arith.constant 0 : index
    %13 = vector.load %arg3[%c0_12, %c0_13] : memref<32x16xbf16, #tpu.memory_space<vmem>>, vector<32x16xbf16>
    %14 = vector.extract_strided_slice %6 {offsets = [16, 0], sizes = [16, 32], strides = [1, 1]} : vector<48x32xbf16> to vector<16x32xbf16>
    %cst_14 = arith.constant dense<0.000000e+00> : vector<32x32xf32>
    %15 = tpu.matmul %13, %14, %cst_14 {dimension_numbers = #tpu.dot_dimension_numbers<[1], [0], [0], [1], [0, 0, 1, 1], [], []>} : vector<32x16xbf16>, vector<16x32xbf16>, vector<32x32xf32> -> vector<32x32xf32>
    %c0_15 = arith.constant 0 : index
    %c1 = arith.constant 1 : index
    %c0_16 = arith.constant 0 : index
    %c0_17 = arith.constant 0 : index
    %16 = vector.load %arg4[%c0_15, %c1, %c0_16, %c0_17] : memref<1x3x32x32xf32, #tpu.memory_space<vmem>>, vector<1x1x32x32xf32>
    %17 = vector.shape_cast %16 : vector<1x1x32x32xf32> to vector<32x32xf32>
    %18 = vector.shape_cast %15 : vector<32x32xf32> to vector<1x1x32x32xf32>
    tpu.vector_store %arg4[%c0_15, %c1, %c0_16, %c0_17], %18 {strides = array<i32>} : memref<1x3x32x32xf32, #tpu.memory_space<vmem>>, vector<1x1x32x32xf32>,
    %c0_18 = arith.constant 0 : index
    %c0_19 = arith.constant 0 : index
    %19 = vector.load %arg3[%c0_18, %c0_19] : memref<32x16xbf16, #tpu.memory_space<vmem>>, vector<32x16xbf16>
    %20 = vector.extract_strided_slice %6 {offsets = [32, 0], sizes = [16, 32], strides = [1, 1]} : vector<48x32xbf16> to vector<16x32xbf16>
    %cst_20 = arith.constant dense<0.000000e+00> : vector<32x32xf32>
    %21 = tpu.matmul %19, %20, %cst_20 {dimension_numbers = #tpu.dot_dimension_numbers<[1], [0], [0], [1], [0, 0, 1, 1], [], []>} : vector<32x16xbf16>, vector<16x32xbf16>, vector<32x32xf32> -> vector<32x32xf32>
    %c0_21 = arith.constant 0 : index
    %c2 = arith.constant 2 : index
    %c0_22 = arith.constant 0 : index
    %c0_23 = arith.constant 0 : index
    %22 = vector.load %arg4[%c0_21, %c2, %c0_22, %c0_23] : memref<1x3x32x32xf32, #tpu.memory_space<vmem>>, vector<1x1x32x32xf32>
    %23 = vector.shape_cast %22 : vector<1x1x32x32xf32> to vector<32x32xf32>
    %24 = vector.shape_cast %21 : vector<32x32xf32> to vector<1x1x32x32xf32>
    tpu.vector_store %arg4[%c0_21, %c2, %c0_22, %c0_23], %24 {strides = array<i32>} : memref<1x3x32x32xf32, #tpu.memory_space<vmem>>, vector<1x1x32x32xf32>,
    return
  }
  func.func @transform_0(%arg0: i32) -> (i32, i32, i32, i32) {
    %c0_i32 = arith.constant 0 : i32
    %c0_i32_0 = arith.constant 0 : i32
    %c0_i32_1 = arith.constant 0 : i32
    %c0_i32_2 = arith.constant 0 : i32
    return %arg0, %c0_i32, %c0_i32_0, %c0_i32_1 : i32, i32, i32, i32
  }
  func.func @transform_1(%arg0: i32) -> (i32, i32) {
    %c0_i32 = arith.constant 0 : i32
    %c0_i32_0 = arith.constant 0 : i32
    %c0_i32_1 = arith.constant 0 : i32
    return %c0_i32, %c0_i32_0 : i32, i32
  }
  func.func @transform_2(%arg0: i32) -> (i32, i32) {
    %c0_i32 = arith.constant 0 : i32
    %c0_i32_0 = arith.constant 0 : i32
    %c0_i32_1 = arith.constant 0 : i32
    return %c0_i32, %c0_i32_0 : i32, i32
  }
  func.func @transform_3(%arg0: i32) -> (i32, i32, i32, i32) {
    %c0_i32 = arith.constant 0 : i32
    %c0_i32_0 = arith.constant 0 : i32
    %c0_i32_1 = arith.constant 0 : i32
    %c0_i32_2 = arith.constant 0 : i32
    return %arg0, %c0_i32, %c0_i32_0, %c0_i32_1 : i32, i32, i32, i32
  }
}

</mosaic_0001>

<bundles_post_ra>
// kernel: generator_block_forward.3
= control target key start
LH: loop header
LB: loop body
LE: loop exit
PB: predicated region body
PF: predicated region fallthrough
CT: control target
= control target key end

     0   :  { %8 = vsyncpa [#allocation3], 0  ;;  %s923_s0 = inlined_call_operand.vmem [shape: f32[2,3,16,16], index: 0, kind: input, shape index: {}]   ;;  %s924_s1 = inlined_call_operand.vmem [shape: bf16[16,32], index: 1, kind: input, shape index: {}]   ;;  %s925_s2 = inlined_call_operand.vmem [shape: bf16[32,16], index: 2, kind: input, shape index: {}]   ;;  %s926_s3 = inlined_call_operand.hbm [shape: f32[2,3,32,32], index: 3, kind: output, shape index: {}]  }
   0x1   :  { %10 = vsyncpa [#allocation3 + $0x1], 0  ;;  %s774_s12 = smov 0   ;;  %s776_s13 = smov 0  }
   0x2   :  { %s778_s14 = smov 0   ;;  %s780_s15 = smov 0  }
   0x3 LB: > { %s795_s16 = sadd.s32 4294967295, %s747_s15   ;;  %s555_s17 = sadd.s32 4294967294, %s747_s15   ;;  %s747_s15 = sphi %s780_s15, %s932_s15   ;;  %s743_s14 = sphi %s778_s14, %s931_s14   ;;  %s739_s13 = sphi %s776_s13, %s930_s13   ;;  %s735_s12 = sphi %s774_s12, %s929_s12  }
   0x4   : > { %s799_s18 = sadd.s32 1, %s747_s15   ;;  %s91_s19 = sadd.s32 1, %s743_s14 }
   0x5   : > { %s88_s20 = ssub.s32 %s747_s15, %s799_s18  ;;  %p101_p0 = scmp.ne.s32.totalorder %s743_s14, %s739_s13 }
   0x6   : > { %p89_p1 = scmp.eq.s32.totalorder %s88_s20, 0  ;;  %p102_p2 = scmp.eq.s32.totalorder %s795_s16, 1 }
   0x7   : > { %p107_p3 = scmp.ne.s32.totalorder %s739_s13, %s735_s12  ;;  %p108_p4 = scmp.eq.s32.totalorder %s555_s17, 1 }
   0x8   : > { %s810_s21 = scalar_select %p89_p1, %s743_s14, %s91_s19  }
   0x9   : > { %p812_p5 = por %p102_p2, %p101_p0  ;;  %p816_p6 = por %p108_p4, %p107_p3 }
   0xa   : > { %p558_p7 = scmp.ge.s32.totalorder %s747_s15, 1  ;;  %p140_p8 = scmp.lt.s32.totalorder %s747_s15, 3 }
   0xc   : > { %p141_p9 = pnand %p558_p7, %p140_p8 }
   0xd   : > { %v678_v0 = vld [vmem:[%s924_s1] sm:$0xff] (!%p141_p9)   ;;  %v749_v1 = vmov (!%p141_p9), 0.0   ;;  %p164_p10 = scmp.lt.s32.totalorder (!%p141_p9), %s795_s16, 1  ;;  %vm750_vm0 = vmmov (!%p141_p9), 0   ;;  %vm187_vm1 = vcmask (!%p141_p9), 130048   ;;  %v680_v17 = vld [vmem:[%s925_s2 + $0x8] sm:$0xff] (!%p141_p9)  }
   0xe   : > { %144 = sbr.rel (%p141_p9) target bundleno = 495 (0x1ef), region = 32  ;;  %600 = vmatprep.subr.bf16.mxu0 (!%p141_p9), %v749_v1  ;;  %602 = vmatprep.mubr.msk.bf16.mxu0 (!%p141_p9), %vm750_vm0, %v749_v1  ;;  %v679_v11 = vld [vmem:[%s925_s2] sm:$0xff] (!%p141_p9)   ;;  %v682_v24 = vld [vmem:[%s925_s2 + $0x8] sm:$0xff] (!%p141_p9)   ;;  %s161_s25 = sand.u32 (!%p141_p9), 1, %s739_s13   ;;  %vm326_vm2 = vcmask (!%p141_p9), 261120  }
   0xf   : > { %601 = vmatpush3.bf16.msra.mxu0 (!%p141_p9), %v678_v0  ;;  %616 = vmatprep.mubr.msk.bf16.mxu1 (!%p141_p9), %vm187_vm1, %v679_v11  ;;  %v681_v18 = vld [vmem:[%s925_s2] sm:$0xff] (!%p141_p9)   ;;  %v684_v31 = vld [vmem:[%s925_s2 + $0x8] sm:$0xff] (!%p141_p9)   ;;  %s634_s28 = smul.u32 (!%p141_p9), 1536, %s795_s16  ;;  %s751_s7 = smov (!%p141_p9), [#allocation2]  }
  0x10   : > { %v683_v25 = vld [vmem:[%s925_s2] sm:$0xff] (!%p141_p9)   ;;  %s689_s8 = sshll.u32 (!%p141_p9), %s751_s7, 4  ;;  %s690_s8 = int_to_ptr.vmem [resolvable:$false] %s689_s8 }
  0x11   : > { %s873_s5 = scalar_lea.hbm (!%p141_p9), %s926_s3, %s634_s28  ;;  %s691_s9 = scalar_lea.vmem (!%p141_p9), %s690_s8, 3072 }
  0x15   : > { %s165_s26 = scalar_select %p164_p10, %s795_s16, 1 }
  0x16   : > { %s882_s16 = scalar_lea.sflag [#allocation3], %s161_s25 }
  0x17   : > { %s633_s27 = smul.u32 48, %s165_s26 }
  0x18   : > { %s632_s26 = smul.u32 96, %s161_s25 }
  0x19   : > { %s168_s30 = scalar_lea.vmem %s923_s0, %s633_s27 }
  0x1a   : > { %v170_v2 = vld [vmem:[%s168_s30] sm:$0xff]  ;;  %v171_v3 = vld [vmem:[%s168_s30 + $0x8] sm:$0xff]  ;;  %v172_v5 = vld [vmem:[%s168_s30 + $0x10] sm:$0xff]  ;;  %s163_s27 = scalar_lea.vmem [#allocation2], %s632_s26 }
  0x1b   : > { %v176_v4 = vpack.c.bf16 %v171_v3, %v170_v2  ;;  %v173_v6 = vld [vmem:[%s168_s30 + $0x18] sm:$0xff]  ;;  %v174_v8 = vld [vmem:[%s168_s30 + $0x20] sm:$0xff]  ;;  %v175_v9 = vld [vmem:[%s168_s30 + $0x28] sm:$0xff]  ;;  %s493_s29 = sshll.u32 %s163_s27, 4  ;;  %s875_s29 = int_to_ptr.vmem [resolvable:$true] %s493_s29 }
  0x1c   : > { %v177_v7 = vpack.c.bf16 %v173_v6, %v172_v5  ;;  %v178_v10 = vpack.c.bf16 %v175_v9, %v174_v8  ;;  %s685_s6 = scalar_lea.vmem %s875_s29, 1536  ;;  %p692_p0 = scmp.lt.s32.totalorder %s875_s29, %s690_s8 }
  0x1d   : > { %603 = vmatmul.mubr.msk.bf16.vlgmr.msra.gmra.mrb[0].mxu0 %vm187_vm1, %v176_v4  ;;  %p686_p11 = scmp.ne.s32.totalorder %s875_s29, %s685_s6  ;;  %p693_p1 = scmp.lt.s32.totalorder %s691_s9, %s685_s6 }
  0x1e   : > { %606 = vmatprep.mubr.msk.bf16.mxu0 %vm750_vm0, %v749_v1 }
  0x1f   : > { %p687_p12 = pnand %p686_p11, %p812_p5  ;;  %p694_p2 = por %p693_p1, %p692_p0 }
  0x21   : > { %p688_p13 = pneg %p687_p12 }
  0x23   : > { %p695_p3 = pnand %p694_p2, %p688_p13 }
  0x25   : > { %607 = vmatmul.mubr.msk.bf16.gmra.mrb[4].mxu0 %vm187_vm1, %v177_v7 }
  0x26   : > { %610 = vmatprep.mubr.msk.bf16.mxu0 %vm750_vm0, %v749_v1 }
  0x2d   : > { %611 = vmatmul.mubr.msk.bf16.gmra.mrb[8].mxu0 %vm187_vm1, %v178_v10 }
  0xf0   : > { %v231_v12 = vpop.f32.mrb[0].mxu0 }
  0xf1   : > { %v604_v13 = vpop.f32.mrb[1].mxu0 }
  0xf2   : > { %v234_v14 = vpop.f32.mrb[2].mxu0 }
  0xf3   : > { %v254_v15 = vpack.c.bf16 %v234_v14, %v231_v12  ;;  %v605_v16 = vpop.f32.mrb[3].mxu0 }
  0xf5   : > { %614 = vmatprep.subr.bf16.mxu1 %v254_v15 }
  0xf6   : > { %615 = vmatpush3.bf16.msra.mxu1 %v254_v15 }
  0xf8   : > { %v239_v19 = vpop.f32.mrb[4].mxu0 }
  0xf9   : > { %v608_v20 = vpop.f32.mrb[5].mxu0  ;;  %617 = vmatmul.mubr.msk.bf16.vlgmr.msra.gmra.mrb[0].mxu1 %vm187_vm1, %v680_v17 }
  0xfa   : > { %v242_v21 = vpop.f32.mrb[6].mxu0  ;;  %622 = vmatprep.mubr.msk.bf16.mxu1 %vm187_vm1, %v681_v18 }
  0xfb   : > { %v255_v22 = vpack.c.bf16 %v242_v21, %v239_v19  ;;  %v609_v23 = vpop.f32.mrb[7].mxu0 }
  0xfd   : > { %620 = vmatprep.subr.bf16.mxu1 %v255_v22 }
  0xfe   : > { %621 = vmatpush3.bf16.msra.mxu1 %v255_v22 }
 0x100   : > { %v247_v26 = vpop.f32.mrb[8].mxu0 }
 0x101   : > { %v612_v27 = vpop.f32.mrb[9].mxu0  ;;  %623 = vmatmul.mubr.msk.bf16.vlgmr.msra.gmra.mrb[4].mxu1 %vm187_vm1, %v682_v24 }
 0x102   : > { %v250_v28 = vpop.f32.mrb[10].mxu0  ;;  %628 = vmatprep.mubr.msk.bf16.mxu1 %vm187_vm1, %v683_v25 }
 0x103   : > { %v256_v29 = vpack.c.bf16 %v250_v28, %v247_v26  ;;  %v613_v30 = vpop.f32.mrb[11].mxu0 }
 0x105   : > { %626 = vmatprep.subr.bf16.mxu1 %v256_v29 }
 0x106   : > { %627 = vmatpush3.bf16.msra.mxu1 %v256_v29 }
 0x109   : > { %629 = vmatmul.mubr.msk.bf16.vlgmr.msra.gmra.mrb[8].mxu1 %vm187_vm1, %v684_v31 }
 0x1cc   : > { %v618_v32 = vpop.f32.mrb[0].mxu1 }
 0x1cd   : > { %329 = vst.msk [vmem:[%s163_s27 + $0x10] sm:$0xff] %vm326_vm2, %v618_v32  ;;  %v311_v33 = vpop.f32.mrb[1].mxu1 }
 0x1ce   : > { %327 = vst.msk [vmem:[%s163_s27] sm:$0xff] %vm326_vm2, %v311_v33  ;;  %v619_v34 = vpop.f32.mrb[2].mxu1 }
 0x1cf   : > { %330 = vst.msk [vmem:[%s163_s27 + $0x18] sm:$0xff] %vm326_vm2, %v619_v34  ;;  %v314_v35 = vpop.f32.mrb[3].mxu1 }
 0x1d0   : > { %328 = vst.msk [vmem:[%s163_s27 + $0x8] sm:$0xff] %vm326_vm2, %v314_v35 }
 0x1d4   : > { %v624_v36 = vpop.f32.mrb[4].mxu1 }
 0x1d5   : > { %574 = vst.msk [vmem:[%s163_s27 + $0x30] sm:$0xff] %vm326_vm2, %v624_v36  ;;  %v385_v37 = vpop.f32.mrb[5].mxu1 }
 0x1d6   : > { %572 = vst.msk [vmem:[%s163_s27 + $0x20] sm:$0xff] %vm326_vm2, %v385_v37  ;;  %v625_v38 = vpop.f32.mrb[6].mxu1 }
 0x1d7   : > { %575 = vst.msk [vmem:[%s163_s27 + $0x38] sm:$0xff] %vm326_vm2, %v625_v38  ;;  %v388_v39 = vpop.f32.mrb[7].mxu1 }
 0x1d8   : > { %573 = vst.msk [vmem:[%s163_s27 + $0x28] sm:$0xff] %vm326_vm2, %v388_v39 }
 0x1dc   : > { %v630_v40 = vpop.f32.mrb[8].mxu1 }
 0x1dd   : > { %582 = vst.msk [vmem:[%s163_s27 + $0x50] sm:$0xff] %vm326_vm2, %v630_v40  ;;  %v459_v41 = vpop.f32.mrb[9].mxu1 }
 0x1de   : > { %580 = vst.msk [vmem:[%s163_s27 + $0x40] sm:$0xff] %vm326_vm2, %v459_v41  ;;  %v631_v42 = vpop.f32.mrb[10].mxu1 }
 0x1df   : > { %583 = vst.msk [vmem:[%s163_s27 + $0x58] sm:$0xff] %vm326_vm2, %v631_v42  ;;  %v462_v43 = vpop.f32.mrb[11].mxu1 }
 0x1e0   : > { %581 = vst.msk [vmem:[%s163_s27 + $0x48] sm:$0xff] %vm326_vm2, %v462_v43 }
 0x1e1   : > { %698 = shalt.err (!%p695_p3)
}
 0x1e2   : > { %s699_s10 = scalar_lea.hbm %s873_s5, 1536  ;;  %s703_s19 = scalar_lea.hbm %s926_s3, 3072 }
 0x1e3   : > { %p700_p4 = scmp.ne.s32.totalorder %s873_s5, %s699_s10  ;;  %p704_p9 = scmp.lt.u32.totalorder %s873_s5, %s926_s3 }
 0x1e4   : > { %p705_p10 = scmp.lt.u32.totalorder %s703_s19, %s699_s10  ;;  %p707_p12 = scmp.lt.u32.totalorder %s699_s10, %s873_s5 }
 0x1e5   : > { %p701_p7 = pnand %p700_p4, %p812_p5 }
 0x1e6   : > { %p706_p11 = por %p705_p10, %p704_p9 }
 0x1e7   : > { %p702_p8 = pneg %p701_p7 }
 0x1e8   : > { %p708_p13 = por %p707_p12, %p706_p11 }
 0x1ea   : > { %p709_p0 = pnand %p708_p13, %p702_p8 }
 0x1ec   : > { %712 = shalt.err (!%p709_p0)
}
 0x1ed   : > { %s752_s25 = smov 128   ;;  %s753_s26 = smov 8  }
 0x1ee   : > { %635 = dma.vmem_to_hbm [thread:$0]  (%p812_p5), %s875_s29, 1536, %s873_s5, %s882_s16, %s752_s25, %s752_s25, %s753_s26  }
 0x1ef PF: > { %p641_p1 = scmp.ge.s32.totalorder %s747_s15, 2  ;;  %s508_s27 = sand.u32 1, %s735_s12  }
 0x1f0   : > { %s509_s28 = scalar_lea.sflag [#allocation3], %s508_s27 }
 0x1f1   : > { %p638_p2 = pnand %p641_p1, %p816_p6 }
 0x1f3   : > { %730 = dma.done.wait (!%p638_p2), %s509_s28, 1536  }
 0x1f4   : > { %732 = vsyncadd (!%p638_p2), %s509_s28, 4294965760  ;;  %p13_p3 = scmp.ge.s32.totalorder %s799_s18, 4   ;;  %s929_s12 = smov %s739_s13 }
 0x1f5   : > { %s930_s13 = smov %s743_s14  ;;  %s931_s14 = smov %s810_s21 }
 0x1f6   : > { %s932_s15 = smov %s799_s18  ;;  %15 = sbr.rel (!%p13_p3) target bundleno = 3 (0x3), region = 69 }
 0x1fd   :  { %514 = vsyncpa [#allocation3], 1 }
 0x1fe   :  { %516 = vsyncpa [#allocation3 + $0x1], 1 }

// kernel: generator_block_forward.2
= control target key start
LH: loop header
LB: loop body
LE: loop exit
PB: predicated region body
PF: predicated region fallthrough
CT: control target
= control target key end

     0   :  { %s6547_s21 = smov 0   ;;  %s9917_s0 = inlined_call_operand.vmem [shape: f32[2,16,16,4], index: 0, kind: input, shape index: {}]   ;;  %s9918_s1 = inlined_call_operand.vmem [shape: f32[2,16,16,1], index: 1, kind: input, shape index: {}]   ;;  %s9919_s2 = inlined_call_operand.vmem [shape: f32[2,16,16,3], index: 2, kind: input, shape index: {}]   ;;  %s9920_s3 = inlined_call_operand.vmem [shape: f32[2,36,1], index: 3, kind: input, shape index: {}]   ;;  %s9921_s4 = inlined_call_operand.vmem [shape: f32[2,1,8], index: 4, kind: input, shape index: {}]   ;;  %s9922_s5 = inlined_call_operand.vmem [shape: f32[2,72,1], index: 5, kind: input, shape index: {}]   ;;  %s9923_s6 = inlined_call_operand.vmem [shape: f32[2,1,8], index: 6, kind: input, shape index: {}]   ;;  %s9924_s7 = inlined_call_operand.vmem [shape: f32[2,8,1], index: 7, kind: input, shape index: {}]   ;;  %s9925_s8 = inlined_call_operand.vmem [shape: f32[36,8], index: 8, kind: input, shape index: {}]   ;;  %s9926_s9 = inlined_call_operand.vmem [shape: f32[1,8], index: 9, kind: input, shape index: {}]   ;;  %s9927_s10 = inlined_call_operand.vmem [shape: f32[1,8], index: 10, kind: input, shape index: {}]   ;;  %s9928_s11 = inlined_call_operand.vmem [shape: f32[72,8], index: 11, kind: input, shape index: {}]   ;;  %s9929_s12 = inlined_call_operand.vmem [shape: f32[1,8], index: 12, kind: input, shape index: {}]   ;;  %s9930_s13 = inlined_call_operand.vmem [shape: f32[1,8], index: 13, kind: input, shape index: {}]   ;;  %s9931_s14 = inlined_call_operand.vmem [shape: f32[8,3], index: 14, kind: input, shape index: {}]   ;;  %s9932_s15 = inlined_call_operand.vmem [shape: f32[2,16,16,8], index: 15, kind: output, shape index: {0}]   ;;  %s9933_s16 = inlined_call_operand.vmem [shape: f32[2,16,16,3], index: 16, kind: output, shape index: {1}]  }
   0x1   :  { %10098 = sst [smem:[#allocation64_spill]] %s9917_s0 }
   0x2 LB: > { %s4904_s22 = sadd.s32 4294967295, %s6446_s21   ;;  %p4908_p0 = scmp.ge.s32.totalorder %s6446_s21, 1  ;;  %s6446_s21 = sphi %s6547_s21, %s27_s21  }
   0x3   : > { %p530_p1 = scmp.lt.s32.totalorder %s6446_s21, 3 }
   0x5   : > { %p531_p2 = pnand %p4908_p0, %p530_p1 }
   0x7   : > { %534 = sbr.rel (%p531_p2) target bundleno = 1376 (0x560), region = 80 }
   0xe   : > { %p615_p3 = scmp.lt.s32.totalorder %s4904_s22, 1  ;;  %s10099_s26 = sld [smem:[#allocation64_spill]]  ;;  %v9934_v4 = vmov 0.0   ;;  %vm863_vm0 = vcmask 1046528   ;;  %vm767_vm1 = vcmask 1040384   ;;  %vm1748_vm2 = vcmask 31744  }
   0xf   : > { %s6449_s28 = smov 4   ;;  %s6450_s29 = smov 8   ;;  %vm1781_vm3 = vcmask 64512   ;;  %vm1814_vm4 = vcmask 97280   ;;  %vm1847_vm5 = vcmask 130048   ;;  %vm1880_vm6 = vcmask 162816  }
  0x10   : > { %s10447_s22 = smov (!%p615_p3, %s4904_s22), 1  ;;  %s6452_s30 = smov 12   ;;  %vm1913_vm7 = vcmask 195584   ;;  %vm1946_vm8 = vcmask 228352   ;;  %vm2321_vm9 = vcmask 1041408   ;;  %vm1979_vm10 = vcmask 261120  }
  0x11   : > { %s6558_s23 = sshll.u32 %s10447_s22, 8  ;;  %s6453_s0 = smov 16   ;;  %vm2272_vm11 = vcmask 293888   ;;  %vm4073_vm12 = vcmask 1043456  }
  0x12   : > { %s6454_s17 = smov 20   ;;  %s5164_s18 = smul.u32 40, %s10447_s22 }
  0x13   : > { %s6455_s25 = smov 24   ;;  %s637_s20 = scalar_lea.vmem %s9921_s4, %s10447_s22 }
  0x14   : > { %s6564_s27 = scalar_lea.vmem %s10099_s26, %s6558_s23  ;;  %s634_s24 = scalar_lea.vmem %s9920_s3, %s5164_s18 }
  0x15   : > { %v6567_v0 = vld [vmem:[%s6564_s27 + $0x18] sm:$0xff]  ;;  %v6570_v1 = vld [vmem:[%s6564_s27 + $0x20] sm:$0xff]  ;;  %v6580_v6 = vld [vmem:[%s6564_s27 + $0x28] sm:$0xff]  ;;  %s6456_s26 = smov 28   ;;  %s9818_s18 = scalar_lea.vmem %s9933_s16, %s6558_s23 }
  0x16   : > { %v6573_v2 = vld [vmem:[%s6564_s27] sm:$0xff]  ;;  %v5198_v3 = vpack.i.bf16 %v6570_v1, %v6567_v0  ;;  %v6583_v7 = vld [vmem:[%s6564_s27 + $0x30] sm:$0xff]  ;;  %v6586_v8 = vld [vmem:[%s6564_s27 + $0x8] sm:$0xff]  ;;  %v868_v52 = vrot.slane %v6567_v0, 1  ;;  %v871_v54 = vrot.slane %v6580_v6, 1  ;;  %v870_v59 = vrot.slane %v6570_v1, 1 }
  0x17   : > { %v5188_v5 = vpack.i.bf16 %v6573_v2, %v9934_v4  ;;  %v6589_v9 = vld [vmem:[%s6564_s27 + $0x10] sm:$0xff]  ;;  %v5203_v10 = vpack.i.bf16 %v6583_v7, %v6580_v6  ;;  %v6598_v12 = vld [vmem:[%s6564_s27 + $0x48] sm:$0xff]  ;;  %v6604_v14 = vld [vmem:[%s6564_s27 + $0x38] sm:$0xff]  ;;  %v865_v44 = vrot.slane %v6586_v8, 1  ;;  %v864_v45 = vrot.slane %v6573_v2, 1 }
  0x18   : > { %5199 = vrot.lane.b32.xlu1 %v5198_v3, %s6449_s28  ;;  %v5193_v11 = vpack.i.bf16 %v6589_v9, %v6586_v8  ;;  %v6601_v13 = vld [vmem:[%s6564_s27 + $0x50] sm:$0xff]  ;;  %v6607_v15 = vld [vmem:[%s6564_s27 + $0x40] sm:$0xff]  ;;  %v6616_v18 = vld [vmem:[%s6564_s27 + $0x68] sm:$0xff]  ;;  %v867_v51 = vrot.slane %v6589_v9, 1  ;;  %v873_v55 = vrot.slane %v6583_v7, 1  ;;  %v874_v58 = vrot.slane %v6604_v14, 1 }
  0x19   : > { %5189 = vrot.lane.b32.xlu0 %v5188_v5, %s6449_s28  ;;  %v5213_v16 = vpack.i.bf16 %v6601_v13, %v6598_v12  ;;  %v5208_v17 = vpack.i.bf16 %v6607_v15, %v6604_v14  ;;  %v6619_v19 = vld [vmem:[%s6564_s27 + $0x70] sm:$0xff]  ;;  %v6622_v20 = vld [vmem:[%s6564_s27 + $0x58] sm:$0xff]  ;;  %v6625_v21 = vld [vmem:[%s6564_s27 + $0x60] sm:$0xff]  ;;  %v6719_v57 = vsel %vm863_vm0, %v864_v45, %v865_v44  ;;  %v6727_v61 = vsel %vm863_vm0, %v865_v44, 0.0 }
  0x1a   : > { %v5223_v22 = vpack.i.bf16 %v6619_v19, %v6616_v18  ;;  %v5218_v23 = vpack.i.bf16 %v6625_v21, %v6622_v20  ;;  %v6634_v24 = vld [vmem:[%s6564_s27 + $0x88] sm:$0xff]  ;;  %v6637_v25 = vld [vmem:[%s6564_s27 + $0x90] sm:$0xff]  ;;  %v6640_v26 = vld [vmem:[%s6564_s27 + $0x78] sm:$0xff]  ;;  %v6724_v60 = vsel %vm863_vm0, %v867_v51, %v868_v52  ;;  %v5263_v62 = vpack.i.bf16 %v6719_v57, %v9934_v4 }
  0x1b   : > { %10100 = vst [vmem:[#allocation2_spill] sm:$0xff] %v6634_v24  ;;  %v6643_v27 = vld [vmem:[%s6564_s27 + $0x80] sm:$0xff]  ;;  %v5233_v28 = vpack.i.bf16 %v6637_v25, %v6634_v24  ;;  %v6652_v30 = vld [vmem:[%s6564_s27 + $0xa8] sm:$0xff]  ;;  %v6655_v31 = vld [vmem:[%s6564_s27 + $0xb0] sm:$0xff]  ;;  %v6732_v63 = vsel %vm863_vm0, %v871_v54, 0.0  ;;  %v5268_v3 = vpack.i.bf16 %v6724_v60, %v6727_v61  ;;  %v6740_v5 = vsel %vm863_vm0, %v873_v55, %v874_v58 }
  0x1c   : > { %5204 = vrot.lane.b32.xlu1 %v5203_v10, %s6449_s28  ;;  %10101 = vst [vmem:[#allocation3_spill] sm:$0xff] %v6643_v27  ;;  %v5228_v29 = vpack.i.bf16 %v6643_v27, %v6640_v26  ;;  %v6658_v32 = vld [vmem:[%s6564_s27 + $0x98] sm:$0xff]  ;;  %v6661_v33 = vld [vmem:[%s6564_s27 + $0xa0] sm:$0xff]  ;;  %v6664_v34 = vld [vmem:[%s6564_s27 + $0xc8] sm:$0xff]  ;;  %v5243_v35 = vpack.i.bf16 %v6655_v31, %v6652_v30  ;;  %v6743_v10 = vsel %vm863_vm0, %v870_v59, %v871_v54  ;;  %v889_v51 = vrot.slane %v6634_v24, 1 }
  0x1d   : > { %5194 = vrot.lane.b32.xlu0 %v5193_v11, %s6449_s28  ;;  %10102 = vst [vmem:[#allocation4_spill] sm:$0xff] %v6658_v32  ;;  %v5238_v36 = vpack.i.bf16 %v6661_v33, %v6658_v32  ;;  %v6673_v37 = vld [vmem:[%s6564_s27 + $0xd0] sm:$0xff]  ;;  %v6676_v38 = vld [vmem:[%s6564_s27 + $0xe0] sm:$0xff]  ;;  %v6679_v39 = vld [vmem:[%s6564_s27 + $0xb8] sm:$0xff]  ;;  %v877_v11 = vrot.slane %v6598_v12, 1  ;;  %v891_v59 = vrot.slane %v6637_v25, 1 }
  0x1e   : > { %10103 = vst [vmem:[#allocation5_spill] sm:$0xff] %v6676_v38  ;;  %v6682_v40 = vld [vmem:[%s6564_s27 + $0xc0] sm:$0xff]  ;;  %v6685_v41 = vld [vmem:[%s6564_s27 + $0xe8] sm:$0xff]  ;;  %v906_v42 = vrot.slane %v6676_v38, 1  ;;  %v5253_v46 = vpack.i.bf16 %v6673_v37, %v6664_v34  ;;  %v6704_v50 = vld [vmem:[%s6564_s27 + $0xd8] sm:$0xff] }
  0x1f   : > { %10104 = vst [vmem:[#allocation6_spill] sm:$0xff] %v6685_v41  ;;  %v907_v43 = vrot.slane %v6685_v41, 1  ;;  %v5248_v47 = vpack.i.bf16 %v6682_v40, %v6679_v39  ;;  %v5258_v56 = vpack.i.bf16 %v6676_v38, %v6704_v50  ;;  %v928_v44 = vsel %vm863_vm0, %v877_v11, 0.0  ;;  %v6771_v54 = vld [vmem:[%s6564_s27 + $0xf8] sm:$0xff] }
  0x20   : > { %5214 = vrot.lane.b32.xlu1 %v5213_v16, %s6449_s28  ;;  %v6747_v16 = vsel %vm863_vm0, %v868_v52, 0.0  ;;  %v6768_v52 = vld [vmem:[%s6564_s27 + $0xf0] sm:$0xff]  ;;  %v942_v4 = vrot.slane %v6771_v54, 7  ;;  %s6457_s27 = smov 32  }
  0x21   : > { %5209 = vrot.lane.b32.xlu0 %v5208_v17, %s6449_s28  ;;  %v6698_v48 = vsel %vm863_vm0, %v906_v42, %v907_v43  ;;  %v6701_v49 = vsel %vm863_vm0, %v907_v43, 0.0  ;;  %v879_v17 = vrot.slane %v6601_v13, 1  ;;  %v5278_v42 = vpack.i.bf16 %v6740_v5, %v6732_v63 }
  0x22   : > { %v6710_v53 = vpack.i.bf16 %v6701_v49, %v6698_v48  ;;  %v5273_v43 = vpack.i.bf16 %v6743_v10, %v6747_v16 }
  0x24   : > { %5224 = vrot.lane.b32.xlu1 %v5223_v22, %s6449_s28  ;;  %10105 = vst [vmem:[#allocation7_spill] sm:$0xff] %v6710_v53  ;;  %v880_v22 = vrot.slane %v6622_v20, 1 }
  0x25   : > { %5219 = vrot.lane.b32.xlu0 %v5218_v23, %s6449_s28  ;;  %v876_v23 = vrot.slane %v6607_v15, 1 }
  0x26   : > { %v881_v45 = vsel %vm863_vm0, %v879_v17, %v880_v22 }
  0x27   : > { %v5288_v17 = vpack.i.bf16 %v881_v45, %v928_v44 }
  0x28   : > { %5234 = vrot.lane.b32.xlu1 %v5233_v28, %s6449_s28  ;;  %v883_v28 = vrot.slane %v6616_v18, 1 }
  0x29   : > { %5229 = vrot.lane.b32.xlu0 %v5228_v29, %s6449_s28  ;;  %v885_v29 = vrot.slane %v6619_v19, 1 }
  0x2c   : > { %5244 = vrot.lane.b32.xlu1 %v5243_v35, %s6449_s28  ;;  %v886_v35 = vrot.slane %v6640_v26, 1 }
  0x2d   : > { %5239 = vrot.lane.b32.xlu0 %v5238_v36, %s6449_s28  ;;  %v882_v36 = vrot.slane %v6625_v21, 1 }
  0x2e   : > { %v6774_v55 = vsel %vm863_vm0, %v885_v29, %v886_v35  ;;  %v941_v29 = vrot.slane %v6768_v52, 7 }
  0x2f   : > { %10106 = vst [vmem:[#allocation8_spill] sm:$0xff] %v6774_v55 }
  0x30   : > { %5254 = vrot.lane.b32.xlu1 %v5253_v46, %s6449_s28  ;;  %v878_v46 = vsel %vm863_vm0, %v876_v23, %v877_v11  ;;  %v929_v11 = vsel %vm863_vm0, %v880_v22, 0.0  ;;  %v6791_v22 = vsel %vm863_vm0, %v886_v35, 0.0  ;;  %v945_v38 = vsel %vm767_vm1, 0.0, %v941_v29 }
  0x31   : > { %5249 = vrot.lane.b32.xlu0 %v5248_v47, %s6449_s28  ;;  %v927_v47 = vsel %vm863_vm0, %v874_v58, 0.0  ;;  %v888_v58 = vrot.slane %v6643_v27, 1  ;;  %10108 = vst [vmem:[#allocation10_spill] sm:$0xff] %v6791_v22  ;;  %v898_v27 = vrot.slane %v6679_v39, 1  ;;  %v894_v35 = vrot.slane %v6661_v33, 1 }
  0x32   : > { %v5283_v23 = vpack.i.bf16 %v878_v46, %v927_v47 }
  0x33   : > { %v6800_v24 = vsel %vm863_vm0, %v888_v58, %v889_v51  ;;  %v6825_v58 = vpack.i.bf16 %v6598_v12, %v6607_v15 }
  0x34   : > { %1015 = vrot.lane.b32.xlu1 %v6685_v41, %s6449_s28  ;;  %v6788_v41 = vsel %vm863_vm0, %v889_v51, 0.0  ;;  %10110 = vst [vmem:[#allocation12_spill] sm:$0xff] %v6800_v24  ;;  %v901_v51 = vrot.slane %v6664_v34, 1 }
  0x35   : > { %5259 = vrot.lane.b32.xlu0 %v5258_v56, %s6449_s28  ;;  %v930_v56 = vsel %vm863_vm0, %v883_v28, 0.0  ;;  %10107 = vst [vmem:[#allocation9_spill] sm:$0xff] %v6788_v41  ;;  %10113 = vst [vmem:[#allocation15_spill] sm:$0xff] %v6825_v58  ;;  %s6460_s28 = smov 64  }
  0x36   : > { %v5298_v53 = vpack.i.bf16 %v6774_v55, %v930_v56  ;;  %v897_v55 = vrot.slane %v6655_v31, 1 }
  0x38   : > { %5269 = vrot.lane.b32.xlu1 %v5268_v3, %s6450_s29  ;;  %v884_v3 = vsel %vm863_vm0, %v882_v36, %v883_v28  ;;  %v895_v28 = vrot.slane %v6652_v30, 1  ;;  %v6842_v58 = vsel %vm863_vm0, %v897_v55, %v898_v27  ;;  %v6859_v55 = vsel %vm863_vm0, %v898_v27, 0.0 }
  0x39   : > { %5264 = vrot.lane.b32.xlu0 %v5263_v62, %s6450_s29  ;;  %v892_v62 = vrot.slane %v6658_v32, 1  ;;  %v5293_v36 = vpack.i.bf16 %v884_v3, %v929_v11 }
  0x3c   : > { %5279 = vrot.lane.b32.xlu1 %v5278_v42, %s6450_s29  ;;  %v6795_v42 = vsel %vm863_vm0, %v891_v59, %v892_v62  ;;  %v6817_v59 = vpack.i.bf16 %v6604_v14, %v6583_v7 }
  0x3d   : > { %5274 = vrot.lane.b32.xlu0 %v5273_v43, %s6450_s29  ;;  %10109 = vst [vmem:[#allocation11_spill] sm:$0xff] %v6795_v42  ;;  %v943_v43 = vsel %vm767_vm1, %v941_v29, %v942_v4  ;;  %v6811_v4 = vpack.i.bf16 %v6567_v0, %v6589_v9  ;;  %v6832_v29 = vsel %vm863_vm0, %v895_v28, 0.0 }
  0x3e   : > { %v6804_v32 = vpack.i.bf16 %v943_v43, %v945_v38  ;;  %v6821_v38 = vpack.i.bf16 %v6580_v6, %v6570_v1  ;;  %v6835_v43 = vsel %vm863_vm0, %v892_v62, 0.0  ;;  %v6851_v62 = vpack.i.bf16 %v6747_v16, %v6724_v60 }
  0x3f   : > { %v5318_v60 = vpack.i.bf16 %v6842_v58, %v6832_v29 }
  0x40   : > { %10111 = vst [vmem:[#allocation13_spill] sm:$0xff] %v6804_v32  ;;  %5289 = vrot.lane.b32.xlu1 %v5288_v17, %s6450_s29  ;;  %10112 = vst [vmem:[#allocation14_spill] sm:$0xff] %v6821_v38  ;;  %v5308_v17 = vpack.i.bf16 %v6795_v42, %v6788_v41  ;;  %v903_v38 = vrot.slane %v6673_v37, 1  ;;  %v6845_v41 = vsel %vm863_vm0, %v894_v35, %v895_v28  ;;  %v900_v42 = vrot.slane %v6682_v40, 1 }
  0x41   : > { %5284 = vrot.lane.b32.xlu0 %v5283_v23, %s6450_s29  ;;  %v5303_v23 = vpack.i.bf16 %v6800_v24, %v6791_v22  ;;  %v904_v24 = vrot.slane %v6704_v50, 1  ;;  %v6863_v28 = vpack.i.bf16 %v6732_v63, %v6743_v10  ;;  %v6867_v35 = vpack.i.bf16 %v928_v44, %v878_v46 }
  0x42   : > { %v5313_v16 = vpack.i.bf16 %v6845_v41, %v6835_v43  ;;  %v6884_v63 = vsel %vm863_vm0, %v900_v42, %v901_v51  ;;  %v773_v10 = vrot.slane %v6589_v9, 7  ;;  %v946_v44 = vrot.slane %v6768_v52, 1 }
  0x43   : > { %v6881_v27 = vsel %vm863_vm0, %v903_v38, %v904_v24  ;;  %v770_v46 = vrot.slane %v6573_v2, 7  ;;  %v5323_v9 = vpack.i.bf16 %v6884_v63, %v6859_v55  ;;  %v797_v22 = vrot.slane %v6637_v25, 7 }
  0x44   : > { %5299 = vrot.lane.b32.xlu1 %v5298_v53, %s6450_s29  ;;  %v6856_v53 = vpack.i.bf16 %v927_v47, %v6740_v5  ;;  %v6874_v5 = vsel %vm863_vm0, %v901_v51, 0.0  ;;  %v6876_v47 = vpack.i.bf16 %v930_v56, %v884_v3  ;;  %v947_v56 = vrot.slane %v6771_v54, 1 }
  0x45   : > { %5294 = vrot.lane.b32.xlu0 %v5293_v36, %s6450_s29  ;;  %v6865_v36 = vpack.i.bf16 %v929_v11, %v881_v45  ;;  %v774_v45 = vrot.slane %v6567_v0, 7  ;;  %v771_v3 = vrot.slane %v6586_v8, 7  ;;  %v5328_v0 = vpack.i.bf16 %v6881_v27, %v6874_v5 }
  0x46   : > { %v948_v11 = vsel %vm863_vm0, %v946_v44, %v947_v56  ;;  %v950_v38 = vsel %vm863_vm0, %v947_v56, 0.0  ;;  %v6903_v51 = vsel %vm863_vm0, %v904_v24, 0.0  ;;  %v779_v44 = vrot.slane %v6583_v7, 7 }
  0x47   : > { %v6900_v42 = vpack.i.bf16 %v950_v38, %v948_v11  ;;  %v6914_v56 = vsel %vm767_vm1, %v770_v46, %v771_v3  ;;  %v5333_v24 = vpack.i.bf16 %v6698_v48, %v6903_v51  ;;  %v776_v7 = vrot.slane %v6570_v1, 7 }
  0x48   : > { %5309 = vrot.lane.b32.xlu1 %v5308_v17, %s6450_s29  ;;  %v6451_v17 = vmov 0   ;;  %10116 = vst [vmem:[#allocation18_spill] sm:$0xff] %v6914_v56  ;;  %v6935_v3 = vsel %vm767_vm1, 0.0, %v779_v44  ;;  %v785_v11 = vrot.slane %v6601_v13, 7  ;;  %v786_v48 = vrot.slane %v6622_v20, 7 }
  0x49   : > { %5304 = vrot.lane.b32.xlu0 %v5303_v23, %s6450_s29  ;;  %5589 = vset.pattern.permute.xlu1 %v6451_v17  ;;  %v6906_v23 = vsel %vm767_vm1, 0.0, %v773_v10  ;;  %10119 = vst [vmem:[#allocation21_spill] sm:$0xff] %v6935_v3  ;;  %v782_v38 = vrot.slane %v6607_v15, 7 }
  0x4a   : > { %5588 = vset.pattern.permute.xlu0 %v6451_v17  ;;  %10114 = vst [vmem:[#allocation16_spill] sm:$0xff] %v6906_v23  ;;  %v6917_v17 = vsel %vm767_vm1, 0.0, %v770_v46 }
  0x4b   : > { %10117 = vst [vmem:[#allocation19_spill] sm:$0xff] %v6917_v17  ;;  %v6971_v15 = vsel %vm767_vm1, 0.0, %v782_v38 }
  0x4c   : > { %5319 = vrot.lane.b32.xlu1 %v5318_v60, %s6450_s29  ;;  %v780_v60 = vrot.slane %v6604_v14, 7  ;;  %v777_v14 = vrot.slane %v6580_v6, 7  ;;  %v6946_v6 = vsel %vm767_vm1, 0.0, %v776_v7  ;;  %10125 = vst [vmem:[#allocation27_spill] sm:$0xff] %v6971_v15 }
  0x4d   : > { %5314 = vrot.lane.b32.xlu0 %v5313_v16, %s6450_s29  ;;  %v6911_v16 = vsel %vm767_vm1, %v773_v10, %v774_v45  ;;  %v5338_v45 = vpack.i.bf16 %v6914_v56, %v6917_v17  ;;  %10121 = vst [vmem:[#allocation23_spill] sm:$0xff] %v6946_v6 }
  0x4e   : > { %10115 = vst [vmem:[#allocation17_spill] sm:$0xff] %v6911_v16  ;;  %v6927_v10 = vpack.i.bf16 %v6911_v16, %v6906_v23  ;;  %v6932_v46 = vsel %vm767_vm1, %v779_v44, %v780_v60  ;;  %v6943_v1 = vsel %vm767_vm1, %v776_v7, %v777_v14  ;;  %v6962_v60 = vsel %vm767_vm1, 0.0, %v785_v11  ;;  %v10132_v23 = vld [vmem:[#allocation2_spill] sm:$0xff] }
  0x4f   : > { %10118 = vst [vmem:[#allocation20_spill] sm:$0xff] %v6932_v46  ;;  %10120 = vst [vmem:[#allocation22_spill] sm:$0xff] %v6943_v1  ;;  %v6956_v44 = vpack.i.bf16 %v6943_v1, %v6946_v6  ;;  %v792_v7 = vrot.slane %v6640_v26, 7  ;;  %v788_v14 = vrot.slane %v6625_v21, 7  ;;  %v795_v1 = vrot.slane %v10132_v23, 7 }
  0x50   : > { %5329 = vrot.lane.b32.xlu1 %v5328_v0, %s6450_s29  ;;  %v783_v0 = vrot.slane %v6598_v12, 7  ;;  %10123 = vst [vmem:[#allocation25_spill] sm:$0xff] %v6962_v60  ;;  %v800_v16 = vrot.slane %v6661_v33, 7  ;;  %v801_v6 = vrot.slane %v6652_v30, 7 }
  0x51   : > { %5324 = vrot.lane.b32.xlu0 %v5323_v9, %s6450_s29  ;;  %v6952_v9 = vpack.i.bf16 %v6932_v46, %v6935_v3  ;;  %v7022_v3 = vsel %vm767_vm1, 0.0, %v797_v22 }
  0x52   : > { %v6968_v12 = vsel %vm767_vm1, %v782_v38, %v783_v0  ;;  %10136 = vst [vmem:[#allocation32_spill] sm:$0xff] %v7022_v3 }
  0x53   : > { %10124 = vst [vmem:[#allocation26_spill] sm:$0xff] %v6968_v12 }
  0x54   : > { %1123 = vrot.lane.b32.xlu1 %v6701_v49, %s6450_s29  ;;  %v6959_v49 = vsel %vm767_vm1, %v785_v11, %v786_v48  ;;  %v789_v11 = vrot.slane %v6616_v18, 7 }
  0x55   : > { %5334 = vrot.lane.b32.xlu0 %v5333_v24, %s6450_s29  ;;  %10122 = vst [vmem:[#allocation24_spill] sm:$0xff] %v6959_v49  ;;  %v791_v24 = vrot.slane %v6619_v19, 7  ;;  %v6979_v48 = vpack.i.bf16 %v6959_v49, %v6962_v60  ;;  %v10128_v49 = vld [vmem:[#allocation4_spill] sm:$0xff] }
  0x56   : > { %v798_v46 = vrot.slane %v10128_v49, 7  ;;  %v6998_v60 = vsel %vm767_vm1, %v788_v14, %v789_v11 }
  0x57   : > { %v6990_v38 = vsel %vm767_vm1, %v791_v24, %v792_v7  ;;  %v6993_v0 = vsel %vm767_vm1, 0.0, %v791_v24  ;;  %10129 = vst [vmem:[#allocation4_spill] sm:$0xff] %v6998_v60  ;;  %v803_v24 = vrot.slane %v6655_v31, 7 }
  0x58   : > { %5344 = vrot.lane.b32.xlu1 %v6927_v10, %s6452_s30  ;;  %10126 = vst [vmem:[#allocation28_spill] sm:$0xff] %v6990_v38  ;;  %10127 = vst [vmem:[#allocation29_spill] sm:$0xff] %v6993_v0  ;;  %v7007_v7 = vpack.i.bf16 %v6990_v38, %v6993_v0  ;;  %v7019_v11 = vsel %vm767_vm1, %v797_v22, %v798_v46  ;;  %v804_v38 = vrot.slane %v6679_v39, 7 }
  0x59   : > { %5339 = vrot.lane.b32.xlu0 %v5338_v45, %s6452_s30  ;;  %v6983_v45 = vpack.i.bf16 %v6968_v12, %v6971_v15  ;;  %v7001_v15 = vsel %vm767_vm1, 0.0, %v788_v14  ;;  %v10131_v12 = vld [vmem:[#allocation3_spill] sm:$0xff]  ;;  %10135 = vst [vmem:[#allocation31_spill] sm:$0xff] %v7019_v11  ;;  %v7038_v46 = vsel %vm767_vm1, 0.0, %v803_v24 }
  0x5a   : > { %10130 = vst [vmem:[#allocation30_spill] sm:$0xff] %v7001_v15  ;;  %v794_v56 = vrot.slane %v10131_v12, 7  ;;  %10133 = vst [vmem:[#allocation3_spill] sm:$0xff] %v7007_v7  ;;  %v7016_v14 = vpack.i.bf16 %v6998_v60, %v7001_v15  ;;  %v7035_v15 = vpack.i.bf16 %v7019_v11, %v7022_v3  ;;  %v810_v11 = vrot.slane %v6704_v50, 7 }
  0x5b   : > { %10140 = vst [vmem:[#allocation36_spill] sm:$0xff] %v7038_v46  ;;  %v7054_v3 = vsel %vm767_vm1, %v800_v16, %v801_v6  ;;  %v7057_v60 = vsel %vm767_vm1, 0.0, %v800_v16 }
  0x5c   : > { %5354 = vrot.lane.b32.xlu1 %v6952_v9, %s6452_s30  ;;  %10134 = vst [vmem:[#allocation2_spill] sm:$0xff] %v7016_v14  ;;  %v7026_v0 = vsel %vm767_vm1, %v794_v56, %v795_v1  ;;  %v7029_v17 = vsel %vm767_vm1, 0.0, %v794_v56  ;;  %10139 = vst [vmem:[#allocation35_spill] sm:$0xff] %v7035_v15  ;;  %v7049_v56 = vsel %vm767_vm1, %v803_v24, %v804_v38  ;;  %v809_v1 = vrot.slane %v6673_v37, 7 }
  0x5d   : > { %5349 = vrot.lane.b32.xlu0 %v6956_v44, %s6452_s30  ;;  %10137 = vst [vmem:[#allocation33_spill] sm:$0xff] %v7026_v0  ;;  %10138 = vst [vmem:[#allocation34_spill] sm:$0xff] %v7029_v17  ;;  %v7046_v22 = vpack.i.bf16 %v7026_v0, %v7029_v17  ;;  %v7067_v38 = vpack.i.bf16 %v7049_v56, %v7038_v46  ;;  %v7071_v6 = vpack.i.bf16 %v7054_v3, %v7057_v60 }
  0x5e   : > { %10142 = vst [vmem:[#allocation38_spill] sm:$0xff] %v7049_v56  ;;  %10143 = vst [vmem:[#allocation39_spill] sm:$0xff] %v7054_v3  ;;  %v7074_v16 = vsel %vm767_vm1, %v809_v1, %v810_v11  ;;  %v7077_v24 = vsel %vm767_vm1, 0.0, %v809_v1  ;;  %v10146_v56 = vld [vmem:[#allocation6_spill] sm:$0xff]  ;;  %v7129_v3 = vpack.i.bf16 %v6622_v20, %v6601_v13  ;;  %v7149_v13 = vpack.i.bf16 %v10128_v49, %v6637_v25 }
  0x5f   : > { %10141 = vst [vmem:[#allocation37_spill] sm:$0xff] %v7046_v22  ;;  %10144 = vst [vmem:[#allocation40_spill] sm:$0xff] %v7057_v60  ;;  %v813_v46 = vrot.slane %v10146_v56, 7  ;;  %v7093_v11 = vpack.i.bf16 %v7074_v16, %v7077_v24  ;;  %v7153_v20 = vpack.i.bf16 %v10132_v23, %v10131_v12 }
  0x60   : > { %5364 = vrot.lane.b32.xlu1 %v6979_v48, %s6452_s30 }
  0x61   : > { %5359 = vrot.lane.b32.xlu0 %v6983_v45, %s6452_s30 }
  0x64   : > { %5374 = vrot.lane.b32.xlu1 %v7007_v7, %s6452_s30  ;;  %v806_v7 = vrot.slane %v6682_v40, 7 }
  0x65   : > { %5369 = vrot.lane.b32.xlu0 %v7016_v14, %s6452_s30  ;;  %v807_v14 = vrot.slane %v6664_v34, 7 }
  0x66   : > { %v7083_v0 = vsel %vm767_vm1, 0.0, %v806_v7 }
  0x67   : > { %v7080_v17 = vsel %vm767_vm1, %v806_v7, %v807_v14 }
  0x68   : > { %5384 = vrot.lane.b32.xlu1 %v7035_v15, %s6452_s30  ;;  %v10145_v15 = vld [vmem:[#allocation5_spill] sm:$0xff]  ;;  %v7097_v14 = vpack.i.bf16 %v7080_v17, %v7083_v0 }
  0x69   : > { %5379 = vrot.lane.b32.xlu0 %v7046_v22, %s6452_s30  ;;  %v812_v22 = vrot.slane %v10145_v15, 7 }
  0x6b   : > { %v7100_v7 = vsel %vm767_vm1, %v812_v22, %v813_v46  ;;  %v7103_v1 = vsel %vm767_vm1, 0.0, %v812_v22  ;;  %v10147_v46 = vpack.i.bf16 %v6586_v8, %v6573_v2  ;;  %v10148_v22 = vld [vmem:[#allocation14_spill] sm:$0xff]  ;;  %v7137_v2 = vpack.i.bf16 %v6640_v26, %v6619_v19 }
  0x6c   : > { %5394 = vrot.lane.b32.xlu1 %v7067_v38, %s6452_s30  ;;  %v7111_v60 = vpack.i.bf16 %v7100_v7, %v7103_v1  ;;  %v7141_v8 = vpack.i.bf16 %v6616_v18, %v6625_v21  ;;  %v7161_v18 = vpack.i.bf16 %v6679_v39, %v6655_v31  ;;  %v7165_v19 = vpack.i.bf16 %v6652_v30, %v6661_v33 }
  0x6d   : > { %5389 = vrot.lane.b32.xlu0 %v7071_v6, %s6452_s30  ;;  %v7177_v26 = vpack.i.bf16 %v6704_v50, %v6673_v37  ;;  %v7181_v31 = vpack.i.bf16 %v6664_v34, %v6682_v40  ;;  %v7193_v39 = vpack.i.bf16 %v6771_v54, %v6768_v52  ;;  %v7197_v37 = vpack.i.bf16 %v10146_v56, %v10145_v15 }
  0x6e   : > { %v10154_v52 = vpack.i.bf16 %v6727_v61, %v6719_v57  ;;  %v10158_v57 = vld [vmem:[#allocation8_spill] sm:$0xff]  ;;  %v10159_v61 = vld [vmem:[#allocation10_spill] sm:$0xff] }
  0x6f   : > { %v7235_v56 = vpack.i.bf16 %v10159_v61, %v10158_v57 }
  0x70   : > { %5404 = vrot.lane.b32.xlu1 %v7093_v11, %s6452_s30 }
  0x71   : > { %5399 = vrot.lane.b32.xlu0 %v7097_v14, %s6452_s30 }
  0x74   : > { %5414 = vrot.lane.b32.xlu1 %v6804_v32, %s6452_s30  ;;  %v10149_v32 = vld [vmem:[#allocation15_spill] sm:$0xff] }
  0x75   : > { %5409 = vrot.lane.b32.xlu0 %v7111_v60, %s6452_s30  ;;  %s5165_s30 = smul.u32 72, %s10447_s22 }
  0x78   : > { %5424 = vrot.lane.b32.xlu1 %v6811_v4, %s6453_s0 }
  0x79   : > { %5419 = vrot.lane.b32.xlu0 %v10147_v46, %s6453_s0 }
  0x7c   : > { %5434 = vrot.lane.b32.xlu1 %v6817_v59, %s6453_s0 }
  0x7d   : > { %5429 = vrot.lane.b32.xlu0 %v10148_v22, %s6453_s0 }
  0x80   : > { %5444 = vrot.lane.b32.xlu1 %v7129_v3, %s6453_s0 }
  0x81   : > { %5439 = vrot.lane.b32.xlu0 %v10149_v32, %s6453_s0 }
  0x84   : > { %5454 = vrot.lane.b32.xlu1 %v7137_v2, %s6453_s0 }
  0x85   : > { %5449 = vrot.lane.b32.xlu0 %v7141_v8, %s6453_s0 }
  0x88   : > { %5464 = vrot.lane.b32.xlu1 %v7149_v13, %s6453_s0 }
  0x89   : > { %5459 = vrot.lane.b32.xlu0 %v7153_v20, %s6453_s0 }
  0x8a   : > { %v7167_v21 = vpop.permute.xlu1 %5199 }
  0x8b   : > { %v7169_v25 = vpop.permute.xlu0 %5189 }
  0x8c   : > { %5474 = vrot.lane.b32.xlu1 %v7161_v18, %s6453_s0 }
  0x8d   : > { %5469 = vrot.lane.b32.xlu0 %v7165_v19, %s6453_s0 }
  0x8e   : > { %v7183_v30 = vpop.permute.xlu1 %5204 }
  0x8f   : > { %v7185_v33 = vpop.permute.xlu0 %5194 }
  0x90   : > { %5484 = vrot.lane.b32.xlu1 %v7177_v26, %s6453_s0 }
  0x91   : > { %5479 = vrot.lane.b32.xlu0 %v7181_v31, %s6453_s0 }
  0x92   : > { %v7199_v34 = vpop.permute.xlu1 %5214 }
  0x93   : > { %10150 = vst [vmem:[#allocation5_spill] sm:$0xff] %v7199_v34  ;;  %v7201_v40 = vpop.permute.xlu0 %5209 }
  0x94   : > { %10151 = vst [vmem:[#allocation6_spill] sm:$0xff] %v7201_v40  ;;  %5494 = vrot.lane.b32.xlu1 %v7193_v39, %s6453_s0  ;;  %v7263_v40 = vpack.i.bf16 %v6859_v55, %v6842_v58  ;;  %v7283_v58 = vpack.i.bf16 %v6874_v5, %v6884_v63  ;;  %v10169_v5 = vld [vmem:[#allocation7_spill] sm:$0xff] }
  0x95   : > { %5489 = vrot.lane.b32.xlu0 %v7197_v37, %s6453_s0 }
  0x96   : > { %v7207_v50 = vpop.permute.xlu1 %5224 }
  0x97   : > { %10152 = vst [vmem:[#allocation14_spill] sm:$0xff] %v7207_v50  ;;  %v7209_v23 = vpop.permute.xlu0 %5219 }
  0x98   : > { %10153 = vst [vmem:[#allocation15_spill] sm:$0xff] %v7209_v23  ;;  %5504 = vrot.lane.b32.xlu1 %v6851_v62, %s6454_s17  ;;  %v10162_v23 = vld [vmem:[#allocation9_spill] sm:$0xff] }
  0x99   : > { %5499 = vrot.lane.b32.xlu0 %v10154_v52, %s6454_s17 }
  0x9a   : > { %v7217_v54 = vpop.permute.xlu1 %5234 }
  0x9b   : > { %10155 = vst [vmem:[#allocation41_spill] sm:$0xff] %v7217_v54  ;;  %v7219_v49 = vpop.permute.xlu0 %5229  ;;  %v10161_v54 = vld [vmem:[#allocation12_spill] sm:$0xff] }
  0x9c   : > { %10156 = vst [vmem:[#allocation42_spill] sm:$0xff] %v7219_v49  ;;  %5514 = vrot.lane.b32.xlu1 %v6856_v53, %s6454_s17  ;;  %v7251_v50 = vpack.i.bf16 %v10162_v23, %v10161_v54 }
  0x9d   : > { %5509 = vrot.lane.b32.xlu0 %v6863_v28, %s6454_s17 }
  0x9e   : > { %v7225_v12 = vpop.permute.xlu1 %5244 }
  0x9f   : > { %v7227_v15 = vpop.permute.xlu0 %5239 }
  0xa0   : > { %10157 = vst [vmem:[#allocation43_spill] sm:$0xff] %v7227_v15  ;;  %5524 = vrot.lane.b32.xlu1 %v6865_v36, %s6454_s17  ;;  %v10160_v15 = vld [vmem:[#allocation11_spill] sm:$0xff] }
  0xa1   : > { %5519 = vrot.lane.b32.xlu0 %v6867_v35, %s6454_s17  ;;  %v7247_v49 = vpack.i.bf16 %v6835_v43, %v10160_v15  ;;  %v7267_v43 = vpack.i.bf16 %v6832_v29, %v6845_v41  ;;  %v7279_v15 = vpack.i.bf16 %v6903_v51, %v6881_v27  ;;  %v731_v51 = vld [vmem:[%s634_s24 + $0x8] sm:$0xff] }
  0xa2   : > { %v7237_v46 = vpop.permute.xlu1 %5254 }
  0xa3   : > { %v7239_v52 = vpop.permute.xlu0 %5249 }
  0xa4   : > { %5534 = vrot.lane.b32.xlu1 %v7235_v56, %s6454_s17 }
  0xa5   : > { %5529 = vrot.lane.b32.xlu0 %v6876_v47, %s6454_s17 }
  0xa6   : > { %v7253_v57 = vpop.permute.xlu1 %1015 }
  0xa7   : > { %v7255_v61 = vpop.permute.xlu0 %5259 }
  0xa8   : > { %5544 = vrot.lane.b32.xlu1 %v7247_v49, %s6454_s17 }
  0xa9   : > { %5539 = vrot.lane.b32.xlu0 %v7251_v50, %s6454_s17 }
  0xaa   : > { %v7269_v23 = vpop.permute.xlu1 %5269 }
  0xab   : > { %10163 = vst [vmem:[#allocation8_spill] sm:$0xff] %v7269_v23  ;;  %v7271_v54 = vpop.permute.xlu0 %5264 }
  0xac   : > { %10164 = vst [vmem:[#allocation10_spill] sm:$0xff] %v7271_v54  ;;  %5554 = vrot.lane.b32.xlu1 %v7263_v40, %s6454_s17 }
  0xad   : > { %5549 = vrot.lane.b32.xlu0 %v7267_v43, %s6454_s17 }
  0xae   : > { %v7285_v41 = vpop.permute.xlu1 %5279 }
  0xaf   : > { %10165 = vst [vmem:[#allocation11_spill] sm:$0xff] %v7285_v41  ;;  %v7287_v29 = vpop.permute.xlu0 %5274 }
  0xb0   : > { %10166 = vst [vmem:[#allocation12_spill] sm:$0xff] %v7287_v29  ;;  %5564 = vrot.lane.b32.xlu1 %v7279_v15, %s6454_s17 }
  0xb1   : > { %5559 = vrot.lane.b32.xlu0 %v7283_v58, %s6454_s17 }
  0xb2   : > { %v7293_v55 = vpop.permute.xlu1 %5289 }
  0xb3   : > { %10167 = vst [vmem:[#allocation9_spill] sm:$0xff] %v7293_v55  ;;  %v7295_v54 = vpop.permute.xlu0 %5284 }
  0xb4   : > { %10168 = vst [vmem:[#allocation44_spill] sm:$0xff] %v7295_v54  ;;  %5574 = vrot.lane.b32.xlu1 %v6900_v42, %s6454_s17  ;;  %v730_v54 = vld [vmem:[%s634_s24] sm:$0xff] }
  0xb5   : > { %5569 = vrot.lane.b32.xlu0 %v10169_v5, %s6454_s17  ;;  %s7574_s17 = scalar_lea.vmem %s9918_s1, %s6558_s23 }
  0xb6   : > { %v7302_v27 = vpop.permute.xlu1 %5299 }
  0xb7   : > { %10170 = vst [vmem:[#allocation7_spill] sm:$0xff] %v7302_v27  ;;  %v7304_v63 = vpop.permute.xlu0 %5294  ;;  %v733_v27 = vld [vmem:[%s634_s24 + $0x18] sm:$0xff] }
  0xb8   : > { %10171 = vst [vmem:[#allocation45_spill] sm:$0xff] %v7304_v63  ;;  %5584 = vrot.lane.b32.xlu1 %v6956_v44, %s6455_s25  ;;  %v732_v63 = vld [vmem:[%s634_s24 + $0x10] sm:$0xff]  ;;  %v734_v44 = vld [vmem:[%s634_s24 + $0x20] sm:$0xf]  ;;  %s6458_s24 = smov 56  }
  0xb9   : > { %5579 = vrot.lane.b32.xlu0 %v6927_v10, %s6455_s25 }
  0xba   : > { %v7313_v55 = vpop.permute.xlu1 %5309 }
  0xbb   : > { %v7315_v29 = vpop.permute.xlu0 %5304 }
  0xbc   : > { %2035 = vperm.xlu1 %5589, %v731_v51  }
  0xbd   : > { %2030 = vperm.xlu0 %5588, %v730_v54  }
  0xbe   : > { %v7317_v41 = vpop.permute.xlu1 %5319 }
  0xbf   : > { %v7319_v23 = vpop.permute.xlu0 %5314 }
  0xc0   : > { %10172 = vst [vmem:[#allocation46_spill] sm:$0xff] %v7319_v23  ;;  %2040 = vperm.xlu1 %5589, %v732_v63  }
  0xc1   : > { %2045 = vperm.xlu0 %5588, %v733_v27  }
  0xc2   : > { %v7321_v34 = vpop.permute.xlu1 %5329 }
  0xc3   : > { %v7323_v10 = vpop.permute.xlu0 %5324 }
  0xc4   : > { %2050 = vperm.xlu1 %5589, %v734_v44  }
  0xc5   : > { %5591 = vrot.lane.b32.xlu0 %v6811_v4, %s6456_s26 }
  0xc6   : > { %v7327_v51 = vpop.permute.xlu1 %1123 }
  0xc7   : > { %v7329_v54 = vpop.permute.xlu0 %5334 }
  0xc8   : > { %5596 = vrot.lane.b32.xlu1 %v10148_v22, %s6456_s26 }
  0xc9   : > { %5601 = vrot.lane.b32.xlu0 %v6851_v62, %s6457_s27 }
  0xca   : > { %v7335_v27 = vpop.permute.xlu1 %5344 }
  0xcb   : > { %10173 = vst [vmem:[#allocation47_spill] sm:$0xff] %v7335_v27  ;;  %v7337_v63 = vpop.permute.xlu0 %5339 }
  0xcc   : > { %10174 = vst [vmem:[#allocation48_spill] sm:$0xff] %v7337_v63  ;;  %5606 = vrot.lane.b32.xlu1 %v6863_v28, %s6457_s27 }
  0xcd   : > { %5611 = vrot.lane.b32.xlu0 %v6952_v9, %s6455_s25 }
  0xce   : > { %v7343_v4 = vpop.permute.xlu1 %5354 }
  0xcf   : > { %10175 = vst [vmem:[#allocation49_spill] sm:$0xff] %v7343_v4  ;;  %v7345_v44 = vpop.permute.xlu0 %5349 }
  0xd0   : > { %10176 = vst [vmem:[#allocation50_spill] sm:$0xff] %v7345_v44  ;;  %5616 = vrot.lane.b32.xlu1 %v6983_v45, %s6455_s25 }
  0xd1   : > { %5621 = vrot.lane.b32.xlu0 %v6817_v59, %s6456_s26 }
  0xd2   : > { %v7351_v62 = vpop.permute.xlu1 %5364 }
  0xd3   : > { %10177 = vst [vmem:[#allocation51_spill] sm:$0xff] %v7351_v62  ;;  %v7353_v22 = vpop.permute.xlu0 %5359 }
  0xd4   : > { %10178 = vst [vmem:[#allocation52_spill] sm:$0xff] %v7353_v22  ;;  %5626 = vrot.lane.b32.xlu1 %v10149_v32, %s6456_s26  ;;  %v5247_v32 = vunpack.i.h.bf16 %v7225_v12  ;;  %v5257_v22 = vunpack.i.h.bf16 %v7237_v46 }
  0xd5   : > { %5631 = vrot.lane.b32.xlu0 %v6856_v53, %s6457_s27  ;;  %v10183_v53 = vld [vmem:[#allocation2_spill] sm:$0xff] }
  0xd6   : > { %v7359_v28 = vpop.permute.xlu1 %5374 }
  0xd7   : > { %10179 = vst [vmem:[#allocation53_spill] sm:$0xff] %v7359_v28  ;;  %v7361_v9 = vpop.permute.xlu0 %5369 }
  0xd8   : > { %10180 = vst [vmem:[#allocation54_spill] sm:$0xff] %v7361_v9  ;;  %5636 = vrot.lane.b32.xlu1 %v6867_v35, %s6457_s27  ;;  %v5256_v35 = vunpack.i.l.bf16 %v7237_v46  ;;  %v5252_v9 = vunpack.i.h.bf16 %v7239_v52  ;;  %v5327_v46 = vunpack.i.h.bf16 %v7323_v10 }
  0xd9   : > { %5641 = vrot.lane.b32.xlu0 %v6979_v48, %s6455_s25  ;;  %v5251_v48 = vunpack.i.l.bf16 %v7239_v52  ;;  %v5326_v52 = vunpack.i.l.bf16 %v7323_v10 }
  0xda   : > { %v7367_v59 = vpop.permute.xlu1 %5384 }
  0xdb   : > { %10181 = vst [vmem:[#allocation55_spill] sm:$0xff] %v7367_v59  ;;  %v7369_v45 = vpop.permute.xlu0 %5379  ;;  %v5331_v59 = vunpack.i.l.bf16 %v7321_v34 }
  0xdc   : > { %10182 = vst [vmem:[#allocation56_spill] sm:$0xff] %v7369_v45  ;;  %5646 = vrot.lane.b32.xlu1 %v10183_v53, %s6455_s25  ;;  %v5322_v45 = vunpack.i.h.bf16 %v7317_v41  ;;  %v10186_v53 = vld [vmem:[#allocation36_spill] sm:$0xff] }
  0xdd   : > { %5651 = vrot.lane.b32.xlu0 %v7129_v3, %s6456_s26  ;;  %v1773_v44 = vsel %vm1748_vm2, %v10186_v53, %v5247_v32  ;;  %v1777_v3 = vsel %vm1748_vm2, %v7077_v24, %v5257_v22  ;;  %v10187_v32 = vld [vmem:[#allocation38_spill] sm:$0xff]  ;;  %v5262_v24 = vunpack.i.h.bf16 %v7255_v61  ;;  %v5261_v22 = vunpack.i.l.bf16 %v7255_v61 }
  0xde   : > { %v7382_v28 = vpop.permute.xlu1 %5394  ;;  %v1774_v53 = vsel %vm1748_vm2, %v10187_v32, %v5251_v48  ;;  %v1806_v10 = vsel %vm1781_vm3, %v1773_v44, %v5322_v45  ;;  %v5337_v48 = vunpack.i.h.bf16 %v7329_v54  ;;  %v5336_v61 = vunpack.i.l.bf16 %v7329_v54 }
  0xdf   : > { %10184 = vst [vmem:[#allocation2_spill] sm:$0xff] %v7382_v28  ;;  %v7384_v62 = vpop.permute.xlu0 %5389  ;;  %v1776_v28 = vsel %vm1748_vm2, %v7080_v17, %v5256_v35  ;;  %v1780_v54 = vsel %vm1748_vm2, %v7100_v7, %v7253_v57 }
  0xe0   : > { %10185 = vst [vmem:[#allocation57_spill] sm:$0xff] %v7384_v62  ;;  %5656 = vrot.lane.b32.xlu1 %v7141_v8, %s6456_s26  ;;  %v1775_v62 = vsel %vm1748_vm2, %v7083_v0, %v5252_v9  ;;  %v5332_v8 = vunpack.i.h.bf16 %v7321_v34  ;;  %v1809_v4 = vsel %vm1781_vm3, %v1776_v28, %v5331_v59  ;;  %v1807_v9 = vsel %vm1781_vm3, %v1774_v53, %v5326_v52  ;;  %v10188_v34 = vld [vmem:[#allocation3_spill] sm:$0xff] }
  0xe1   : > { %5661 = vrot.lane.b32.xlu0 %v6865_v36, %s6457_s27  ;;  %v1808_v0 = vsel %vm1781_vm3, %v1775_v62, %v5327_v46  ;;  %v1778_v59 = vsel %vm1748_vm2, %v7074_v16, %v5261_v22 }
  0xe2   : > { %v5405_v36 = vpop.permute.xlu1 %5404  ;;  %v1810_v45 = vsel %vm1781_vm3, %v1777_v3, %v5332_v8  ;;  %v1811_v7 = vsel %vm1781_vm3, %v1778_v59, %v5336_v61 }
  0xe3   : > { %v5400_v63 = vpop.permute.xlu0 %5399  ;;  %v5407_v27 = vunpack.i.h.bf16 %v5405_v36  ;;  %v5406_v17 = vunpack.i.l.bf16 %v5405_v36  ;;  %v10190_v36 = vld [vmem:[#allocation35_spill] sm:$0xff] }
  0xe4   : > { %v5402_v35 = vunpack.i.h.bf16 %v5400_v63  ;;  %v5401_v23 = vunpack.i.l.bf16 %v5400_v63  ;;  %5666 = vrot.lane.b32.xlu1 %v6876_v47, %s6457_s27  ;;  %v1779_v47 = vsel %vm1748_vm2, %v7103_v1, %v5262_v24  ;;  %v10189_v1 = vld [vmem:[#allocation37_spill] sm:$0xff] }
  0xe5   : > { %5671 = vrot.lane.b32.xlu0 %v10188_v34, %s6455_s25  ;;  %v7416_v44 = vsel %vm1814_vm4, %v1808_v0, %v5406_v17  ;;  %v7419_v28 = vsel %vm1814_vm4, %v1809_v4, %v5407_v27 }
  0xe6   : > { %v7422_v63 = vsel %vm1814_vm4, %v1807_v9, %v5402_v35  ;;  %v7425_v62 = vsel %vm1814_vm4, %v1806_v10, %v5401_v23  ;;  %v5415_v27 = vpop.permute.xlu1 %5414  ;;  %v1813_v23 = vsel %vm1781_vm3, %v1780_v54, %v7327_v51  ;;  %v1812_v10 = vsel %vm1781_vm3, %v1779_v47, %v5337_v48 }
  0xe7   : > { %v5410_v4 = vpop.permute.xlu0 %5409  ;;  %v5417_v46 = vunpack.i.h.bf16 %v5415_v27  ;;  %v5416_v52 = vunpack.i.l.bf16 %v5415_v27  ;;  %v10195_v9 = vmov 0.0   ;;  %v5201_v47 = vunpack.i.l.bf16 %v7167_v21 }
  0xe8   : > { %v5412_v32 = vunpack.i.h.bf16 %v5410_v4  ;;  %v5411_v53 = vunpack.i.l.bf16 %v5410_v4  ;;  %5676 = vrot.lane.b32.xlu1 %v10189_v1, %s6455_s25  ;;  %v7532_v48 = vrot.slane %v10195_v9, 7  ;;  %v5192_v27 = vunpack.i.h.bf16 %v7169_v25 }
  0xe9   : > { %5681 = vrot.lane.b32.xlu0 %v7137_v2, %s6456_s26  ;;  %v7444_v16 = vsel %vm1814_vm4, %v1813_v23, %v5417_v46  ;;  %v7447_v57 = vsel %vm1814_vm4, %v1812_v10, %v5416_v52  ;;  %v5207_v4 = vunpack.i.h.bf16 %v7183_v30  ;;  %v5206_v46 = vunpack.i.l.bf16 %v7183_v30  ;;  %v661_v30 = vld [vmem:[%s7574_s17] sm:$0xff] }
  0xea   : > { %v7450_v3 = vsel %vm1814_vm4, %v1811_v7, %v5412_v32  ;;  %v7453_v51 = vsel %vm1814_vm4, %v1810_v45, %v5411_v53  ;;  %v7455_v24 = vpop.permute.xlu1 %5424  ;;  %10196 = vst [vmem:[#allocation35_spill] sm:$0xff] %v7532_v48  ;;  %v5196_v52 = vunpack.i.l.bf16 %v7185_v33  ;;  %v10204_v53 = vld [vmem:[#allocation23_spill] sm:$0xff]  ;;  %v10206_v7 = vld [vmem:[#allocation17_spill] sm:$0xff] }
  0xeb   : > { %v7457_v22 = vpop.permute.xlu0 %5419 }
  0xec   : > { %5686 = vrot.lane.b32.xlu1 %v7153_v20, %s6456_s26 }
  0xed   : > { %5691 = vrot.lane.b32.xlu0 %v7235_v56, %s6457_s27 }
  0xee   : > { %v7463_v2 = vpop.permute.xlu1 %5434 }
  0xef   : > { %v7465_v8 = vpop.permute.xlu0 %5429 }
  0xf0   : > { %5696 = vrot.lane.b32.xlu1 %v7251_v50, %s6457_s27 }
  0xf1   : > { %5701 = vrot.lane.b32.xlu0 %v10190_v36, %s6455_s25 }
  0xf2   : > { %v7471_v17 = vpop.permute.xlu1 %5444 }
  0xf3   : > { %v7473_v35 = vpop.permute.xlu0 %5439 }
  0xf4   : > { %5706 = vrot.lane.b32.xlu1 %v7071_v6, %s6455_s25 }
  0xf5   : > { %5711 = vrot.lane.b32.xlu0 %v7149_v13, %s6456_s26 }
  0xf6   : > { %v7479_v20 = vpop.permute.xlu1 %5454 }
  0xf7   : > { %v7481_v56 = vpop.permute.xlu0 %5449 }
  0xf8   : > { %5716 = vrot.lane.b32.xlu1 %v7165_v19, %s6456_s26 }
  0xf9   : > { %5721 = vrot.lane.b32.xlu0 %v7247_v49, %s6457_s27 }
  0xfa   : > { %v7487_v50 = vpop.permute.xlu1 %5464 }
  0xfb   : > { %10191 = vst [vmem:[#allocation36_spill] sm:$0xff] %v7487_v50  ;;  %v7489_v0 = vpop.permute.xlu0 %5459 }
  0xfc   : > { %10192 = vst [vmem:[#allocation38_spill] sm:$0xff] %v7489_v0  ;;  %5726 = vrot.lane.b32.xlu1 %v7267_v43, %s6457_s27  ;;  %v672_v0 = vld [vmem:[%s7574_s17 + $0x58] sm:$0xff] }
  0xfd   : > { %5731 = vrot.lane.b32.xlu0 %v7067_v38, %s6455_s25 }
  0xfe   : > { %v7495_v6 = vpop.permute.xlu1 %5474 }
  0xff   : > { %10193 = vst [vmem:[#allocation3_spill] sm:$0xff] %v7495_v6  ;;  %v7497_v13 = vpop.permute.xlu0 %5469  ;;  %v10213_v6 = vld [vmem:[#allocation18_spill] sm:$0xff] }
 0x100   : > { %10194 = vst [vmem:[#allocation37_spill] sm:$0xff] %v7497_v13  ;;  %5736 = vrot.lane.b32.xlu1 %v7097_v14, %s6455_s25 }
 0x101   : > { %5741 = vrot.lane.b32.xlu0 %v7161_v18, %s6456_s26 }
 0x102   : > { %v7503_v19 = vpop.permute.xlu1 %5484 }
 0x103   : > { %v7505_v49 = vpop.permute.xlu0 %5479  ;;  %v5487_v1 = vunpack.i.h.bf16 %v7503_v19  ;;  %v5486_v36 = vunpack.i.l.bf16 %v7503_v19  ;;  %v10210_v19 = vld [vmem:[#allocation21_spill] sm:$0xff] }
 0x104   : > { %5746 = vrot.lane.b32.xlu1 %v7181_v31, %s6456_s26 }
 0x105   : > { %5751 = vrot.lane.b32.xlu0 %v7263_v40, %s6457_s27 }
 0x106   : > { %v7511_v38 = vpop.permute.xlu1 %5494 }
 0x107   : > { %v7513_v43 = vpop.permute.xlu0 %5489 }
 0x108   : > { %5756 = vrot.lane.b32.xlu1 %v7283_v58, %s6457_s27  ;;  %v10198_v58 = vld [vmem:[#allocation13_spill] sm:$0xff] }
 0x109   : > { %5761 = vrot.lane.b32.xlu0 %v7093_v11, %s6455_s25 }
 0x10a   : > { %v7519_v14 = vpop.permute.xlu1 %5504 }
 0x10b   : > { %v7521_v18 = vpop.permute.xlu0 %5499 }
 0x10c   : > { %5766 = vrot.lane.b32.xlu1 %v7111_v60, %s6455_s25 }
 0x10d   : > { %5771 = vrot.lane.b32.xlu0 %v7177_v26, %s6456_s26  ;;  %v7544_v26 = vsel %vm767_vm1, 0.0, %v7532_v48 }
 0x10e   : > { %v7527_v31 = vpop.permute.xlu1 %5514  ;;  %10197 = vst [vmem:[#allocation58_spill] sm:$0xff] %v7544_v26 }
 0x10f   : > { %v7529_v40 = vpop.permute.xlu0 %5509 }
 0x110   : > { %5776 = vrot.lane.b32.xlu1 %v7197_v37, %s6456_s26  ;;  %v7552_v37 = vpack.i.bf16 %v7532_v48, %v7544_v26 }
 0x111   : > { %5781 = vrot.lane.b32.xlu0 %v7279_v15, %s6457_s27  ;;  %v951_v15 = vrot.slane %v10195_v9, 1 }
 0x112   : > { %v7538_v11 = vpop.permute.xlu1 %5524  ;;  %10199 = vst [vmem:[#allocation13_spill] sm:$0xff] %v7552_v37 }
 0x113   : > { %v7540_v60 = vpop.permute.xlu0 %5519  ;;  %v954_v54 = vsel %vm863_vm0, %v951_v15, 0.0 }
 0x114   : > { %5786 = vrot.lane.b32.xlu1 %v10169_v5, %s6457_s27  ;;  %v5202_v5 = vunpack.i.h.bf16 %v7167_v21  ;;  %v5197_v21 = vunpack.i.h.bf16 %v7185_v33  ;;  %v7586_v32 = vpack.i.bf16 %v954_v54, %v951_v15  ;;  %v7596_v33 = vsel %vm1748_vm2, %v10206_v7, %v5201_v47  ;;  %v10209_v47 = vld [vmem:[#allocation19_spill] sm:$0xff] }
 0x115   : > { %5791 = vrot.lane.b32.xlu0 %v10198_v58, %s6455_s25  ;;  %v7619_v7 = vsel %vm1748_vm2, %v10210_v19, %v5207_v4  ;;  %v663_v19 = vld [vmem:[%s7574_s17 + $0x10] sm:$0xff] }
 0x116   : > { %v7555_v61 = vpop.permute.xlu1 %5534  ;;  %10203 = vst [vmem:[#allocation62_spill] sm:$0xff] %v7586_v32  ;;  %v7590_v23 = vsel %vm1748_vm2, %v10204_v53, %v5202_v5  ;;  %v7615_v53 = vsel %vm1748_vm2, %v10209_v47, %v5192_v27  ;;  %v10214_v27 = vld [vmem:[#allocation25_spill] sm:$0xff] }
 0x117   : > { %10200 = vst [vmem:[#allocation59_spill] sm:$0xff] %v7555_v61  ;;  %v7557_v34 = vpop.permute.xlu0 %5529  ;;  %v673_v61 = vld [vmem:[%s7574_s17 + $0x60] sm:$0xff] }
 0x118   : > { %5796 = vrot.lane.b32.xlu1 %v7552_v37, %s6455_s25  ;;  %v10211_v37 = vld [vmem:[#allocation22_spill] sm:$0xff] }
 0x119   : > { %5801 = vrot.lane.b32.xlu0 %v7193_v39, %s6456_s26  ;;  %v5191_v39 = vunpack.i.l.bf16 %v7169_v25  ;;  %v10205_v25 = vld [vmem:[#allocation5_spill] sm:$0xff] }
 0x11a   : > { %v7566_v59 = vpop.permute.xlu1 %5544  ;;  %v5217_v10 = vunpack.i.h.bf16 %v10205_v25 }
 0x11b   : > { %10201 = vst [vmem:[#allocation60_spill] sm:$0xff] %v7566_v59  ;;  %v7568_v45 = vpop.permute.xlu0 %5539  ;;  %v7607_v5 = vsel %vm1748_vm2, %v7544_v26, %v5191_v39  ;;  %v7611_v54 = vsel %vm1748_vm2, %v7532_v48, %v5191_v39  ;;  %v7631_v39 = vsel %vm1748_vm2, %v10213_v6, %v5196_v52  ;;  %v5482_v48 = vunpack.i.h.bf16 %v7505_v49 }
 0x11c   : > { %10202 = vst [vmem:[#allocation61_spill] sm:$0xff] %v7568_v45  ;;  %1618 = vrot.lane.b32.xlu1 %v10195_v9, %s6456_s26  ;;  %v7623_v9 = vsel %vm1748_vm2, %v10211_v37, %v5206_v46  ;;  %v7638_v4 = vsel %vm1748_vm2, %v10214_v27, %v5217_v10  ;;  %v5216_v37 = vunpack.i.l.bf16 %v10205_v25  ;;  %v10215_v46 = vld [vmem:[#allocation6_spill] sm:$0xff]  ;;  %v1874_v6 = vsel %vm1847_vm5, %v7416_v44, %v5486_v36  ;;  %s6459_s26 = smov 48  }
 0x11d   : > { %5806 = vrot.lane.b32.xlu0 %v6900_v42, %s6457_s27  ;;  %v5481_v42 = vunpack.i.l.bf16 %v7505_v49  ;;  %v5212_v47 = vunpack.i.h.bf16 %v10215_v46  ;;  %v1875_v49 = vsel %vm1847_vm5, %v7419_v28, %v5487_v1  ;;  %v5496_v10 = vunpack.i.l.bf16 %v7511_v38 }
 0x11e   : > { %v7601_v58 = vpop.permute.xlu1 %5554  ;;  %v1873_v13 = vsel %vm1847_vm5, %v7422_v63, %v5482_v48  ;;  %v5497_v44 = vunpack.i.h.bf16 %v7511_v38  ;;  %v5492_v28 = vunpack.i.h.bf16 %v7513_v43  ;;  %v5491_v1 = vunpack.i.l.bf16 %v7513_v43  ;;  %v664_v63 = vld [vmem:[%s7574_s17 + $0x18] sm:$0xff]  ;;  %v665_v38 = vld [vmem:[%s7574_s17 + $0x20] sm:$0xff] }
 0x11f   : > { %10207 = vst [vmem:[#allocation23_spill] sm:$0xff] %v7601_v58  ;;  %v7603_v15 = vpop.permute.xlu0 %5549  ;;  %v10212_v58 = vld [vmem:[#allocation16_spill] sm:$0xff]  ;;  %v1872_v52 = vsel %vm1847_vm5, %v7425_v62, %v5481_v42  ;;  %v10220_v48 = vld [vmem:[#allocation14_spill] sm:$0xff] }
 0x120   : > { %10208 = vst [vmem:[#allocation5_spill] sm:$0xff] %v7603_v15  ;;  %v7627_v26 = vsel %vm1748_vm2, %v10212_v58, %v5197_v21  ;;  %5811 = vrot.lane.b32.xlu1 %v7586_v32, %s6457_s27  ;;  %v5211_v21 = vunpack.i.l.bf16 %v10215_v46  ;;  %v662_v58 = vld [vmem:[%s7574_s17 + $0x8] sm:$0xff]  ;;  %v5226_v43 = vunpack.i.l.bf16 %v10220_v48 }
 0x121   : > { %2076 = vperm.xlu0 %5588, %v661_v30  }
 0x122   : > { %v5565_v30 = vpop.permute.xlu1 %5564 }
 0x123   : > { %v5560_v25 = vpop.permute.xlu0 %5559  ;;  %v5567_v27 = vunpack.i.h.bf16 %v5565_v30  ;;  %v5566_v32 = vunpack.i.l.bf16 %v5565_v30 }
 0x124   : > { %v5562_v46 = vunpack.i.h.bf16 %v5560_v25  ;;  %v5561_v15 = vunpack.i.l.bf16 %v5560_v25  ;;  %2081 = vperm.xlu1 %5589, %v662_v58   ;;  %v5227_v25 = vunpack.i.h.bf16 %v10220_v48  ;;  %v10221_v58 = vld [vmem:[#allocation15_spill] sm:$0xff]  ;;  %v1876_v48 = vsel %vm1847_vm5, %v7453_v51, %v5491_v1  ;;  %v10226_v51 = vld [vmem:[#allocation26_spill] sm:$0xff]  ;;  %v10228_v1 = vld [vmem:[#allocation41_spill] sm:$0xff] }
 0x125   : > { %2086 = vperm.xlu0 %5588, %v663_v19   ;;  %v7658_v62 = vsel %vm1880_vm6, %v1874_v6, %v5566_v32  ;;  %v7661_v36 = vsel %vm1880_vm6, %v1875_v49, %v5567_v27  ;;  %v5222_v19 = vunpack.i.h.bf16 %v10221_v58  ;;  %v1878_v32 = vsel %vm1847_vm5, %v7447_v57, %v5496_v10 }
 0x126   : > { %10216 = vst [vmem:[#allocation17_spill] sm:$0xff] %v7658_v62  ;;  %10217 = vst [vmem:[#allocation19_spill] sm:$0xff] %v7661_v36  ;;  %v7664_v42 = vsel %vm1880_vm6, %v1872_v52, %v5561_v15  ;;  %v7667_v30 = vsel %vm1880_vm6, %v1873_v13, %v5562_v46  ;;  %v5575_v6 = vpop.permute.xlu1 %5574  ;;  %v5221_v46 = vunpack.i.l.bf16 %v10221_v58  ;;  %v1879_v36 = vsel %vm1847_vm5, %v7444_v16, %v5497_v44 }
 0x127   : > { %10218 = vst [vmem:[#allocation21_spill] sm:$0xff] %v7664_v42  ;;  %10219 = vst [vmem:[#allocation22_spill] sm:$0xff] %v7667_v30  ;;  %v5570_v49 = vpop.permute.xlu0 %5569  ;;  %v5577_v15 = vunpack.i.h.bf16 %v5575_v6  ;;  %v5576_v52 = vunpack.i.l.bf16 %v5575_v6  ;;  %v1877_v62 = vsel %vm1847_vm5, %v7450_v3, %v5492_v28  ;;  %v666_v6 = vld [vmem:[%s7574_s17 + $0x28] sm:$0xff]  ;;  %v1760_v44 = vsel %vm1748_vm2, %v10226_v51, %v5216_v37  ;;  %v10237_v30 = vld [vmem:[#allocation32_spill] sm:$0xff] }
 0x128   : > { %v5572_v27 = vunpack.i.h.bf16 %v5570_v49  ;;  %v5571_v13 = vunpack.i.l.bf16 %v5570_v49  ;;  %2091 = vperm.xlu1 %5589, %v664_v63   ;;  %v667_v49 = vld [vmem:[%s7574_s17 + $0x30] sm:$0xff]  ;;  %v10227_v3 = vld [vmem:[#allocation27_spill] sm:$0xff]  ;;  %v5237_v63 = vunpack.i.h.bf16 %v10228_v1 }
 0x129   : > { %2096 = vperm.xlu0 %5588, %v665_v38   ;;  %v7692_v58 = vsel %vm1880_vm6, %v1878_v32, %v5576_v52  ;;  %v7695_v16 = vsel %vm1880_vm6, %v1879_v36, %v5577_v15  ;;  %v7701_v28 = vsel %vm1748_vm2, %v10227_v3, %v5212_v47  ;;  %v10229_v38 = vld [vmem:[#allocation42_spill] sm:$0xff]  ;;  %v5246_v36 = vunpack.i.l.bf16 %v7225_v12  ;;  %v10230_v15 = vld [vmem:[#allocation43_spill] sm:$0xff] }
 0x12a   : > { %v7684_v57 = vsel %vm1880_vm6, %v1876_v48, %v5571_v13  ;;  %v7687_v10 = vsel %vm1880_vm6, %v1877_v62, %v5572_v27  ;;  %10224 = vst [vmem:[#allocation25_spill] sm:$0xff] %v7692_v58  ;;  %10225 = vst [vmem:[#allocation6_spill] sm:$0xff] %v7695_v16  ;;  %v5236_v62 = vunpack.i.l.bf16 %v10228_v1  ;;  %v5232_v27 = vunpack.i.h.bf16 %v10229_v38  ;;  %v10231_v13 = vld [vmem:[#allocation20_spill] sm:$0xff]  ;;  %v10233_v1 = vld [vmem:[#allocation29_spill] sm:$0xff] }
 0x12b   : > { %10222 = vst [vmem:[#allocation16_spill] sm:$0xff] %v7684_v57  ;;  %10223 = vst [vmem:[#allocation18_spill] sm:$0xff] %v7687_v10  ;;  %v5231_v32 = vunpack.i.l.bf16 %v10229_v38  ;;  %v5242_v52 = vunpack.i.h.bf16 %v10230_v15  ;;  %v1758_v37 = vsel %vm1748_vm2, %v10231_v13, %v5211_v21  ;;  %v5241_v47 = vunpack.i.l.bf16 %v10230_v15  ;;  %v10232_v48 = vld [vmem:[#allocation8_spill] sm:$0xff]  ;;  %v10235_v12 = vld [vmem:[#allocation30_spill] sm:$0xff] }
 0x12c   : > { %v5272_v51 = vunpack.i.h.bf16 %v10232_v48  ;;  %v5271_v3 = vunpack.i.l.bf16 %v10232_v48  ;;  %2101 = vperm.xlu1 %5589, %v666_v6   ;;  %v1765_v16 = vsel %vm1748_vm2, %v10233_v1, %v5227_v25  ;;  %v10234_v58 = vld [vmem:[#allocation4_spill] sm:$0xff]  ;;  %v1763_v10 = vsel %vm1748_vm2, %v10235_v12, %v5222_v19  ;;  %v668_v13 = vld [vmem:[%s7574_s17 + $0x38] sm:$0xff]  ;;  %v669_v15 = vld [vmem:[%s7574_s17 + $0x40] sm:$0xff] }
 0x12d   : > { %2106 = vperm.xlu0 %5588, %v667_v49   ;;  %v1764_v38 = vsel %vm1748_vm2, %v10234_v58, %v5226_v43  ;;  %v10236_v57 = vld [vmem:[#allocation24_spill] sm:$0xff]  ;;  %v1769_v42 = vsel %vm1748_vm2, %v10237_v30, %v5237_v63  ;;  %v10238_v48 = vld [vmem:[#allocation33_spill] sm:$0xff]  ;;  %v10239_v49 = vld [vmem:[#allocation10_spill] sm:$0xff] }
 0x12e   : > { %v1762_v21 = vsel %vm1748_vm2, %v10236_v57, %v5221_v46  ;;  %v7728_v6 = vsel %vm1748_vm2, %v10238_v48, %v5236_v62  ;;  %v5267_v25 = vunpack.i.h.bf16 %v10239_v49  ;;  %v7732_v43 = vunpack.i.l.bf16 %v10239_v49  ;;  %v10241_v19 = vld [vmem:[#allocation34_spill] sm:$0xff]  ;;  %v10242_v46 = vld [vmem:[#allocation28_spill] sm:$0xff]  ;;  %v10243_v1 = vld [vmem:[#allocation39_spill] sm:$0xff] }
 0x12f   : > { %v1767_v58 = vsel %vm1748_vm2, %v10241_v19, %v5232_v27  ;;  %v7738_v57 = vsel %vm1748_vm2, %v10242_v46, %v5231_v32  ;;  %v7742_v30 = vsel %vm1748_vm2, %v10243_v1, %v5246_v36  ;;  %v10244_v63 = vld [vmem:[#allocation40_spill] sm:$0xff]  ;;  %v10245_v12 = vld [vmem:[#allocation31_spill] sm:$0xff]  ;;  %v7754_v49 = vsel %vm1781_vm3, %v7631_v39, %v5271_v3  ;;  %v10249_v3 = vld [vmem:[#allocation9_spill] sm:$0xff] }
 0x130   : > { %10240 = vst [vmem:[#allocation14_spill] sm:$0xff] %v7732_v43  ;;  %v7746_v62 = vsel %vm1748_vm2, %v10244_v63, %v5242_v52  ;;  %v7750_v48 = vsel %vm1748_vm2, %v10245_v12, %v5241_v47  ;;  %v7758_v27 = vsel %vm1781_vm3, %v7627_v26, %v5272_v51  ;;  %2111 = vperm.xlu1 %5589, %v668_v13   ;;  %v10247_v32 = vld [vmem:[#allocation11_spill] sm:$0xff]  ;;  %v10248_v52 = vld [vmem:[#allocation12_spill] sm:$0xff]  ;;  %v5292_v12 = vunpack.i.h.bf16 %v10249_v3 }
 0x131   : > { %10246 = vst [vmem:[#allocation15_spill] sm:$0xff] %v7750_v48  ;;  %2116 = vperm.xlu0 %5588, %v669_v15   ;;  %v5282_v36 = vunpack.i.h.bf16 %v10247_v32  ;;  %v5281_v19 = vunpack.i.l.bf16 %v10247_v32  ;;  %v5277_v46 = vunpack.i.h.bf16 %v10248_v52  ;;  %v5276_v1 = vunpack.i.l.bf16 %v10248_v52  ;;  %v670_v47 = vld [vmem:[%s7574_s17 + $0x48] sm:$0xff]  ;;  %v671_v63 = vld [vmem:[%s7574_s17 + $0x50] sm:$0xff] }
 0x132   : > { %v7768_v39 = vsel %vm1781_vm3, %v7615_v53, %v5267_v25  ;;  %v5291_v26 = vunpack.i.l.bf16 %v10249_v3  ;;  %v7775_v51 = vsel %vm1781_vm3, %v7607_v5, %v7732_v43  ;;  %v10250_v13 = vld [vmem:[#allocation44_spill] sm:$0xff]  ;;  %v10251_v52 = vld [vmem:[#allocation7_spill] sm:$0xff]  ;;  %v10252_v25 = vld [vmem:[#allocation45_spill] sm:$0xff]  ;;  %v5312_v3 = vunpack.i.h.bf16 %v7313_v55 }
 0x133   : > { %v5287_v15 = vunpack.i.h.bf16 %v10250_v13  ;;  %v5286_v32 = vunpack.i.l.bf16 %v10250_v13  ;;  %v5302_v48 = vunpack.i.h.bf16 %v10251_v52  ;;  %v5301_v53 = vunpack.i.l.bf16 %v10251_v52 }
 0x134   : > { %v5297_v59 = vunpack.i.h.bf16 %v10252_v25  ;;  %v5296_v50 = vunpack.i.l.bf16 %v10252_v25  ;;  %v1783_v5 = vsel %vm1781_vm3, %v7611_v54, %v7732_v43  ;;  %2121 = vperm.xlu1 %5589, %v670_v47   ;;  %v7789_v45 = vsel %vm1781_vm3, %v7619_v7, %v5282_v36  ;;  %v7866_v43 = vld [vmem:[%s637_s20] ss:$0 sm:$0xff]  ;;  %s8022_s20 = scalar_lea.vmem %s9922_s5, %s5165_s30  ;;  %s645_s30 = scalar_lea.vmem %s9923_s6, %s10447_s22 }
 0x135   : > { %2126 = vperm.xlu0 %5588, %v671_v63   ;;  %v7793_v13 = vsel %vm1781_vm3, %v7623_v9, %v5281_v19  ;;  %v1788_v52 = vsel %vm1781_vm3, %v7590_v23, %v5277_v46  ;;  %v1787_v25 = vsel %vm1781_vm3, %v7596_v33, %v5276_v1  ;;  %v7803_v54 = vsel %vm1781_vm3, %v7638_v4, %v5292_v12 }
 0x136   : > { %v7806_v7 = vsel %vm1781_vm3, %v1760_v44, %v5291_v26  ;;  %v5311_v36 = vunpack.i.l.bf16 %v7313_v55  ;;  %v5307_v9 = vunpack.i.h.bf16 %v7315_v29  ;;  %v7812_v23 = vsel %vm1781_vm3, %v7701_v28, %v5287_v15  ;;  %v7823_v44 = vpop.permute.xlu1 %5584  ;;  %v7825_v55 = vpop.permute.xlu0 %5579  ;;  %v10258_v26 = vld [vmem:[#allocation49_spill] sm:$0xff] }
 0x137   : > { %v7815_v33 = vsel %vm1781_vm3, %v1758_v37, %v5286_v32  ;;  %v7818_v19 = vsel %vm1781_vm3, %v1765_v16, %v5302_v48  ;;  %v7821_v4 = vsel %vm1781_vm3, %v1764_v38, %v5301_v53  ;;  %v7828_v46 = vsel %vm1781_vm3, %v1763_v10, %v5297_v59  ;;  %v726_v38 = vld [vmem:[%s9925_s8 + $0x8] sm:$0xff]  ;;  %v10255_v10 = vld [vmem:[#allocation46_spill] sm:$0xff] }
 0x138   : > { %10253 = vst [vmem:[#allocation26_spill] sm:$0xff] %v7818_v19  ;;  %v7831_v28 = vsel %vm1781_vm3, %v1762_v21, %v5296_v50  ;;  %v7834_v37 = vsel %vm1781_vm3, %v1769_v42, %v5312_v3  ;;  %v5306_v16 = vunpack.i.l.bf16 %v7315_v29  ;;  %2131 = vperm.xlu1 %5589, %v672_v0   ;;  %v5321_v59 = vunpack.i.l.bf16 %v7317_v41  ;;  %v10256_v21 = vld [vmem:[#allocation47_spill] sm:$0xff]  ;;  %v725_v29 = vld [vmem:[%s9925_s8] sm:$0xff]  ;;  %v10257_v41 = vld [vmem:[#allocation48_spill] sm:$0xff] }
 0x139   : > { %10254 = vst [vmem:[#allocation27_spill] sm:$0xff] %v7834_v37  ;;  %2136 = vperm.xlu0 %5588, %v673_v61   ;;  %v5317_v50 = vunpack.i.h.bf16 %v10255_v10  ;;  %v5347_v48 = vunpack.i.h.bf16 %v10256_v21  ;;  %v5346_v42 = vunpack.i.l.bf16 %v10256_v21  ;;  %v674_v0 = vld [vmem:[%s7574_s17 + $0x68] sm:$0xff]  ;;  %v675_v61 = vld [vmem:[%s7574_s17 + $0x70] sm:$0xff]  ;;  %v7855_v1 = vsel %vm1781_vm3, %v7728_v6, %v5311_v36  ;;  %v10259_v53 = vld [vmem:[#allocation50_spill] sm:$0xff] }
 0x13a   : > { %v7858_v47 = vsel %vm1781_vm3, %v1767_v58, %v5307_v9  ;;  %v5342_v63 = vunpack.i.h.bf16 %v10257_v41  ;;  %v5341_v12 = vunpack.i.l.bf16 %v10257_v41  ;;  %v5357_v15 = vunpack.i.h.bf16 %v10258_v26 }
 0x13b   : > { %v5356_v32 = vunpack.i.l.bf16 %v10258_v26  ;;  %v5352_v3 = vunpack.i.h.bf16 %v10259_v53  ;;  %v5351_v21 = vunpack.i.l.bf16 %v10259_v53  ;;  %v2036_v6 = vpop.permute.xlu1 %2035  ;;  %v7870_v58 = vsel %vm1781_vm3, %v7738_v57, %v5306_v16  ;;  %v727_v26 = vld [vmem:[%s9925_s8 + $0x10] sm:$0xff] }
 0x13c   : > { %v2031_v36 = vpop.permute.xlu0 %2030  ;;  %v2054_v41 = vmul.f32 %v2036_v6, %v726_v38  ;;  %2141 = vperm.xlu1 %5589, %v674_v0   ;;  %v7878_v53 = vsel %vm1781_vm3, %v7742_v30, %v5321_v59  ;;  %v7882_v19 = vsel %vm1781_vm3, %v7746_v62, %v5317_v50  ;;  %v1817_v57 = vsel %vm1814_vm4, %v7768_v39, %v5346_v42  ;;  %v728_v38 = vld [vmem:[%s9925_s8 + $0x18] sm:$0xff]  ;;  %v677_v0 = vld [vmem:[%s7574_s17 + $0x80] sm:$0xff]  ;;  %v10261_v6 = vld [vmem:[#allocation52_spill] sm:$0xff] }
 0x13d   : > { %v2053_v37 = vmul.f32 %v2031_v36, %v725_v29  ;;  %2146 = vperm.xlu0 %5588, %v675_v61   ;;  %v7888_v16 = vsel %vm1814_vm4, %v7754_v49, %v5347_v48  ;;  %v676_v29 = vld [vmem:[%s7574_s17 + $0x78] sm:$0xff]  ;;  %v1816_v30 = vsel %vm1814_vm4, %v1783_v5, %v5342_v63  ;;  %v1815_v62 = vsel %vm1814_vm4, %v7775_v51, %v5341_v12  ;;  %v681_v63 = vld [vmem:[%s7574_s17 + $0xa0] sm:$0xff] }
 0x13e   : > { %v2065_v59 = vmul.f32 %v7866_v43, %v2054_v41  ;;  %v7901_v49 = vsel %vm1814_vm4, %v1788_v52, %v5356_v32  ;;  %v7905_v50 = vsel %vm1814_vm4, %v7793_v13, %v5357_v15  ;;  %v7908_v48 = vsel %vm1814_vm4, %v1787_v25, %v5352_v3  ;;  %v10260_v13 = vld [vmem:[#allocation51_spill] sm:$0xff]  ;;  %v679_v3 = vld [vmem:[%s7574_s17 + $0x90] sm:$0xff]  ;;  %v680_v36 = vld [vmem:[%s7574_s17 + $0x98] sm:$0xff] }
 0x13f   : > { %v2064_v39 = vmul.f32 %v7866_v43, %v2053_v37  ;;  %v7912_v5 = vsel %vm1814_vm4, %v7758_v27, %v5351_v21  ;;  %v2041_v51 = vpop.permute.xlu1 %2040  ;;  %v5426_v25 = vunpack.i.l.bf16 %v7455_v24  ;;  %v5422_v12 = vunpack.i.h.bf16 %v7457_v22  ;;  %v729_v27 = vld [vmem:[%s9925_s8 + $0x20] sm:$0xf]  ;;  %v678_v32 = vld [vmem:[%s7574_s17 + $0x88] sm:$0xff] }
 0x140   : > { %v2046_v42 = vpop.permute.xlu0 %2045  ;;  %v2055_v61 = vmul.f32 %v2041_v51, %v727_v26  ;;  %2151 = vperm.xlu1 %5589, %v676_v29   ;;  %v5421_v15 = vunpack.i.l.bf16 %v7457_v22  ;;  %v5427_v22 = vunpack.i.h.bf16 %v7455_v24  ;;  %v5502_v29 = vunpack.i.h.bf16 %v7521_v18 }
 0x141   : > { %v2069_v37 = vpack.c.bf16 %v2065_v59, %v2064_v39  ;;  %v2056_v52 = vmul.f32 %v2046_v42, %v728_v38  ;;  %2156 = vperm.xlu0 %5588, %v677_v0   ;;  %v5501_v0 = vunpack.i.l.bf16 %v7521_v18  ;;  %v5582_v51 = vunpack.i.h.bf16 %v7825_v55 }
 0x142   : > { %v2066_v41 = vmul.f32 %v7866_v43, %v2055_v61  ;;  %v5581_v42 = vunpack.i.l.bf16 %v7825_v55  ;;  %v1850_v24 = vsel %vm1847_vm5, %v1817_v57, %v5426_v25  ;;  %v1848_v9 = vsel %vm1847_vm5, %v1815_v62, %v5421_v15 }
 0x143   : > { %v2067_v26 = vmul.f32 %v7866_v43, %v2056_v52  ;;  %5040 = vmatprep.subr.bf16.mxu0 %v2069_v37  ;;  %5154 = vmatprep.subr.bf16.mxu1 %v2069_v37  ;;  %v2051_v59 = vpop.permute.xlu1 %2050  ;;  %v1849_v18 = vsel %vm1847_vm5, %v1816_v30, %v5422_v12  ;;  %v5506_v21 = vunpack.i.l.bf16 %v7519_v14  ;;  %v5587_v62 = vunpack.i.h.bf16 %v7823_v44 }
 0x144   : > { %5041 = vmatpush3.bf16.msra.mxu0 %v2069_v37  ;;  %5157 = vmatpush3.bf16.msra.mxu1 %v2069_v37  ;;  %v5592_v39 = vpop.permute.xlu0 %5591  ;;  %v2057_v52 = vmul.f32 %v2051_v59, %v729_v27  ;;  %v5507_v37 = vunpack.i.h.bf16 %v7519_v14  ;;  %v1881_v27 = vsel %vm1880_vm6, %v1848_v9, %v5501_v0  ;;  %v1882_v57 = vsel %vm1880_vm6, %v1849_v18, %v5502_v29  ;;  %v682_v29 = vld [vmem:[%s7574_s17 + $0xa8] sm:$0xff]  ;;  %v683_v0 = vld [vmem:[%s7574_s17 + $0xb0] sm:$0xff] }
 0x145   : > { %v2070_v61 = vpack.c.bf16 %v2067_v26, %v2066_v41  ;;  %2161 = vperm.xlu1 %5589, %v678_v32   ;;  %2166 = vperm.xlu0 %5588, %v679_v3   ;;  %v5594_v38 = vunpack.i.h.bf16 %v5592_v39  ;;  %v5593_v41 = vunpack.i.l.bf16 %v5592_v39  ;;  %v5586_v30 = vunpack.i.l.bf16 %v7823_v44 }
 0x146   : > { %v2068_v55 = vmul.f32 %v7866_v43, %v2057_v52  ;;  %v1914_v43 = vsel %vm1913_vm7, %v1881_v27, %v5581_v42  ;;  %v1915_v9 = vsel %vm1913_vm7, %v1882_v57, %v5582_v51  ;;  %v1851_v44 = vsel %vm1847_vm5, %v7888_v16, %v5427_v22  ;;  %v684_v57 = vld [vmem:[%s7574_s17 + $0xb8] sm:$0xff] }
 0x147   : > { %5042 = vmatprep.subr.bf16.mxu0 %v2070_v61  ;;  %5155 = vmatprep.subr.bf16.mxu1 %v2070_v61  ;;  %v5597_v25 = vpop.permute.xlu1 %5596  ;;  %v1948_v59 = vsel %vm1946_vm8, %v1915_v9, %v5594_v38  ;;  %v5432_v51 = vunpack.i.h.bf16 %v7465_v8  ;;  %v1883_v42 = vsel %vm1880_vm6, %v1850_v24, %v5506_v21  ;;  %v5431_v21 = vunpack.i.l.bf16 %v7465_v8 }
 0x148   : > { %5043 = vmatpush3.bf16.msra.mxu0 %v2070_v61  ;;  %5158 = vmatpush3.bf16.msra.mxu1 %v2070_v61  ;;  %v5602_v12 = vpop.permute.xlu0 %5601  ;;  %v2071_v14 = vpack.c.bf16 %v2068_v55, %v2068_v55  ;;  %v5599_v32 = vunpack.i.h.bf16 %v5597_v25  ;;  %v5598_v3 = vunpack.i.l.bf16 %v5597_v25  ;;  %v1884_v61 = vsel %vm1880_vm6, %v1851_v44, %v5507_v37  ;;  %v685_v25 = vld [vmem:[%s7574_s17 + $0xc0] sm:$0xff] }
 0x149   : > { %v5604_v15 = vunpack.i.h.bf16 %v5602_v12  ;;  %2171 = vperm.xlu1 %5589, %v680_v36   ;;  %2176 = vperm.xlu0 %5588, %v681_v63   ;;  %v5603_v26 = vunpack.i.l.bf16 %v5602_v12  ;;  %v1947_v36 = vsel %vm1946_vm8, %v1914_v43, %v5593_v41  ;;  %v1916_v52 = vsel %vm1913_vm7, %v1883_v42, %v5586_v30  ;;  %v686_v42 = vld [vmem:[%s7574_s17 + $0xc8] sm:$0xff] }
 0x14a   : > { %5160 = vmatprep.subr.msk.bf16.mxu0 %vm2321_vm9, %v2071_v14  ;;  %5161 = vmatprep.subr.msk.bf16.mxu1 %vm2321_vm9, %v2071_v14  ;;  %v2323_v63 = vsel %vm2321_vm9, %v2071_v14, 0  ;;  %v1917_v18 = vsel %vm1913_vm7, %v1884_v61, %v5587_v62  ;;  %v1949_v24 = vsel %vm1946_vm8, %v1916_v52, %v5598_v3  ;;  %v5512_v12 = vunpack.i.h.bf16 %v7529_v40 }
 0x14b   : > { %v1981_v39 = vsel %vm1979_vm10, %v1948_v59, %v5604_v15  ;;  %v5607_v38 = vpop.permute.xlu1 %5606  ;;  %v1980_v22 = vsel %vm1979_vm10, %v1947_v36, %v5603_v26  ;;  %v1950_v37 = vsel %vm1946_vm8, %v1917_v18, %v5599_v32  ;;  %v5511_v14 = vunpack.i.l.bf16 %v7529_v40  ;;  %v10265_v59 = vld [vmem:[#allocation53_spill] sm:$0xff] }
 0x14c   : > { %5045 = vmatpush3.bf16.msra.mxu0 %v2323_v63  ;;  %5159 = vmatpush3.bf16.msra.mxu1 %v2323_v63  ;;  %v5612_v16 = vpop.permute.xlu0 %5611  ;;  %v5609_v55 = vunpack.i.h.bf16 %v5607_v38  ;;  %v5608_v41 = vunpack.i.l.bf16 %v5607_v38  ;;  %v2012_v27 = vpack.c.bf16 %v1981_v39, %v1980_v22  ;;  %v10262_v15 = vunpack.i.l.bf16 %v10260_v13 }
 0x14d   : > { %2181 = vperm.xlu1 %5589, %v682_v29   ;;  %2186 = vperm.xlu0 %5588, %v683_v0   ;;  %v5614_v43 = vunpack.i.h.bf16 %v5612_v16  ;;  %v5613_v9 = vunpack.i.l.bf16 %v5612_v16  ;;  %v10263_v40 = vunpack.i.h.bf16 %v10260_v13  ;;  %v10264_v0 = vunpack.i.h.bf16 %v10261_v6 }
 0x14e   : > { %v1982_v30 = vsel %vm1979_vm10, %v1949_v24, %v5608_v41  ;;  %v1983_v62 = vsel %vm1979_vm10, %v1950_v37, %v5609_v55  ;;  %v7976_v8 = vsel %vm1814_vm4, %v7812_v23, %v10262_v15  ;;  %5046 = vmatprep.mubr.msk.bf16.mxu0 %vm2272_vm11, %v2012_v27  ;;  %v5377_v44 = vunpack.i.h.bf16 %v10265_v59 }
 0x14f   : > { %v5617_v32 = vpop.permute.xlu1 %5616  ;;  %v2013_v26 = vpack.c.bf16 %v1983_v62, %v1982_v30  ;;  %v7983_v29 = vsel %vm1814_vm4, %v7806_v7, %v10263_v40  ;;  %v7989_v23 = vsel %vm1814_vm4, %v7815_v33, %v10264_v0  ;;  %v5376_v63 = vunpack.i.l.bf16 %v10265_v59  ;;  %v687_v33 = vld [vmem:[%s7574_s17 + $0xd0] sm:$0xff]  ;;  %v2630_v59 = vld [vmem:[%s8022_s20 + $0x8] sm:$0xff] }
 0x150   : > { %v5622_v3 = vpop.permute.xlu0 %5621  ;;  %v1852_v13 = vsel %vm1847_vm5, %v7912_v5, %v5431_v21  ;;  %v1853_v7 = vsel %vm1847_vm5, %v7908_v48, %v5432_v51  ;;  %v5437_v61 = vunpack.i.h.bf16 %v7463_v2  ;;  %v5436_v38 = vunpack.i.l.bf16 %v7463_v2 }
 0x151   : > { %2191 = vperm.xlu1 %5589, %v684_v57   ;;  %2196 = vperm.xlu0 %5588, %v685_v25   ;;  %v5624_v36 = vunpack.i.h.bf16 %v5622_v3  ;;  %v5623_v39 = vunpack.i.l.bf16 %v5622_v3  ;;  %v1885_v16 = vsel %vm1880_vm6, %v1852_v13, %v5511_v14  ;;  %v1886_v22 = vsel %vm1880_vm6, %v1853_v7, %v5512_v12  ;;  %v689_v12 = vld [vmem:[%s7574_s17 + $0xe0] sm:$0xff] }
 0x152   : > { %5047 = vmatmul.mubr.msk.bf16.vlgmr.msra.gmra.mrb[0].mxu0 %vm2272_vm11, %v2013_v26  ;;  %v5517_v5 = vunpack.i.h.bf16 %v7527_v31  ;;  %v5516_v48 = vunpack.i.l.bf16 %v7527_v31  ;;  %v1918_v51 = vsel %vm1913_vm7, %v1885_v16, %v5613_v9  ;;  %v1919_v52 = vsel %vm1913_vm7, %v1886_v22, %v5614_v43  ;;  %v688_v31 = vld [vmem:[%s7574_s17 + $0xd8] sm:$0xff]  ;;  %v10266_v43 = vld [vmem:[#allocation54_spill] sm:$0xff] }
 0x153   : > { %v5627_v18 = vpop.permute.xlu1 %5626  ;;  %v5619_v41 = vunpack.i.h.bf16 %v5617_v32  ;;  %v5618_v21 = vunpack.i.l.bf16 %v5617_v32  ;;  %v1951_v37 = vsel %vm1946_vm8, %v1918_v51, %v5623_v39  ;;  %v1952_v27 = vsel %vm1946_vm8, %v1919_v52, %v5624_v36 }
 0x154   : > { %v5632_v55 = vpop.permute.xlu0 %5631  ;;  %v5629_v57 = vunpack.i.h.bf16 %v5627_v18  ;;  %v5628_v25 = vunpack.i.l.bf16 %v5627_v18  ;;  %v1854_v14 = vsel %vm1847_vm5, %v7901_v49, %v5436_v38  ;;  %v1855_v30 = vsel %vm1847_vm5, %v7905_v50, %v5437_v61  ;;  %v690_v61 = vld [vmem:[%s7574_s17 + $0xe8] sm:$0xff]  ;;  %v2629_v38 = vld [vmem:[%s8022_s20] sm:$0xff] }
 0x155   : > { %v5634_v2 = vunpack.i.h.bf16 %v5632_v55  ;;  %v5633_v24 = vunpack.i.l.bf16 %v5632_v55  ;;  %2201 = vperm.xlu1 %5589, %v686_v42   ;;  %2206 = vperm.xlu0 %5588, %v687_v33   ;;  %v5372_v9 = vunpack.i.h.bf16 %v10266_v43  ;;  %v1887_v32 = vsel %vm1880_vm6, %v1854_v14, %v5516_v48 }
 0x156   : > { %v1888_v3 = vsel %vm1880_vm6, %v1855_v30, %v5517_v5  ;;  %v1920_v40 = vsel %vm1913_vm7, %v1887_v32, %v5618_v21  ;;  %v5442_v36 = vunpack.i.h.bf16 %v7473_v35  ;;  %v5441_v39 = vunpack.i.l.bf16 %v7473_v35 }
 0x157   : > { %v1984_v62 = vsel %vm1979_vm10, %v1951_v37, %v5633_v24  ;;  %v1985_v15 = vsel %vm1979_vm10, %v1952_v27, %v5634_v2  ;;  %v5637_v49 = vpop.permute.xlu1 %5636  ;;  %v1921_v0 = vsel %vm1913_vm7, %v1888_v3, %v5619_v41  ;;  %v1953_v42 = vsel %vm1946_vm8, %v1920_v40, %v5628_v25 }
 0x158   : > { %v5642_v26 = vpop.permute.xlu0 %5641  ;;  %v2014_v50 = vpack.c.bf16 %v1985_v15, %v1984_v62  ;;  %v5639_v13 = vunpack.i.h.bf16 %v5637_v49  ;;  %v5638_v7 = vunpack.i.l.bf16 %v5637_v49  ;;  %v1954_v33 = vsel %vm1946_vm8, %v1921_v0, %v5629_v57 }
 0x159   : > { %2211 = vperm.xlu1 %5589, %v688_v31   ;;  %2216 = vperm.xlu0 %5588, %v689_v12   ;;  %v5522_v16 = vunpack.i.h.bf16 %v7540_v60  ;;  %v5521_v22 = vunpack.i.l.bf16 %v7540_v60  ;;  %v10267_v51 = vunpack.i.l.bf16 %v10261_v6  ;;  %v5644_v52 = vunpack.i.h.bf16 %v5642_v26 }
 0x15a   : > { %5050 = vmatprep.mubr.msk.bf16.mxu0 %vm2272_vm11, %v2014_v50  ;;  %v1986_v5 = vsel %vm1979_vm10, %v1953_v42, %v5638_v7  ;;  %v1987_v48 = vsel %vm1979_vm10, %v1954_v33, %v5639_v13  ;;  %v5643_v18 = vunpack.i.l.bf16 %v5642_v26  ;;  %v8048_v60 = vsel %vm1814_vm4, %v7828_v46, %v5376_v63  ;;  %v2631_v26 = vld [vmem:[%s8022_s20 + $0x10] sm:$0xff]  ;;  %v10268_v7 = vld [vmem:[#allocation55_spill] sm:$0xff] }
 0x15b   : > { %v1823_v35 = vsel %vm1814_vm4, %v7789_v45, %v10267_v51  ;;  %v5647_v55 = vpop.permute.xlu1 %5646  ;;  %v2015_v21 = vpack.c.bf16 %v1987_v48, %v1986_v5  ;;  %v8054_v6 = vsel %vm1814_vm4, %v7821_v4, %v5377_v44  ;;  %v8058_v45 = vsel %vm1814_vm4, %v7831_v28, %v5372_v9  ;;  %v691_v4 = vld [vmem:[%s7574_s17 + $0xf0] sm:$0xff] }
 0x15c   : > { %v5652_v41 = vpop.permute.xlu0 %5651  ;;  %v5371_v2 = vunpack.i.l.bf16 %v10266_v43  ;;  %v1856_v24 = vsel %vm1847_vm5, %v1823_v35, %v5441_v39  ;;  %v1857_v46 = vsel %vm1847_vm5, %v7989_v23, %v5442_v36  ;;  %v5447_v44 = vunpack.i.h.bf16 %v7471_v17 }
 0x15d   : > { %2221 = vperm.xlu1 %5589, %v690_v61   ;;  %3912 = vperm.xlu0 %5588, %v2629_v38   ;;  %v5654_v63 = vunpack.i.h.bf16 %v5652_v41  ;;  %v5653_v37 = vunpack.i.l.bf16 %v5652_v41  ;;  %v5446_v28 = vunpack.i.l.bf16 %v7471_v17  ;;  %v1889_v27 = vsel %vm1880_vm6, %v1856_v24, %v5521_v22 }
 0x15e   : > { %5051 = vmatmul.mubr.msk.bf16.gmra.mrb[4].mxu0 %vm2272_vm11, %v2015_v21  ;;  %v1890_v57 = vsel %vm1880_vm6, %v1857_v46, %v5522_v16  ;;  %v5527_v25 = vunpack.i.h.bf16 %v7538_v11  ;;  %v5526_v31 = vunpack.i.l.bf16 %v7538_v11  ;;  %v1922_v23 = vsel %vm1913_vm7, %v1889_v27, %v5643_v18  ;;  %v692_v11 = vld [vmem:[%s7574_s17 + $0xf8] sm:$0xff]  ;;  %v2633_v18 = vld [vmem:[%s8022_s20 + $0x20] sm:$0xff] }
 0x15f   : > { %v1923_v12 = vsel %vm1913_vm7, %v1890_v57, %v5644_v52  ;;  %v5657_v14 = vpop.permute.xlu1 %5656  ;;  %v5649_v62 = vunpack.i.h.bf16 %v5647_v55  ;;  %v5648_v15 = vunpack.i.l.bf16 %v5647_v55  ;;  %v1955_v9 = vsel %vm1946_vm8, %v1922_v23, %v5653_v37  ;;  %v2632_v52 = vld [vmem:[%s8022_s20 + $0x18] sm:$0xff]  ;;  %v2634_v23 = vld [vmem:[%s8022_s20 + $0x28] sm:$0xff] }
 0x160   : > { %v5662_v30 = vpop.permute.xlu0 %5661  ;;  %v1956_v32 = vsel %vm1946_vm8, %v1923_v12, %v5654_v63  ;;  %v5659_v3 = vunpack.i.h.bf16 %v5657_v14  ;;  %v5658_v49 = vunpack.i.l.bf16 %v5657_v14  ;;  %v1858_v50 = vsel %vm1847_vm5, %v7976_v8, %v5446_v28  ;;  %v2635_v12 = vld [vmem:[%s8022_s20 + $0x30] sm:$0xff] }
 0x161   : > { %v5664_v43 = vunpack.i.h.bf16 %v5662_v30  ;;  %v5663_v17 = vunpack.i.l.bf16 %v5662_v30  ;;  %3917 = vperm.xlu1 %5589, %v2630_v59   ;;  %2226 = vperm.xlu0 %5588, %v691_v4   ;;  %v1859_v40 = vsel %vm1847_vm5, %v7983_v29, %v5447_v44  ;;  %v5386_v36 = vunpack.i.l.bf16 %v10268_v7 }
 0x162   : > { %v1891_v39 = vsel %vm1880_vm6, %v1858_v50, %v5526_v31  ;;  %v1892_v42 = vsel %vm1880_vm6, %v1859_v40, %v5527_v25  ;;  %v5452_v5 = vunpack.i.h.bf16 %v7481_v56  ;;  %v5451_v48 = vunpack.i.l.bf16 %v7481_v56 }
 0x163   : > { %v1988_v0 = vsel %vm1979_vm10, %v1955_v9, %v5663_v17  ;;  %v1989_v13 = vsel %vm1979_vm10, %v1956_v32, %v5664_v43  ;;  %v5667_v33 = vpop.permute.xlu1 %5666  ;;  %v1924_v8 = vsel %vm1913_vm7, %v1891_v39, %v5648_v15  ;;  %v1925_v16 = vsel %vm1913_vm7, %v1892_v42, %v5649_v62  ;;  %v10270_v15 = vld [vmem:[#allocation59_spill] sm:$0xff] }
 0x164   : > { %v5672_v61 = vpop.permute.xlu0 %5671  ;;  %v2016_v38 = vpack.c.bf16 %v1989_v13, %v1988_v0  ;;  %v5669_v29 = vunpack.i.h.bf16 %v5667_v33  ;;  %v5668_v22 = vunpack.i.l.bf16 %v5667_v33  ;;  %v1957_v51 = vsel %vm1946_vm8, %v1924_v8, %v5658_v49 }
 0x165   : > { %2231 = vperm.xlu1 %5589, %v692_v11   ;;  %3922 = vperm.xlu0 %5588, %v2631_v26   ;;  %v1958_v35 = vsel %vm1946_vm8, %v1925_v16, %v5659_v3  ;;  %v5532_v55 = vunpack.i.h.bf16 %v7557_v34  ;;  %v5531_v41 = vunpack.i.l.bf16 %v7557_v34  ;;  %v1827_v46 = vsel %vm1814_vm4, %v7803_v54, %v5371_v2  ;;  %v10269_v34 = vld [vmem:[#allocation56_spill] sm:$0xff] }
 0x166   : > { %5054 = vmatprep.mubr.msk.bf16.mxu0 %vm2272_vm11, %v2016_v38  ;;  %v1990_v21 = vsel %vm1979_vm10, %v1957_v51, %v5668_v22  ;;  %v1991_v24 = vsel %vm1979_vm10, %v1958_v35, %v5669_v29  ;;  %v5674_v56 = vunpack.i.h.bf16 %v5672_v61  ;;  %v5673_v63 = vunpack.i.l.bf16 %v5672_v61  ;;  %v10271_v35 = vld [vmem:[#allocation38_spill] sm:$0xff] }
 0x167   : > { %v5677_v37 = vpop.permute.xlu1 %5676  ;;  %v2017_v4 = vpack.c.bf16 %v1991_v24, %v1990_v21  ;;  %v5387_v44 = vunpack.i.h.bf16 %v10268_v7  ;;  %v8106_v28 = vsel %vm1814_vm4, %v7858_v47, %v5386_v36  ;;  %v5382_v27 = vunpack.i.h.bf16 %v10269_v34  ;;  %v2636_v7 = vld [vmem:[%s8022_s20 + $0x38] sm:$0xff]  ;;  %v2637_v36 = vld [vmem:[%s8022_s20 + $0x40] sm:$0xff] }
 0x168   : > { %v5682_v59 = vpop.permute.xlu0 %5681  ;;  %v5381_v57 = vunpack.i.l.bf16 %v10269_v34  ;;  %v1860_v54 = vsel %vm1847_vm5, %v1827_v46, %v5451_v48  ;;  %v1861_v2 = vsel %vm1847_vm5, %v8058_v45, %v5452_v5  ;;  %v5457_v47 = vunpack.i.h.bf16 %v7479_v20 }
 0x169   : > { %3927 = vperm.xlu1 %5589, %v2632_v52   ;;  %3932 = vperm.xlu0 %5588, %v2633_v18   ;;  %v5684_v25 = vunpack.i.h.bf16 %v5682_v59  ;;  %v5683_v31 = vunpack.i.l.bf16 %v5682_v59  ;;  %v5456_v14 = vunpack.i.l.bf16 %v7479_v20  ;;  %v1893_v30 = vsel %vm1880_vm6, %v1860_v54, %v5531_v41  ;;  %v10272_v41 = vld [vmem:[#allocation61_spill] sm:$0xff] }
 0x16a   : > { %5055 = vmatmul.mubr.msk.bf16.gmra.mrb[8].mxu0 %vm2272_vm11, %v2017_v4  ;;  %v1894_v62 = vsel %vm1880_vm6, %v1861_v2, %v5532_v55  ;;  %v5537_v43 = vunpack.i.h.bf16 %v10270_v15  ;;  %v5536_v17 = vunpack.i.l.bf16 %v10270_v15  ;;  %v1926_v45 = vsel %vm1913_vm7, %v1893_v30, %v5673_v63  ;;  %v10273_v2 = vld [vmem:[#allocation26_spill] sm:$0xff]  ;;  %v10276_v15 = vld [vmem:[#allocation36_spill] sm:$0xff] }
 0x16b   : > { %v1927_v9 = vsel %vm1913_vm7, %v1894_v62, %v5674_v56  ;;  %v5687_v32 = vpop.permute.xlu1 %5686  ;;  %v5679_v49 = vunpack.i.h.bf16 %v5677_v37  ;;  %v5678_v11 = vunpack.i.l.bf16 %v5677_v37  ;;  %v1959_v50 = vsel %vm1946_vm8, %v1926_v45, %v5683_v31  ;;  %v10274_v31 = vld [vmem:[#allocation2_spill] sm:$0xff]  ;;  %v10277_v45 = vld [vmem:[#allocation60_spill] sm:$0xff] }
 0x16c   : > { %v5692_v3 = vpop.permute.xlu0 %5691  ;;  %v1960_v40 = vsel %vm1946_vm8, %v1927_v9, %v5684_v25  ;;  %v5689_v0 = vunpack.i.h.bf16 %v5687_v32  ;;  %v5688_v13 = vunpack.i.l.bf16 %v5687_v32  ;;  %v1862_v39 = vsel %vm1847_vm5, %v8048_v60, %v5456_v14 }
 0x16d   : > { %v5694_v26 = vunpack.i.h.bf16 %v5692_v3  ;;  %v5693_v20 = vunpack.i.l.bf16 %v5692_v3  ;;  %3937 = vperm.xlu1 %5589, %v2634_v23   ;;  %3942 = vperm.xlu0 %5588, %v2635_v12   ;;  %v1863_v42 = vsel %vm1847_vm5, %v8054_v6, %v5457_v47  ;;  %v1834_v38 = vsel %vm1814_vm4, %v7855_v1, %v5387_v44  ;;  %v10275_v47 = vld [vmem:[#allocation57_spill] sm:$0xff] }
 0x16e   : > { %v1895_v8 = vsel %vm1880_vm6, %v1862_v39, %v5536_v17  ;;  %v1896_v16 = vsel %vm1880_vm6, %v1863_v42, %v5537_v43  ;;  %v5462_v52 = vunpack.i.h.bf16 %v10271_v35  ;;  %v5461_v18 = vunpack.i.l.bf16 %v10271_v35 }
 0x16f   : > { %v1992_v33 = vsel %vm1979_vm10, %v1959_v50, %v5693_v20  ;;  %v1993_v61 = vsel %vm1979_vm10, %v1960_v40, %v5694_v26  ;;  %v5697_v29 = vpop.permute.xlu1 %5696  ;;  %v1928_v48 = vsel %vm1913_vm7, %v1895_v8, %v5678_v11  ;;  %v1929_v60 = vsel %vm1913_vm7, %v1896_v16, %v5679_v49 }
 0x170   : > { %v5702_v22 = vpop.permute.xlu0 %5701  ;;  %v2018_v5 = vpack.c.bf16 %v1993_v61, %v1992_v33  ;;  %v5699_v51 = vunpack.i.h.bf16 %v5697_v29  ;;  %v5698_v6 = vunpack.i.l.bf16 %v5697_v29  ;;  %v1961_v1 = vsel %vm1946_vm8, %v1928_v48, %v5688_v13 }
 0x171   : > { %3947 = vperm.xlu1 %5589, %v2636_v7   ;;  %3952 = vperm.xlu0 %5588, %v2637_v36   ;;  %v1962_v55 = vsel %vm1946_vm8, %v1929_v60, %v5689_v0  ;;  %v5542_v21 = vunpack.i.h.bf16 %v10272_v41  ;;  %v5541_v24 = vunpack.i.l.bf16 %v10272_v41  ;;  %v1832_v63 = vsel %vm1814_vm4, %v7870_v58, %v5382_v27  ;;  %v10279_v41 = vld [vmem:[#allocation5_spill] sm:$0xff] }
 0x172   : > { %5058 = vmatprep.mubr.msk.bf16.mxu0 %vm2272_vm11, %v2018_v5  ;;  %v1994_v46 = vsel %vm1979_vm10, %v1961_v1, %v5698_v6  ;;  %v1995_v56 = vsel %vm1979_vm10, %v1962_v55, %v5699_v51  ;;  %v5704_v37 = vunpack.i.h.bf16 %v5702_v22  ;;  %v5703_v59 = vunpack.i.l.bf16 %v5702_v22 }
 0x173   : > { %v5707_v4 = vpop.permute.xlu1 %5706  ;;  %v2019_v54 = vpack.c.bf16 %v1995_v56, %v1994_v46  ;;  %v1831_v25 = vsel %vm1814_vm4, %v10273_v2, %v5381_v57  ;;  %v5397_v23 = vunpack.i.h.bf16 %v10274_v31  ;;  %v5396_v12 = vunpack.i.l.bf16 %v10274_v31 }
 0x174   : > { %v5712_v44 = vpop.permute.xlu0 %5711  ;;  %v5392_v14 = vunpack.i.h.bf16 %v10275_v47  ;;  %v1864_v30 = vsel %vm1847_vm5, %v1831_v25, %v5461_v18  ;;  %v1865_v58 = vsel %vm1847_vm5, %v1832_v63, %v5462_v52  ;;  %v5467_v43 = vunpack.i.h.bf16 %v10276_v15 }
 0x175   : > { %v5714_v27 = vunpack.i.h.bf16 %v5712_v44  ;;  %v5713_v62 = vunpack.i.l.bf16 %v5712_v44  ;;  %5059 = vmatmul.mubr.msk.bf16.gmra.mrb[12].mxu0 %vm2272_vm11, %v2019_v54  ;;  %v5466_v34 = vunpack.i.l.bf16 %v10276_v15  ;;  %v1897_v57 = vsel %vm1880_vm6, %v1864_v30, %v5541_v24 }
 0x176   : > { %v1898_v17 = vsel %vm1880_vm6, %v1865_v58, %v5542_v21  ;;  %v5547_v9 = vunpack.i.h.bf16 %v10277_v45  ;;  %v5546_v32 = vunpack.i.l.bf16 %v10277_v45  ;;  %v1930_v11 = vsel %vm1913_vm7, %v1897_v57, %v5703_v59  ;;  %v10282_v58 = vld [vmem:[#allocation27_spill] sm:$0xff] }
 0x177   : > { %v5717_v3 = vpop.permute.xlu1 %5716  ;;  %v1931_v26 = vsel %vm1913_vm7, %v1898_v17, %v5704_v37  ;;  %v5709_v20 = vunpack.i.h.bf16 %v5707_v4  ;;  %v5708_v50 = vunpack.i.l.bf16 %v5707_v4  ;;  %v1963_v36 = vsel %vm1946_vm8, %v1930_v11, %v5713_v62  ;;  %v10281_v37 = vld [vmem:[#allocation15_spill] sm:$0xff] }
 0x178   : > { %v5722_v49 = vpop.permute.xlu0 %5721  ;;  %v5719_v13 = vunpack.i.h.bf16 %v5717_v3  ;;  %v5718_v7 = vunpack.i.l.bf16 %v5717_v3  ;;  %v1964_v39 = vsel %vm1946_vm8, %v1931_v26, %v5714_v27  ;;  %v1866_v42 = vsel %vm1847_vm5, %v8106_v28, %v5466_v34  ;;  %v10283_v34 = vld [vmem:[#allocation3_spill] sm:$0xff] }
 0x179   : > { %v5724_v40 = vunpack.i.h.bf16 %v5722_v49  ;;  %v5723_v0 = vunpack.i.l.bf16 %v5722_v49  ;;  %v1867_v33 = vsel %vm1847_vm5, %v1834_v38, %v5467_v43  ;;  %v5391_v16 = vunpack.i.l.bf16 %v10275_v47  ;;  %v10278_v38 = vld [vmem:[#allocation37_spill] sm:$0xff] }
 0x17a   : > { %v1899_v29 = vsel %vm1880_vm6, %v1866_v42, %v5546_v32  ;;  %v1900_v22 = vsel %vm1880_vm6, %v1867_v33, %v5547_v9  ;;  %v5472_v52 = vunpack.i.h.bf16 %v10278_v38  ;;  %v5471_v18 = vunpack.i.l.bf16 %v10278_v38 }
 0x17b   : > { %v1996_v61 = vsel %vm1979_vm10, %v1963_v36, %v5723_v0  ;;  %v1997_v8 = vsel %vm1979_vm10, %v1964_v39, %v5724_v40  ;;  %v5727_v5 = vpop.permute.xlu1 %5726  ;;  %v1932_v51 = vsel %vm1913_vm7, %v1899_v29, %v5708_v50  ;;  %v1933_v6 = vsel %vm1913_vm7, %v1900_v22, %v5709_v20 }
 0x17c   : > { %v5732_v48 = vpop.permute.xlu0 %5731  ;;  %v2020_v60 = vpack.c.bf16 %v1997_v8, %v1996_v61  ;;  %v5729_v28 = vunpack.i.h.bf16 %v5727_v5  ;;  %v5728_v35 = vunpack.i.l.bf16 %v5727_v5  ;;  %v1965_v1 = vsel %vm1946_vm8, %v1932_v51, %v5718_v7 }
 0x17d   : > { %v1966_v55 = vsel %vm1946_vm8, %v1933_v6, %v5719_v13  ;;  %v5552_v21 = vunpack.i.h.bf16 %v10279_v41  ;;  %v5551_v24 = vunpack.i.l.bf16 %v10279_v41  ;;  %v10280_v63 = vunpack.i.l.bf16 %v10255_v10 }
 0x17e   : > { %5062 = vmatprep.mubr.msk.bf16.mxu1 %vm2272_vm11, %v2020_v60  ;;  %v1998_v46 = vsel %vm1979_vm10, %v1965_v1, %v5728_v35  ;;  %v1999_v56 = vsel %vm1979_vm10, %v1966_v55, %v5729_v28  ;;  %v5734_v4 = vunpack.i.h.bf16 %v5732_v48  ;;  %v5733_v44 = vunpack.i.l.bf16 %v5732_v48 }
 0x17f   : > { %v1803_v59 = vsel %vm1781_vm3, %v10281_v37, %v10280_v63  ;;  %v5737_v54 = vpop.permute.xlu1 %5736  ;;  %v2021_v25 = vpack.c.bf16 %v1999_v56, %v1998_v46  ;;  %v1837_v31 = vsel %vm1814_vm4, %v7882_v19, %v5396_v12  ;;  %v1838_v47 = vsel %vm1814_vm4, %v7878_v53, %v5397_v23  ;;  %v10284_v23 = vld [vmem:[#allocation23_spill] sm:$0xff]  ;;  %v10286_v56 = vld [vmem:[#allocation22_spill] sm:$0xff] }
 0x180   : > { %v5742_v2 = vpop.permute.xlu0 %5741  ;;  %v1836_v30 = vsel %vm1814_vm4, %v1803_v59, %v5392_v14  ;;  %v1835_v27 = vsel %vm1814_vm4, %v10282_v58, %v5391_v16  ;;  %v5477_v57 = vunpack.i.h.bf16 %v10283_v34  ;;  %v5476_v19 = vunpack.i.l.bf16 %v10283_v34 }
 0x181   : > { %v1868_v10 = vsel %vm1847_vm5, %v1835_v27, %v5471_v18  ;;  %v1869_v62 = vsel %vm1847_vm5, %v1836_v30, %v5472_v52  ;;  %v5744_v15 = vunpack.i.h.bf16 %v5742_v2  ;;  %v5743_v43 = vunpack.i.l.bf16 %v5742_v2  ;;  %5063 = vmatmul.mubr.msk.bf16.vlgmr.msra.gmra.mrb[0].mxu1 %vm2272_vm11, %v2021_v25 }
 0x182   : > { %v1901_v12 = vsel %vm1880_vm6, %v1868_v10, %v5551_v24  ;;  %v1902_v53 = vsel %vm1880_vm6, %v1869_v62, %v5552_v21  ;;  %v5557_v14 = vunpack.i.h.bf16 %v10284_v23  ;;  %v5556_v17 = vunpack.i.l.bf16 %v10284_v23  ;;  %v10285_v24 = vld [vmem:[#allocation21_spill] sm:$0xff] }
 0x183   : > { %v1934_v45 = vsel %vm1913_vm7, %v1901_v12, %v5733_v44  ;;  %v1935_v9 = vsel %vm1913_vm7, %v1902_v53, %v5734_v4  ;;  %v5747_v32 = vpop.permute.xlu1 %5746  ;;  %v5739_v49 = vunpack.i.h.bf16 %v5737_v54  ;;  %v5738_v11 = vunpack.i.l.bf16 %v5737_v54 }
 0x184   : > { %v5752_v3 = vpop.permute.xlu0 %5751  ;;  %v1967_v50 = vsel %vm1946_vm8, %v1934_v45, %v5743_v43  ;;  %v1968_v40 = vsel %vm1946_vm8, %v1935_v9, %v5744_v15  ;;  %v5749_v0 = vunpack.i.h.bf16 %v5747_v32  ;;  %v5748_v13 = vunpack.i.l.bf16 %v5747_v32  ;;  %v10287_v43 = vld [vmem:[#allocation17_spill] sm:$0xff] }
 0x185   : > { %v5754_v26 = vunpack.i.h.bf16 %v5752_v3  ;;  %v5753_v20 = vunpack.i.l.bf16 %v5752_v3  ;;  %v1870_v7 = vsel %vm1847_vm5, %v1837_v31, %v5476_v19  ;;  %v1871_v36 = vsel %vm1847_vm5, %v1838_v47, %v5477_v57  ;;  %v10288_v57 = vld [vmem:[#allocation19_spill] sm:$0xff] }
 0x186   : > { %v1903_v33 = vsel %vm1880_vm6, %v1870_v7, %v5556_v17  ;;  %v1904_v61 = vsel %vm1880_vm6, %v1871_v36, %v5557_v14  ;;  %v10289_v7 = vld [vmem:[#allocation16_spill] sm:$0xff] }
 0x187   : > { %v2000_v39 = vsel %vm1979_vm10, %v1967_v50, %v5753_v20  ;;  %v2001_v42 = vsel %vm1979_vm10, %v1968_v40, %v5754_v26  ;;  %v5757_v8 = vpop.permute.xlu1 %5756  ;;  %v1936_v22 = vsel %vm1913_vm7, %v1903_v33, %v5738_v11  ;;  %v1937_v5 = vsel %vm1913_vm7, %v1904_v61, %v5739_v49 }
 0x188   : > { %v5762_v16 = vpop.permute.xlu0 %5761  ;;  %v2022_v29 = vpack.c.bf16 %v2001_v42, %v2000_v39  ;;  %v5759_v48 = vunpack.i.h.bf16 %v5757_v8  ;;  %v5758_v60 = vunpack.i.l.bf16 %v5757_v8  ;;  %v1969_v51 = vsel %vm1946_vm8, %v1936_v22, %v5748_v13  ;;  %v10290_v39 = vld [vmem:[#allocation18_spill] sm:$0xff] }
 0x189   : > { %v1970_v6 = vsel %vm1946_vm8, %v1937_v5, %v5749_v0  ;;  %v5764_v38 = vunpack.i.h.bf16 %v5762_v16  ;;  %v5763_v52 = vunpack.i.l.bf16 %v5762_v16  ;;  %v10292_v5 = vld [vmem:[#allocation6_spill] sm:$0xff] }
 0x18a   : > { %5066 = vmatprep.mubr.msk.bf16.mxu1 %vm2272_vm11, %v2022_v29  ;;  %v2002_v28 = vsel %vm1979_vm10, %v1969_v51, %v5758_v60  ;;  %v2003_v35 = vsel %vm1979_vm10, %v1970_v6, %v5759_v48  ;;  %v10291_v29 = vld [vmem:[#allocation25_spill] sm:$0xff] }
 0x18b   : > { %v5767_v18 = vpop.permute.xlu1 %5766  ;;  %v2023_v55 = vpack.c.bf16 %v2003_v35, %v2002_v28  ;;  %v1938_v46 = vsel %vm1913_vm7, %v10285_v24, %v5763_v52  ;;  %v1939_v63 = vsel %vm1913_vm7, %v10286_v56, %v5764_v38 }
 0x18c   : > { %v5772_v1 = vpop.permute.xlu0 %5771  ;;  %v5769_v4 = vunpack.i.h.bf16 %v5767_v18  ;;  %v5768_v44 = vunpack.i.l.bf16 %v5767_v18 }
 0x18d   : > { %v5774_v41 = vunpack.i.h.bf16 %v5772_v1  ;;  %v5773_v21 = vunpack.i.l.bf16 %v5772_v1  ;;  %5067 = vmatmul.mubr.msk.bf16.gmra.mrb[4].mxu1 %vm2272_vm11, %v2023_v55 }
 0x18e   : > { %v1940_v34 = vsel %vm1913_vm7, %v10287_v43, %v5768_v44  ;;  %v1941_v19 = vsel %vm1913_vm7, %v10288_v57, %v5769_v4 }
 0x18f   : > { %v5777_v37 = vpop.permute.xlu1 %5776  ;;  %v1971_v25 = vsel %vm1946_vm8, %v1938_v46, %v5773_v21  ;;  %v1972_v31 = vsel %vm1946_vm8, %v1939_v63, %v5774_v41 }
 0x190   : > { %v5782_v59 = vpop.permute.xlu0 %5781  ;;  %v5779_v47 = vunpack.i.h.bf16 %v5777_v37  ;;  %v5778_v30 = vunpack.i.l.bf16 %v5777_v37 }
 0x191   : > { %v5784_v54 = vunpack.i.h.bf16 %v5782_v59  ;;  %v5783_v2 = vunpack.i.l.bf16 %v5782_v59 }
 0x192   : > { %v1973_v23 = vsel %vm1946_vm8, %v1940_v34, %v5778_v30  ;;  %v1974_v14 = vsel %vm1946_vm8, %v1941_v19, %v5779_v47 }
 0x193   : > { %v2004_v58 = vsel %vm1979_vm10, %v1971_v25, %v5783_v2  ;;  %v2005_v27 = vsel %vm1979_vm10, %v1972_v31, %v5784_v54  ;;  %v5787_v10 = vpop.permute.xlu1 %5786 }
 0x194   : > { %v5792_v62 = vpop.permute.xlu0 %5791  ;;  %v2024_v15 = vpack.c.bf16 %v2005_v27, %v2004_v58  ;;  %v5789_v12 = vunpack.i.h.bf16 %v5787_v10  ;;  %v5788_v53 = vunpack.i.l.bf16 %v5787_v10 }
 0x195   : > { %v5794_v49 = vunpack.i.h.bf16 %v5792_v62  ;;  %v5793_v11 = vunpack.i.l.bf16 %v5792_v62 }
 0x196   : > { %5070 = vmatprep.mubr.msk.bf16.mxu1 %vm2272_vm11, %v2024_v15  ;;  %v2006_v17 = vsel %vm1979_vm10, %v1973_v23, %v5788_v53  ;;  %v2007_v45 = vsel %vm1979_vm10, %v1974_v14, %v5789_v12 }
 0x197   : > { %v5797_v9 = vpop.permute.xlu1 %5796  ;;  %v2025_v3 = vpack.c.bf16 %v2007_v45, %v2006_v17  ;;  %v1942_v36 = vsel %vm1913_vm7, %v10289_v7, %v5793_v11  ;;  %v1943_v42 = vsel %vm1913_vm7, %v10290_v39, %v5794_v49  ;;  %v4941_v11 = vld [vmem:[%s645_s30] ss:$0 sm:$0xff]  ;;  %v2622_v7 = vld [vmem:[%s9928_s11 + $0x10] sm:$0xff]  ;;  %s6461_s30 = smov 40  }
 0x198   : > { %v5802_v32 = vpop.permute.xlu0 %5801  ;;  %v5799_v50 = vunpack.i.h.bf16 %v5797_v9  ;;  %v5798_v40 = vunpack.i.l.bf16 %v5797_v9  ;;  %v2620_v9 = vld [vmem:[%s9928_s11] sm:$0xff] }
 0x199   : > { %v5804_v26 = vunpack.i.h.bf16 %v5802_v32  ;;  %v5803_v20 = vunpack.i.l.bf16 %v5802_v32  ;;  %5071 = vmatmul.mubr.msk.bf16.gmra.mrb[8].mxu1 %vm2272_vm11, %v2025_v3  ;;  %v2621_v3 = vld [vmem:[%s9928_s11 + $0x8] sm:$0xff] }
 0x19a   : > { %v1944_v22 = vsel %vm1913_vm7, %v10291_v29, %v5798_v40  ;;  %v1945_v48 = vsel %vm1913_vm7, %v10292_v5, %v5799_v50 }
 0x19b   : > { %v1619_v0 = vpop.permute.xlu1 %1618  ;;  %v1975_v8 = vsel %vm1946_vm8, %v1942_v36, %v5803_v20  ;;  %v1976_v16 = vsel %vm1946_vm8, %v1943_v42, %v5804_v26  ;;  %v2623_v42 = vld [vmem:[%s9928_s11 + $0x18] sm:$0xff] }
 0x19c   : > { %v5807_v13 = vpop.permute.xlu0 %5806  ;;  %v1977_v18 = vsel %vm1946_vm8, %v1944_v22, %v1619_v0  ;;  %v1978_v1 = vsel %vm1946_vm8, %v1945_v48, %v1619_v0  ;;  %v2625_v22 = vld [vmem:[%s9928_s11 + $0x28] sm:$0xff] }
 0x19d   : > { %v5809_v33 = vunpack.i.h.bf16 %v5807_v13  ;;  %v5808_v61 = vunpack.i.l.bf16 %v5807_v13 }
 0x19f   : > { %v2008_v60 = vsel %vm1979_vm10, %v1975_v8, %v5808_v61  ;;  %v2009_v51 = vsel %vm1979_vm10, %v1976_v16, %v5809_v33  ;;  %v5812_v6 = vpop.permute.xlu1 %5811  ;;  %v2624_v8 = vld [vmem:[%s9928_s11 + $0x20] sm:$0xff] }
 0x1a0   : > { %v8258_v28 = vpop.permute.xlu0 %2076  ;;  %v2026_v35 = vpack.c.bf16 %v2009_v51, %v2008_v60  ;;  %v5814_v38 = vunpack.i.h.bf16 %v5812_v6  ;;  %v5813_v52 = vunpack.i.l.bf16 %v5812_v6  ;;  %v2626_v6 = vld [vmem:[%s9928_s11 + $0x30] sm:$0xff] }
 0x1a1   : > { %10293 = vst [vmem:[#allocation41_spill] sm:$0xff] %v8258_v28 }
 0x1a2   : > { %5074 = vmatprep.mubr.msk.bf16.mxu1 %vm2272_vm11, %v2026_v35  ;;  %v2010_v55 = vsel %vm1979_vm10, %v1977_v18, %v5813_v52  ;;  %v2011_v41 = vsel %vm1979_vm10, %v1978_v1, %v5814_v38  ;;  %v2627_v18 = vld [vmem:[%s9928_s11 + $0x38] sm:$0xff]  ;;  %v2628_v1 = vld [vmem:[%s9928_s11 + $0x40] sm:$0xff] }
 0x1a3   : > { %v8265_v21 = vpop.permute.xlu1 %2081  ;;  %v2027_v46 = vpack.c.bf16 %v2011_v41, %v2010_v55 }
 0x1a4   : > { %10294 = vst [vmem:[#allocation42_spill] sm:$0xff] %v8265_v21  ;;  %v8267_v24 = vpop.permute.xlu0 %2086 }
 0x1a5   : > { %10295 = vst [vmem:[#allocation43_spill] sm:$0xff] %v8267_v24  ;;  %5075 = vmatmul.mubr.msk.bf16.gmra.mrb[12].mxu1 %vm2272_vm11, %v2027_v46 }
 0x1a7   : > { %v8270_v56 = vpop.permute.xlu1 %2091 }
 0x1a8   : > { %10296 = vst [vmem:[#allocation20_spill] sm:$0xff] %v8270_v56  ;;  %v8272_v63 = vpop.permute.xlu0 %2096 }
 0x1a9   : > { %10297 = vst [vmem:[#allocation8_spill] sm:$0xff] %v8272_v63 }
 0x1ab   : > { %v8274_v37 = vpop.permute.xlu1 %2101 }
 0x1ac   : > { %10298 = vst [vmem:[#allocation29_spill] sm:$0xff] %v8274_v37  ;;  %v8276_v59 = vpop.permute.xlu0 %2106 }
 0x1ad   : > { %10299 = vst [vmem:[#allocation4_spill] sm:$0xff] %v8276_v59 }
 0x1af   : > { %v8278_v4 = vpop.permute.xlu1 %2111 }
 0x1b0   : > { %10300 = vst [vmem:[#allocation30_spill] sm:$0xff] %v8278_v4  ;;  %v8280_v44 = vpop.permute.xlu0 %2116 }
 0x1b1   : > { %10301 = vst [vmem:[#allocation24_spill] sm:$0xff] %v8280_v44 }
 0x1b3   : > { %v8282_v54 = vpop.permute.xlu1 %2121 }
 0x1b4   : > { %10302 = vst [vmem:[#allocation32_spill] sm:$0xff] %v8282_v54  ;;  %v8284_v2 = vpop.permute.xlu0 %2126 }
 0x1b5   : > { %10303 = vst [vmem:[#allocation33_spill] sm:$0xff] %v8284_v2 }
 0x1b7   : > { %v8286_v25 = vpop.permute.xlu1 %2131 }
 0x1b8   : > { %10304 = vst [vmem:[#allocation10_spill] sm:$0xff] %v8286_v25  ;;  %v8288_v31 = vpop.permute.xlu0 %2136 }
 0x1b9   : > { %10305 = vst [vmem:[#allocation34_spill] sm:$0xff] %v8288_v31 }
 0x1bb   : > { %v8290_v47 = vpop.permute.xlu1 %2141 }
 0x1bc   : > { %10306 = vst [vmem:[#allocation28_spill] sm:$0xff] %v8290_v47  ;;  %v8292_v30 = vpop.permute.xlu0 %2146 }
 0x1bd   : > { %10307 = vst [vmem:[#allocation39_spill] sm:$0xff] %v8292_v30 }
 0x1bf   : > { %v8294_v58 = vpop.permute.xlu1 %2151 }
 0x1c0   : > { %10308 = vst [vmem:[#allocation40_spill] sm:$0xff] %v8294_v58  ;;  %v8296_v27 = vpop.permute.xlu0 %2156 }
 0x1c1   : > { %10309 = vst [vmem:[#allocation31_spill] sm:$0xff] %v8296_v27 }
 0x1c4   : > { %v8298_v10 = vpop.permute.xlu1 %2161  ;;  %v8300_v62 = vpop.permute.xlu0 %2166 }
 0x1c5   : > { %10310 = vst [vmem:[#allocation11_spill] sm:$0xff] %v8298_v10  ;;  %10311 = vst [vmem:[#allocation12_spill] sm:$0xff] %v8300_v62 }
 0x1c8   : > { %v8302_v15 = vpop.permute.xlu1 %2171  ;;  %v8304_v43 = vpop.permute.xlu0 %2176 }
 0x1c9   : > { %10312 = vst [vmem:[#allocation9_spill] sm:$0xff] %v8302_v15  ;;  %10313 = vst [vmem:[#allocation44_spill] sm:$0xff] %v8304_v43 }
 0x1cc   : > { %v8306_v34 = vpop.permute.xlu1 %2181  ;;  %v8308_v57 = vpop.permute.xlu0 %2186 }
 0x1cd   : > { %10314 = vst [vmem:[#allocation7_spill] sm:$0xff] %v8306_v34  ;;  %10315 = vst [vmem:[#allocation45_spill] sm:$0xff] %v8308_v57 }
 0x1d0   : > { %v8310_v19 = vpop.permute.xlu1 %2191  ;;  %v8312_v12 = vpop.permute.xlu0 %2196 }
 0x1d1   : > { %10316 = vst [vmem:[#allocation46_spill] sm:$0xff] %v8310_v19  ;;  %10317 = vst [vmem:[#allocation47_spill] sm:$0xff] %v8312_v12 }
 0x1d4   : > { %v8314_v53 = vpop.permute.xlu1 %2201  ;;  %v8316_v23 = vpop.permute.xlu0 %2206 }
 0x1d5   : > { %10318 = vst [vmem:[#allocation48_spill] sm:$0xff] %v8314_v53  ;;  %10319 = vst [vmem:[#allocation49_spill] sm:$0xff] %v8316_v23 }
 0x1d8   : > { %v8318_v14 = vpop.permute.xlu1 %2211  ;;  %v8320_v17 = vpop.permute.xlu0 %2216 }
 0x1d9   : > { %10320 = vst [vmem:[#allocation50_spill] sm:$0xff] %v8318_v14  ;;  %10321 = vst [vmem:[#allocation51_spill] sm:$0xff] %v8320_v17 }
 0x1dc   : > { %v8322_v45 = vpop.permute.xlu1 %2221  ;;  %v3913_v32 = vpop.permute.xlu0 %3912 }
 0x1dd   : > { %10322 = vst [vmem:[#allocation52_spill] sm:$0xff] %v8322_v45  ;;  %v3955_v49 = vmul.f32 %v3913_v32, %v2620_v9 }
 0x1df   : > { %v3970_v40 = vmul.f32 %v4941_v11, %v3955_v49 }
 0x1e0   : > { %v3918_v26 = vpop.permute.xlu1 %3917  ;;  %v8334_v20 = vpop.permute.xlu0 %2226 }
 0x1e1   : > { %10323 = vst [vmem:[#allocation53_spill] sm:$0xff] %v8334_v20  ;;  %v3956_v50 = vmul.f32 %v3918_v26, %v2621_v3 }
 0x1e3   : > { %v3971_v0 = vmul.f32 %v4941_v11, %v3956_v50 }
 0x1e4   : > { %v8336_v13 = vpop.permute.xlu1 %2231  ;;  %v3923_v36 = vpop.permute.xlu0 %3922 }
 0x1e5   : > { %10324 = vst [vmem:[#allocation54_spill] sm:$0xff] %v8336_v13  ;;  %v3979_v39 = vpack.c.bf16 %v3971_v0, %v3970_v40  ;;  %v3957_v33 = vmul.f32 %v3923_v36, %v2622_v7 }
 0x1e7   : > { %5078 = vmatprep.subr.bf16.mxu1 %v3979_v39  ;;  %v3972_v5 = vmul.f32 %v4941_v11, %v3957_v33  ;;  %v8371_v33 = vld [vmem:[%s9927_s10] ss:$0 sm:$0xff] }
 0x1e8   : > { %v3928_v61 = vpop.permute.xlu1 %3927  ;;  %v3933_v16 = vpop.permute.xlu0 %3932  ;;  %5079 = vmatpush3.bf16.msra.mxu1 %v3979_v39 }
 0x1e9   : > { %v3958_v29 = vmul.f32 %v3928_v61, %v2623_v42  ;;  %v3959_v60 = vmul.f32 %v3933_v16, %v2624_v8  ;;  %v8364_v42 = vld [vmem:[%s9926_s9] ss:$0 sm:$0xff] }
 0x1ea   : > { %v2240_v8 = vmul.f32 %v8364_v42, %v8258_v28 }
 0x1eb   : > { %v3973_v48 = vmul.f32 %v4941_v11, %v3958_v29  ;;  %v3974_v55 = vmul.f32 %v4941_v11, %v3959_v60  ;;  %v2241_v60 = vmul.f32 %v8364_v42, %v8265_v21 }
 0x1ec   : > { %v3938_v51 = vpop.permute.xlu1 %3937  ;;  %v3943_v35 = vpop.permute.xlu0 %3942 }
 0x1ed   : > { %v3960_v38 = vmul.f32 %v3938_v51, %v2625_v22  ;;  %v3980_v52 = vpack.c.bf16 %v3973_v48, %v3972_v5  ;;  %v3961_v46 = vmul.f32 %v3943_v35, %v2626_v6  ;;  %v2243_v22 = vmul.f32 %v8364_v42, %v8270_v56 }
 0x1ef   : > { %v3975_v41 = vmul.f32 %v4941_v11, %v3960_v38  ;;  %5080 = vmatprep.subr.bf16.mxu1 %v3980_v52  ;;  %v3976_v50 = vmul.f32 %v4941_v11, %v3961_v46  ;;  %v2244_v38 = vmul.f32 %v8364_v42, %v8272_v63 }
 0x1f0   : > { %v3948_v9 = vpop.permute.xlu1 %3947  ;;  %v3953_v32 = vpop.permute.xlu0 %3952  ;;  %5081 = vmatpush3.bf16.msra.mxu1 %v3980_v52 }
 0x1f1   : > { %v3962_v3 = vmul.f32 %v3948_v9, %v2627_v18  ;;  %v3963_v49 = vmul.f32 %v3953_v32, %v2628_v1  ;;  %v3981_v26 = vpack.c.bf16 %v3975_v41, %v3974_v55  ;;  %v2246_v1 = vmul.f32 %v8364_v42, %v8276_v59 }
 0x1f2   : > { %v2245_v55 = vmul.f32 %v8364_v42, %v8274_v37  ;;  %v2247_v9 = vmul.f32 %v8364_v42, %v8278_v4  ;;  %v10331_v37 = vmov 0.0  }
 0x1f3   : > { %v3977_v40 = vmul.f32 %v4941_v11, %v3962_v3  ;;  %v3978_v0 = vmul.f32 %v4941_v11, %v3963_v49  ;;  %5082 = vmatprep.subr.bf16.mxu1 %v3981_v26  ;;  %v2242_v11 = vmul.f32 %v8364_v42, %v8267_v24  ;;  %v8393_v49 = vmul.f32 %v8364_v42, %v8280_v44 }
 0x1f4   : > { %5083 = vmatpush3.bf16.msra.mxu1 %v3981_v26 }
 0x1f5   : > { %v3982_v7 = vpack.c.bf16 %v3977_v40, %v3976_v50  ;;  %v3983_v36 = vpack.c.bf16 %v3978_v0, %v3978_v0  ;;  %v8397_v40 = vmul.f32 %v8364_v42, %v8284_v2 }
 0x1f7   : > { %5084 = vmatprep.subr.bf16.mxu1 %v3982_v7  ;;  %v4075_v39 = vsel %vm4073_vm12, %v3983_v36, 0 }
 0x1f8   : > { %5085 = vmatpush3.bf16.msra.mxu1 %v3982_v7 }
 0x1f9   : > { %5162 = vmatprep.subr.msk.bf16.mxu1 %vm4073_vm12, %v3983_v36  ;;  %v8403_v36 = vmul.f32 %v8364_v42, %v8282_v54 }
 0x1fc   : > { %5087 = vmatpush3.bf16.msra.mxu1 %v4075_v39 }
 0x225   : > { %v5048_v61 = vpop.f32.mrb[0].mxu0 }
 0x226   : > { %v2368_v16 = vadd.f32 %v5048_v61, %v2242_v11  ;;  %v2359_v29 = vpop.f32.mrb[1].mxu0 }
 0x227   : > { %v2360_v5 = vadd.f32 %v2359_v29, %v2240_v8  ;;  %v5049_v48 = vpop.f32.mrb[2].mxu0  ;;  %v8407_v8 = vmul.f32 %v8364_v42, %v8286_v25 }
 0x228   : > { %v2494_v51 = vadd.f32 %v8371_v33, %v2368_v16  ;;  %v2371_v6 = vadd.f32 %v5049_v48, %v2243_v22  ;;  %v2362_v35 = vpop.f32.mrb[3].mxu0 }
 0x229   : > { %v2492_v52 = vadd.f32 %v8371_v33, %v2360_v5  ;;  %v2363_v18 = vadd.f32 %v2362_v35, %v2241_v60 }
 0x22a   : > { %vm2526_vm13 = vcmp.ge.f32.partialorder %v2494_v51, 0.0  ;;  %v2558_v41 = vmul.f32 0.2, %v2494_v51  ;;  %v2495_v46 = vadd.f32 %v8371_v33, %v2371_v6 }
 0x22b   : > { %vm2524_vm14 = vcmp.ge.f32.partialorder %v2492_v52, 0.0  ;;  %v2556_v32 = vmul.f32 0.2, %v2492_v52  ;;  %v2493_v3 = vadd.f32 %v8371_v33, %v2363_v18 }
 0x22c   : > { %v2590_v26 = vsel %vm2526_vm13, %v2494_v51, %v2558_v41  ;;  %vm2527_vm15 = vcmp.ge.f32.partialorder %v2495_v46, 0.0  ;;  %v2559_v50 = vmul.f32 0.2, %v2495_v46 }
 0x22d   : > { %v8399_v0 = vsel %vm2524_vm14, %v2492_v52, %v2556_v32  ;;  %vm2525_vm2 = vcmp.ge.f32.partialorder %v2493_v3, 0.0  ;;  %v2557_v7 = vmul.f32 0.2, %v2493_v3  ;;  %v2762_v39 = vrot.slane %v2590_v26, 1 }
 0x22e   : > { %v2591_v11 = vsel %vm2527_vm15, %v2495_v46, %v2559_v50  ;;  %v2672_v61 = vrot.slane %v2590_v26, 7  ;;  %v2759_v5 = vrot.slane %v8399_v0, 1 }
 0x22f   : > { %v2673_v16 = vrot.slane %v2591_v11, 7  ;;  %v2589_v29 = vsel %vm2525_vm2, %v2493_v3, %v2557_v7  ;;  %v5820_v22 = vpack.i.bf16 %v2591_v11, %v2590_v26  ;;  %v2763_v52 = vrot.slane %v2591_v11, 1 }
 0x230   : > { %v2760_v48 = vrot.slane %v2589_v29, 1  ;;  %v5835_v60 = vpack.i.bf16 %v2589_v29, %v8399_v0  ;;  %v2670_v51 = vrot.slane %v2589_v29, 7  ;;  %v8422_v3 = vmul.f32 %v8364_v42, %v8288_v31 }
 0x231   : > { %5821 = vrot.lane.b32.xlu0 %v5820_v22, %s6458_s24  ;;  %5816 = vrot.lane.b32.xlu1 %v5820_v22, %s6457_s27  ;;  %v5052_v6 = vpop.f32.mrb[4].mxu0  ;;  %v8414_v35 = vsel %vm767_vm1, %v2672_v61, %v2673_v16  ;;  %v8425_v7 = vsel %vm767_vm1, 0.0, %v2672_v61  ;;  %v8428_v16 = vsel %vm863_vm0, %v2762_v39, %v2763_v52  ;;  %v10327_v61 = vrot.slane %v8399_v0, 7 }
 0x232   : > { %10325 = vst [vmem:[#allocation55_spill] sm:$0xff] %v8414_v35  ;;  %v2384_v18 = vadd.f32 %v5052_v6, %v2246_v1  ;;  %v2375_v41 = vpop.f32.mrb[5].mxu0  ;;  %v8417_v46 = vsel %vm863_vm0, %v2759_v5, %v2760_v48  ;;  %10326 = vst [vmem:[#allocation56_spill] sm:$0xff] %v8425_v7  ;;  %v8431_v1 = vsel %vm863_vm0, %v2763_v52, 0.0  ;;  %v8440_v39 = vsel %vm863_vm0, %v2760_v48, 0.0 }
 0x233   : > { %v2376_v26 = vadd.f32 %v2375_v41, %v2244_v38  ;;  %v5053_v50 = vpop.f32.mrb[6].mxu0  ;;  %v5855_v6 = vpack.i.bf16 %v8431_v1, %v8428_v16  ;;  %v8445_v52 = vsel %vm767_vm1, %v10327_v61, %v2670_v51  ;;  %v5850_v48 = vpack.i.bf16 %v8414_v35, %v8425_v7 }
 0x234   : > { %v2498_v11 = vadd.f32 %v8371_v33, %v2384_v18  ;;  %v2387_v29 = vadd.f32 %v5053_v50, %v2247_v9  ;;  %v2378_v5 = vpop.f32.mrb[7].mxu0  ;;  %10328 = vst [vmem:[#allocation59_spill] sm:$0xff] %v8445_v52 }
 0x235   : > { %v2496_v32 = vadd.f32 %v8371_v33, %v2376_v26  ;;  %v2379_v38 = vadd.f32 %v2378_v5, %v2245_v55  ;;  %5826 = vrot.lane.b32.xlu1 %v5820_v22, %s6450_s29  ;;  %5836 = vrot.lane.b32.xlu0 %v5835_v60, %s6457_s27 }
 0x236   : > { %vm2530_vm4 = vcmp.ge.f32.partialorder %v2498_v11, 0.0  ;;  %v2562_v9 = vmul.f32 0.2, %v2498_v11  ;;  %v2499_v18 = vadd.f32 %v8371_v33, %v2387_v29 }
 0x237   : > { %vm2528_vm6 = vcmp.ge.f32.partialorder %v2496_v32, 0.0  ;;  %v2560_v55 = vmul.f32 0.2, %v2496_v32  ;;  %v2497_v22 = vadd.f32 %v8371_v33, %v2379_v38 }
 0x238   : > { %v8453_v26 = vsel %vm2530_vm4, %v2498_v11, %v2562_v9  ;;  %vm2531_vm8 = vcmp.ge.f32.partialorder %v2499_v18, 0.0  ;;  %v2563_v50 = vmul.f32 0.2, %v2499_v18 }
 0x239   : > { %v2768_v51 = vrot.slane %v8453_v26, 1  ;;  %v8456_v5 = vsel %vm2528_vm6, %v2496_v32, %v2560_v55  ;;  %vm2529_vm9 = vcmp.ge.f32.partialorder %v2497_v22, 0.0  ;;  %v2561_v29 = vmul.f32 0.2, %v2497_v22  ;;  %5851 = vrot.lane.b32.xlu0 %v5850_v48, %s6459_s26  ;;  %5831 = vrot.lane.b32.xlu1 %v5835_v60, %s6450_s29 }
 0x23a   : > { %v2765_v38 = vrot.slane %v8456_v5, 1  ;;  %v2595_v61 = vsel %vm2531_vm8, %v2499_v18, %v2563_v50  ;;  %v10035_v9 = vrot.slane %v8456_v5, 7  ;;  %v10034_v32 = vrot.slane %v8453_v26, 7 }
 0x23b   : > { %v2679_v41 = vrot.slane %v2595_v61, 7  ;;  %v2769_v31 = vrot.slane %v2595_v61, 1  ;;  %v2593_v54 = vsel %vm2529_vm9, %v2497_v22, %v2561_v29  ;;  %v2254_v60 = vmul.f32 %v8364_v42, %v8292_v30 }
 0x23c   : > { %v2676_v55 = vrot.slane %v2593_v54, 7  ;;  %v8466_v25 = vpack.i.bf16 %v2593_v54, %v8456_v5  ;;  %v2766_v44 = vrot.slane %v2593_v54, 1 }
 0x23d   : > { %v5056_v2 = vpop.f32.mrb[8].mxu0  ;;  %5856 = vrot.lane.b32.xlu0 %v5855_v6, %s6460_s28  ;;  %5841 = vrot.lane.b32.xlu1 %v5850_v48, %s6455_s25  ;;  %v8473_v18 = vsel %vm863_vm0, %v2768_v51, %v2769_v31  ;;  %v8478_v22 = vsel %vm767_vm1, %v10034_v32, %v2679_v41  ;;  %v5860_v41 = vpack.i.bf16 %v8417_v46, %v10331_v37 }
 0x23e   : > { %10329 = vst [vmem:[#allocation38_spill] sm:$0xff] %v8478_v22  ;;  %v2400_v50 = vadd.f32 %v5056_v2, %v8397_v40  ;;  %v2391_v54 = vpop.f32.mrb[9].mxu0  ;;  %v8482_v29 = vsel %vm863_vm0, %v2765_v38, %v2766_v44  ;;  %v8485_v11 = vsel %vm863_vm0, %v2766_v44, 0.0  ;;  %v8490_v48 = vsel %vm767_vm1, %v10035_v9, %v2676_v55 }
 0x23f   : > { %10330 = vst [vmem:[#allocation61_spill] sm:$0xff] %v8490_v48  ;;  %v2392_v51 = vadd.f32 %v2391_v54, %v8393_v49  ;;  %v5057_v30 = vpop.f32.mrb[10].mxu0  ;;  %v8497_v2 = vpack.i.bf16 %v8485_v11, %v8482_v29  ;;  %v10332_v55 = vrot.slane %v8399_v0, 7  ;;  %v8517_v0 = vsel %vm863_vm0, %v2769_v31, 0.0 }
 0x240   : > { %v2502_v44 = vadd.f32 %v8371_v33, %v2400_v50  ;;  %v2403_v38 = vadd.f32 %v5057_v30, %v8407_v8  ;;  %v2394_v32 = vpop.f32.mrb[11].mxu0  ;;  %v10333_v54 = vpack.i.bf16 %v8428_v16, %v8440_v39 }
 0x241   : > { %v8506_v49 = vsel %vm767_vm1, 0.0, %v10332_v55  ;;  %v2500_v9 = vadd.f32 %v8371_v33, %v2392_v51  ;;  %v2395_v4 = vadd.f32 %v2394_v32, %v8403_v36  ;;  %5846 = vrot.lane.b32.xlu1 %v5855_v6, %s6461_s30  ;;  %5861 = vrot.lane.b32.xlu0 %v5860_v41, %s6453_s0  ;;  %v8522_v36 = vpack.i.bf16 %v2595_v61, %v8453_v26 }
 0x242   : > { %v5870_v30 = vpack.i.bf16 %v8445_v52, %v8506_v49  ;;  %vm2534_vm11 = vcmp.ge.f32.partialorder %v2502_v44, 0.0  ;;  %v2566_v8 = vmul.f32 0.2, %v2502_v44  ;;  %v2503_v50 = vadd.f32 %v8371_v33, %v2403_v38 }
 0x243   : > { %vm2532_vm13 = vcmp.ge.f32.partialorder %v2500_v9, 0.0  ;;  %v2564_v55 = vmul.f32 0.2, %v2500_v9  ;;  %v2501_v51 = vadd.f32 %v8371_v33, %v2395_v4  ;;  %v2253_v4 = vmul.f32 %v8364_v42, %v8290_v47 }
 0x244   : > { %v8524_v6 = vsel %vm2534_vm11, %v2502_v44, %v2566_v8  ;;  %vm2535_vm14 = vcmp.ge.f32.partialorder %v2503_v50, 0.0  ;;  %v2567_v32 = vmul.f32 0.2, %v2503_v50  ;;  %v2255_v44 = vmul.f32 %v8364_v42, %v8294_v58 }
 0x245   : > { %v8526_v41 = vsel %vm2532_vm13, %v2500_v9, %v2564_v55  ;;  %vm2533_vm15 = vcmp.ge.f32.partialorder %v2501_v51, 0.0  ;;  %v2565_v31 = vmul.f32 0.2, %v2501_v51  ;;  %5866 = vrot.lane.b32.xlu1 %v10333_v54, %s6453_s0  ;;  %5871 = vrot.lane.b32.xlu0 %v5870_v30, %s6455_s25  ;;  %v8539_v9 = vmul.f32 %v8364_v42, %v8296_v27 }
 0x246   : > { %v2599_v61 = vsel %vm2535_vm14, %v2503_v50, %v2567_v32  ;;  %v8543_v38 = vpack.i.bf16 %v8517_v0, %v8473_v18  ;;  %v2774_v16 = vrot.slane %v8524_v6, 1  ;;  %v10045_v30 = vrot.slane %v8526_v41, 7 }
 0x247   : > { %v2775_v54 = vrot.slane %v2599_v61, 1  ;;  %v2597_v8 = vsel %vm2533_vm15, %v2501_v51, %v2565_v31  ;;  %v2771_v32 = vrot.slane %v8526_v41, 1  ;;  %v10334_v27 = vpack.i.bf16 %v8440_v39, %v8417_v46 }
 0x248   : > { %v2682_v55 = vrot.slane %v2597_v8, 7  ;;  %v8548_v50 = vpack.i.bf16 %v2597_v8, %v8526_v41  ;;  %v5060_v40 = vpop.f32.mrb[12].mxu0  ;;  %v2772_v47 = vrot.slane %v2597_v8, 1  ;;  %v2258_v31 = vmul.f32 %v8364_v42, %v8300_v62 }
 0x249   : > { %5881 = vrot.lane.b32.xlu1 %v8466_v25, %s6458_s24  ;;  %5876 = vrot.lane.b32.xlu0 %v10334_v27, %s6461_s30  ;;  %v2416_v58 = vadd.f32 %v5060_v40, %v2254_v60  ;;  %v2407_v51 = vpop.f32.mrb[13].mxu0  ;;  %v8565_v59 = vsel %vm863_vm0, %v2774_v16, %v2775_v54  ;;  %v2685_v56 = vrot.slane %v2599_v61, 7  ;;  %v10336_v40 = vrot.slane %v8456_v5, 7 }
 0x24a   : > { %v8562_v63 = vsel %vm767_vm1, %v10045_v30, %v2682_v55  ;;  %v2408_v21 = vadd.f32 %v2407_v51, %v8422_v3  ;;  %v5061_v28 = vpop.f32.mrb[14].mxu0  ;;  %v8569_v27 = vsel %vm863_vm0, %v2771_v32, %v2772_v47  ;;  %v8572_v46 = vsel %vm863_vm0, %v2772_v47, 0.0 }
 0x24b   : > { %10335 = vst [vmem:[#allocation26_spill] sm:$0xff] %v8562_v63  ;;  %v2419_v39 = vadd.f32 %v5061_v28, %v2255_v44  ;;  %v2410_v60 = vpop.f32.mrb[15].mxu0  ;;  %v8577_v8 = vsel %vm767_vm1, 0.0, %v10336_v40  ;;  %v8581_v16 = vpack.i.bf16 %v8572_v46, %v8569_v27  ;;  %v10047_v47 = vrot.slane %v8524_v6, 7 }
 0x24c   : > { %10337 = vst [vmem:[#allocation2_spill] sm:$0xff] %v8577_v8  ;;  %v2504_v55 = vadd.f32 %v8371_v33, %v2408_v21  ;;  %v2411_v32 = vadd.f32 %v2410_v60, %v2253_v4  ;;  %v2506_v5 = vadd.f32 %v8371_v33, %v2416_v58  ;;  %v5890_v51 = vpack.i.bf16 %v8490_v48, %v8577_v8 }
 0x24d   : > { %5886 = vrot.lane.b32.xlu1 %v8466_v25, %s6450_s29  ;;  %5896 = vrot.lane.b32.xlu0 %v8497_v2, %s6460_s28  ;;  %v2507_v44 = vadd.f32 %v8371_v33, %v2419_v39  ;;  %v2257_v21 = vmul.f32 %v8364_v42, %v8298_v10  ;;  %v8603_v40 = vsel %vm767_vm1, %v10047_v47, %v2685_v56  ;;  %v10339_v39 = vrot.slane %v8453_v26, 7 }
 0x24e   : > { %vm2536_vm2 = vcmp.ge.f32.partialorder %v2504_v55, 0.0  ;;  %v2568_v4 = vmul.f32 0.2, %v2504_v55  ;;  %v2505_v60 = vadd.f32 %v8371_v33, %v2411_v32  ;;  %10338 = vst [vmem:[#allocation57_spill] sm:$0xff] %v8603_v40  ;;  %v2259_v58 = vmul.f32 %v8364_v42, %v8302_v15 }
 0x24f   : > { %v2571_v28 = vmul.f32 0.2, %v2507_v44  ;;  %v8610_v3 = vsel %vm767_vm1, 0.0, %v10339_v39  ;;  %vm2539_vm4 = vcmp.ge.f32.partialorder %v2507_v44, 0.0  ;;  %v10341_v56 = vpack.i.bf16 %v8482_v29, %v8431_v1 }
 0x250   : > { %10340 = vst [vmem:[#allocation36_spill] sm:$0xff] %v8610_v3  ;;  %v8612_v30 = vsel %vm2536_vm2, %v2504_v55, %v2568_v4  ;;  %vm2537_vm6 = vcmp.ge.f32.partialorder %v2505_v60, 0.0  ;;  %v2569_v10 = vmul.f32 0.2, %v2505_v60  ;;  %v2570_v32 = vmul.f32 0.2, %v2506_v5 }
 0x251   : > { %5891 = vrot.lane.b32.xlu1 %v5890_v51, %s6459_s26  ;;  %5901 = vrot.lane.b32.xlu0 %v10341_v56, %s6453_s0  ;;  %v8621_v47 = vpack.i.bf16 %v8478_v22, %v8610_v3  ;;  %v8624_v26 = vpack.i.bf16 %v2599_v61, %v8524_v6  ;;  %vm2538_vm8 = vcmp.ge.f32.partialorder %v2506_v5, 0.0  ;;  %v2777_v55 = vrot.slane %v8612_v30, 1 }
 0x252   : > { %v2601_v4 = vsel %vm2537_vm6, %v2505_v60, %v2569_v10  ;;  %v2603_v39 = vsel %vm2539_vm4, %v2507_v44, %v2571_v28  ;;  %v8628_v62 = vsel %vm863_vm0, %v2775_v54, 0.0  ;;  %v10052_v1 = vrot.slane %v8612_v30, 7 }
 0x253   : > { %v2688_v15 = vrot.slane %v2601_v4, 7  ;;  %v10342_v56 = vpack.i.bf16 %v8473_v18, %v8485_v11  ;;  %v8638_v61 = vpack.i.bf16 %v8628_v62, %v8565_v59  ;;  %v8641_v10 = vpack.i.bf16 %v2601_v4, %v8612_v30 }
 0x254   : > { %v5064_v29 = vpop.f32.mrb[0].mxu1  ;;  %v2778_v28 = vrot.slane %v2601_v4, 1  ;;  %v8643_v54 = vsel %vm2538_vm8, %v2506_v5, %v2570_v32  ;;  %v2781_v11 = vrot.slane %v2603_v39, 1 }
 0x255   : > { %5906 = vrot.lane.b32.xlu1 %v10342_v56, %s6453_s0  ;;  %5911 = vrot.lane.b32.xlu0 %v5890_v51, %s6455_s25  ;;  %v2432_v44 = vadd.f32 %v5064_v29, %v2258_v31  ;;  %v2423_v60 = vpop.f32.mrb[1].mxu1  ;;  %v8648_v24 = vsel %vm767_vm1, %v10052_v1, %v2688_v15  ;;  %v2780_v31 = vrot.slane %v8643_v54, 1  ;;  %v2260_v29 = vmul.f32 %v8364_v42, %v8304_v43 }
 0x256   : > { %10343 = vst [vmem:[#allocation60_spill] sm:$0xff] %v8648_v24  ;;  %v2424_v18 = vadd.f32 %v2423_v60, %v8539_v9  ;;  %v5065_v51 = vpop.f32.mrb[2].mxu1  ;;  %v8652_v56 = vsel %vm863_vm0, %v2777_v55, %v2778_v28  ;;  %v8656_v5 = vsel %vm863_vm0, %v2778_v28, 0.0 }
 0x257   : > { %v2510_v37 = vadd.f32 %v8371_v33, %v2432_v44  ;;  %v2435_v22 = vadd.f32 %v5065_v51, %v2259_v58  ;;  %v2426_v4 = vpop.f32.mrb[3].mxu1  ;;  %v8666_v9 = vpack.i.bf16 %v8656_v5, %v8652_v56  ;;  %v2691_v58 = vrot.slane %v2603_v39, 7 }
 0x258   : > { %v2508_v32 = vadd.f32 %v8371_v33, %v2424_v18  ;;  %v2427_v15 = vadd.f32 %v2426_v4, %v2257_v21  ;;  %v8675_v60 = vsel %vm863_vm0, %v2780_v31, %v2781_v11  ;;  %v2262_v31 = vmul.f32 %v8364_v42, %v8308_v57 }
 0x259   : > { %5916 = vrot.lane.b32.xlu1 %v8621_v47, %s6455_s25  ;;  %5921 = vrot.lane.b32.xlu0 %v8466_v25, %s6457_s27  ;;  %v2511_v55 = vadd.f32 %v8371_v33, %v2435_v22  ;;  %v10058_v22 = vrot.slane %v8643_v54, 7  ;;  %v2574_v51 = vmul.f32 0.2, %v2510_v37  ;;  %vm2542_vm14 = vcmp.ge.f32.partialorder %v2510_v37, 0.0 }
 0x25a   : > { %vm2540_vm9 = vcmp.ge.f32.partialorder %v2508_v32, 0.0  ;;  %v2572_v21 = vmul.f32 0.2, %v2508_v32  ;;  %v2509_v44 = vadd.f32 %v8371_v33, %v2427_v15  ;;  %v2261_v18 = vmul.f32 %v8364_v42, %v8306_v34 }
 0x25b   : > { %vm2543_vm11 = vcmp.ge.f32.partialorder %v2511_v55, 0.0  ;;  %v2575_v25 = vmul.f32 0.2, %v2511_v55  ;;  %v8693_v28 = vsel %vm767_vm1, %v10058_v22, %v2691_v58  ;;  %v10345_v57 = vrot.slane %v8526_v41, 7 }
 0x25c   : > { %vm2541_vm13 = vcmp.ge.f32.partialorder %v2509_v44, 0.0  ;;  %v2573_v4 = vmul.f32 0.2, %v2509_v44  ;;  %v8686_v15 = vsel %vm2540_vm9, %v2508_v32, %v2572_v21  ;;  %10344 = vst [vmem:[#allocation37_spill] sm:$0xff] %v8693_v28  ;;  %v8705_v21 = vpack.i.bf16 %v2603_v39, %v8643_v54 }
 0x25d   : > { %5926 = vrot.lane.b32.xlu1 %v8522_v36, %s6457_s27  ;;  %5931 = vrot.lane.b32.xlu0 %v8497_v2, %s6461_s30  ;;  %v8695_v1 = vsel %vm2543_vm11, %v2511_v55, %v2575_v25  ;;  %v2263_v2 = vmul.f32 %v8364_v42, %v8310_v19  ;;  %v8702_v32 = vsel %vm767_vm1, 0.0, %v10345_v57  ;;  %v8707_v34 = vsel %vm2542_vm14, %v2510_v37, %v2574_v51 }
 0x25e   : > { %v2605_v43 = vsel %vm2541_vm13, %v2509_v44, %v2573_v4  ;;  %10346 = vst [vmem:[#allocation5_spill] sm:$0xff] %v8702_v32  ;;  %v8714_v58 = vsel %vm863_vm0, %v2781_v11, 0.0  ;;  %v10062_v41 = vrot.slane %v8686_v15, 7  ;;  %v2787_v57 = vrot.slane %v8695_v1, 1 }
 0x25f   : > { %v2694_v3 = vrot.slane %v2605_v43, 7  ;;  %v8720_v39 = vpack.i.bf16 %v8714_v58, %v8675_v60  ;;  %v8723_v37 = vpack.i.bf16 %v2605_v43, %v8686_v15  ;;  %v2786_v51 = vrot.slane %v8707_v34, 1 }
 0x260   : > { %v5068_v48 = vpop.f32.mrb[4].mxu1  ;;  %v2783_v4 = vrot.slane %v8686_v15, 1 }
 0x261   : > { %5936 = vrot.lane.b32.xlu1 %v8543_v38, %s6461_s30  ;;  %5941 = vrot.lane.b32.xlu0 %v8621_v47, %s6459_s26  ;;  %v2439_v55 = vpop.f32.mrb[5].mxu1  ;;  %v8727_v47 = vpack.i.bf16 %v8562_v63, %v8702_v32  ;;  %v8732_v11 = vsel %vm767_vm1, %v10062_v41, %v2694_v3  ;;  %v2448_v22 = vadd.f32 %v5068_v48, %v2262_v31 }
 0x262   : > { %v2440_v44 = vadd.f32 %v2439_v55, %v2260_v29  ;;  %v5069_v25 = vpop.f32.mrb[6].mxu1  ;;  %10347 = vst [vmem:[#allocation15_spill] sm:$0xff] %v8732_v11  ;;  %v2784_v29 = vrot.slane %v2605_v43, 1  ;;  %v8742_v3 = vsel %vm863_vm0, %v2786_v51, %v2787_v57  ;;  %v2267_v51 = vmul.f32 %v8364_v42, %v8318_v14 }
 0x263   : > { %v2442_v19 = vpop.f32.mrb[7].mxu1  ;;  %v2451_v8 = vadd.f32 %v5069_v25, %v2263_v2  ;;  %v2514_v48 = vadd.f32 %v8371_v33, %v2448_v22  ;;  %v2697_v22 = vrot.slane %v8695_v1, 7  ;;  %v8797_v14 = vsel %vm863_vm0, %v2787_v57, 0.0 }
 0x264   : > { %v2443_v35 = vadd.f32 %v2442_v19, %v2261_v18  ;;  %v2512_v55 = vadd.f32 %v8371_v33, %v2440_v44  ;;  %v8746_v63 = vsel %vm863_vm0, %v2783_v4, %v2784_v29  ;;  %v2266_v19 = vmul.f32 %v8364_v42, %v8316_v23 }
 0x265   : > { %5946 = vrot.lane.b32.xlu1 %v8727_v47, %s6459_s26  ;;  %5951 = vrot.lane.b32.xlu0 %v8522_v36, %s6458_s24  ;;  %v2264_v18 = vmul.f32 %v8364_v42, %v8312_v12  ;;  %v8754_v43 = vsel %vm863_vm0, %v2784_v29, 0.0  ;;  %v2515_v31 = vadd.f32 %v8371_v33, %v2451_v8  ;;  %vm2546_vm4 = vcmp.ge.f32.partialorder %v2514_v48, 0.0 }
 0x266   : > { %v2513_v41 = vadd.f32 %v8371_v33, %v2443_v35  ;;  %v2265_v35 = vmul.f32 %v8364_v42, %v8314_v53  ;;  %v2576_v44 = vmul.f32 0.2, %v2512_v55  ;;  %v8766_v25 = vpack.i.bf16 %v8754_v43, %v8746_v63 }
 0x267   : > { %vm2544_vm2 = vcmp.ge.f32.partialorder %v2512_v55, 0.0  ;;  %v10072_v53 = vrot.slane %v8707_v34, 7  ;;  %v2578_v12 = vmul.f32 0.2, %v2514_v48  ;;  %v2579_v23 = vmul.f32 0.2, %v2515_v31 }
 0x268   : > { %vm2545_vm15 = vcmp.ge.f32.partialorder %v2513_v41, 0.0  ;;  %v2577_v2 = vmul.f32 0.2, %v2513_v41  ;;  %v8787_v8 = vpack.i.bf16 %v8695_v1, %v8707_v34  ;;  %vm2547_vm6 = vcmp.ge.f32.partialorder %v2515_v31, 0.0 }
 0x269   : > { %5956 = vrot.lane.b32.xlu1 %v8548_v50, %s6458_s24  ;;  %5961 = vrot.lane.b32.xlu0 %v8543_v38, %s6460_s28  ;;  %v8774_v38 = vmul.f32 %v8364_v42, %v8320_v17  ;;  %v8789_v17 = vsel %vm2544_vm2, %v2512_v55, %v2576_v44  ;;  %v8802_v1 = vpack.i.bf16 %v8797_v14, %v8742_v3 }
 0x26a   : > { %v8778_v29 = vsel %vm2545_vm15, %v2513_v41, %v2577_v2  ;;  %v8794_v2 = vsel %vm767_vm1, %v10072_v53, %v2697_v22  ;;  %v2270_v22 = vmul.f32 %v8364_v42, %v8334_v20  ;;  %v2269_v57 = vmul.f32 %v8364_v42, %v8322_v45 }
 0x26b   : > { %10348 = vst [vmem:[#allocation27_spill] sm:$0xff] %v8794_v2 }
 0x26c   : > { %v5072_v32 = vpop.f32.mrb[8].mxu1 }
 0x26d   : > { %5966 = vrot.lane.b32.xlu1 %v8522_v36, %s6450_s29  ;;  %5971 = vrot.lane.b32.xlu0 %v8581_v16, %s6460_s28  ;;  %v2464_v4 = vadd.f32 %v5072_v32, %v2266_v19  ;;  %v2455_v41 = vpop.f32.mrb[9].mxu1  ;;  %v2700_v36 = vrot.slane %v8778_v29, 7 }
 0x26e   : > { %v2456_v7 = vadd.f32 %v2455_v41, %v2264_v18  ;;  %v5073_v52 = vpop.f32.mrb[10].mxu1  ;;  %v10349_v18 = vpack.i.bf16 %v8569_v27, %v8517_v0  ;;  %v10350_v27 = vrot.slane %v8524_v6, 7  ;;  %v10353_v6 = vrot.slane %v8612_v30, 7 }
 0x26f   : > { %v2518_v32 = vadd.f32 %v8371_v33, %v2464_v4  ;;  %v2467_v55 = vadd.f32 %v5073_v52, %v2267_v51  ;;  %v2458_v19 = vpop.f32.mrb[11].mxu1  ;;  %v10074_v52 = vrot.slane %v8789_v17, 7  ;;  %v8818_v51 = vsel %vm2546_vm4, %v2514_v48, %v2578_v12 }
 0x270   : > { %v2516_v44 = vadd.f32 %v8371_v33, %v2456_v7  ;;  %v2459_v53 = vadd.f32 %v2458_v19, %v2265_v35  ;;  %v2611_v4 = vsel %vm2547_vm6, %v2515_v31, %v2579_v23  ;;  %v8831_v12 = vsel %vm767_vm1, 0.0, %v10350_v27 }
 0x271   : > { %5976 = vrot.lane.b32.xlu1 %v8548_v50, %s6450_s29  ;;  %5981 = vrot.lane.b32.xlu0 %v10349_v18, %s6453_s0  ;;  %v2582_v41 = vmul.f32 0.2, %v2518_v32  ;;  %vm2550_vm8 = vcmp.ge.f32.partialorder %v2518_v32, 0.0  ;;  %v2519_v7 = vadd.f32 %v8371_v33, %v2467_v55  ;;  %v8825_v35 = vsel %vm767_vm1, %v10074_v52, %v2700_v36  ;;  %10351 = vst [vmem:[#allocation3_spill] sm:$0xff] %v8831_v12 }
 0x272   : > { %v2580_v45 = vmul.f32 0.2, %v2516_v44  ;;  %vm2548_vm9 = vcmp.ge.f32.partialorder %v2516_v44, 0.0  ;;  %v2517_v0 = vadd.f32 %v8371_v33, %v2459_v53  ;;  %v2271_v23 = vmul.f32 %v8364_v42, %v8336_v13 }
 0x273   : > { %v2792_v48 = vrot.slane %v8818_v51, 1  ;;  %v2793_v31 = vrot.slane %v2611_v4, 1  ;;  %v10352_v55 = vpack.i.bf16 %v8565_v59, %v8572_v46  ;;  %v5995_v53 = vpack.i.bf16 %v8603_v40, %v8831_v12 }
 0x274   : > { %v8847_v36 = vsel %vm767_vm1, 0.0, %v10353_v6  ;;  %v2789_v42 = vrot.slane %v8789_v17, 1  ;;  %v2703_v19 = vrot.slane %v2611_v4, 7  ;;  %v8851_v18 = vsel %vm2550_vm8, %v2518_v32, %v2582_v41 }
 0x275   : > { %5986 = vrot.lane.b32.xlu1 %v10352_v55, %s6453_s0  ;;  %5991 = vrot.lane.b32.xlu0 %v8727_v47, %s6455_s25  ;;  %10354 = vst [vmem:[#allocation23_spill] sm:$0xff] %v8847_v36  ;;  %v8855_v59 = vpack.i.bf16 %v8778_v29, %v8789_v17  ;;  %v8857_v46 = vsel %vm2548_vm9, %v2516_v44, %v2580_v45  ;;  %vm2551_vm11 = vcmp.ge.f32.partialorder %v2519_v7, 0.0  ;;  %v2583_v47 = vmul.f32 0.2, %v2519_v7 }
 0x276   : > { %vm2549_vm13 = vcmp.ge.f32.partialorder %v2517_v0, 0.0  ;;  %v2790_v30 = vrot.slane %v8778_v29, 1  ;;  %v2581_v27 = vmul.f32 0.2, %v2517_v0  ;;  %v8864_v32 = vsel %vm863_vm0, %v2792_v48, %v2793_v31 }
 0x277   : > { %v10079_v41 = vrot.slane %v8818_v51, 7  ;;  %v8874_v29 = vpack.i.bf16 %v2611_v4, %v8818_v51  ;;  %vm3795_vm6 = vcmask 392192   ;;  %vm3828_vm8 = vcmask 457728  }
 0x278   : > { %v5076_v55 = vpop.f32.mrb[12].mxu1  ;;  %v8868_v44 = vsel %vm863_vm0, %v2789_v42, %v2790_v30  ;;  %v8871_v52 = vsel %vm863_vm0, %v2790_v30, 0.0  ;;  %v2615_v42 = vsel %vm2551_vm11, %v2519_v7, %v2583_v47  ;;  %v8899_v7 = vsel %vm863_vm0, %v2793_v31, 0.0 }
 0x279   : > { %5996 = vrot.lane.b32.xlu1 %v5995_v53, %s6455_s25  ;;  %6001 = vrot.lane.b32.xlu0 %v8548_v50, %s6457_s27  ;;  %v2480_v6 = vadd.f32 %v5076_v55, %v2270_v22  ;;  %v2471_v45 = vpop.f32.mrb[13].mxu1  ;;  %v8879_v50 = vpack.i.bf16 %v8871_v52, %v8868_v44  ;;  %vm3861_vm9 = vcmask 523264   ;;  %vm4024_vm11 = vcmask 588800  }
 0x27a   : > { %v2472_v13 = vadd.f32 %v2471_v45, %v8774_v38  ;;  %v5077_v20 = vpop.f32.mrb[14].mxu1  ;;  %v8890_v38 = vsel %vm767_vm1, %v10079_v41, %v2703_v19  ;;  %v2613_v45 = vsel %vm2549_vm13, %v2517_v0, %v2581_v27  ;;  %v2798_v0 = vrot.slane %v8851_v18, 1 }
 0x27b   : > { %v2522_v30 = vadd.f32 %v8371_v33, %v2480_v6  ;;  %v2483_v55 = vadd.f32 %v5077_v20, %v2271_v23  ;;  %v2474_v4 = vpop.f32.mrb[15].mxu1  ;;  %v8904_v23 = vpack.i.bf16 %v8648_v24, %v8847_v36  ;;  %v8911_v19 = vpack.i.bf16 %v8899_v7, %v8864_v32 }
 0x27c   : > { %v2520_v40 = vadd.f32 %v8371_v33, %v2472_v13  ;;  %v2475_v12 = vadd.f32 %v2474_v4, %v2269_v57  ;;  %v2795_v13 = vrot.slane %v8857_v46, 1  ;;  %v2706_v47 = vrot.slane %v2613_v45, 7 }
 0x27d   : > { %6006 = vrot.lane.b32.xlu1 %v8624_v26, %s6457_s27  ;;  %6011 = vrot.lane.b32.xlu0 %v8581_v16, %s6461_s30  ;;  %v2523_v20 = vadd.f32 %v8371_v33, %v2483_v55  ;;  %v2799_v16 = vrot.slane %v2615_v42, 1  ;;  %v2586_v31 = vmul.f32 0.2, %v2522_v30  ;;  %vm2554_vm14 = vcmp.ge.f32.partialorder %v2522_v30, 0.0 }
 0x27e   : > { %v2521_v57 = vadd.f32 %v8371_v33, %v2475_v12  ;;  %v2584_v27 = vmul.f32 0.2, %v2520_v40  ;;  %vm2552_vm15 = vcmp.ge.f32.partialorder %v2520_v40, 0.0  ;;  %v2709_v55 = vrot.slane %v2615_v42, 7 }
 0x27f   : > { %v2587_v4 = vmul.f32 0.2, %v2523_v20  ;;  %v10083_v33 = vrot.slane %v8857_v46, 7  ;;  %vm2555_vm4 = vcmp.ge.f32.partialorder %v2523_v20, 0.0  ;;  %v8918_v48 = vpack.i.bf16 %v2613_v45, %v8857_v46 }
 0x280   : > { %vm2553_vm2 = vcmp.ge.f32.partialorder %v2521_v57, 0.0  ;;  %v2585_v6 = vmul.f32 0.2, %v2521_v57  ;;  %v2618_v22 = vsel %vm2554_vm14, %v2522_v30, %v2586_v31  ;;  %v8920_v41 = vsel %vm2552_vm15, %v2520_v40, %v2584_v27 }
 0x281   : > { %6016 = vrot.lane.b32.xlu1 %v8638_v61, %s6461_s30  ;;  %6021 = vrot.lane.b32.xlu0 %v5995_v53, %s6459_s26  ;;  %v8925_v24 = vsel %vm767_vm1, %v10083_v33, %v2706_v47  ;;  %v2796_v53 = vrot.slane %v2613_v45, 1  ;;  %v10082_v40 = vrot.slane %v8851_v18, 7  ;;  %v8936_v30 = vpack.i.bf16 %v2615_v42, %v8851_v18 }
 0x282   : > { %v2617_v12 = vsel %vm2553_vm2, %v2521_v57, %v2585_v6  ;;  %v8932_v57 = vsel %vm863_vm0, %v2798_v0, %v2799_v16  ;;  %v2619_v6 = vsel %vm2555_vm4, %v2523_v20, %v2587_v4  ;;  %v8945_v27 = vsel %vm863_vm0, %v2799_v16, 0.0 }
 0x283   : > { %v2712_v36 = vrot.slane %v2617_v12, 7  ;;  %v8939_v47 = vsel %vm863_vm0, %v2795_v13, %v2796_v53  ;;  %v8942_v31 = vsel %vm863_vm0, %v2796_v53, 0.0  ;;  %v10085_v45 = vrot.slane %v8920_v41, 7 }
 0x284   : > { %v8950_v0 = vpack.i.bf16 %v8942_v31, %v8939_v47  ;;  %v8959_v13 = vsel %vm767_vm1, %v10082_v40, %v2709_v55  ;;  %v8967_v16 = vpack.i.bf16 %v8945_v27, %v8932_v57  ;;  %v2837_v53 = vrot.slane %v2619_v6, 7 }
 0x285   : > { %6026 = vrot.lane.b32.xlu1 %v8904_v23, %s6459_s26  ;;  %6031 = vrot.lane.b32.xlu0 %v8624_v26, %s6458_s24  ;;  %v8972_v4 = vsel %vm767_vm1, %v10085_v45, %v2712_v36  ;;  %v2841_v42 = vrot.slane %v2618_v22, 1  ;;  %v8975_v55 = vpack.i.bf16 %v2617_v12, %v8920_v41  ;;  %v2801_v20 = vrot.slane %v8920_v41, 1 }
 0x286   : > { %10355 = vst [vmem:[#allocation21_spill] sm:$0xff] %v8967_v16  ;;  %10356 = vst [vmem:[#allocation22_spill] sm:$0xff] %v8972_v4  ;;  %v2802_v40 = vrot.slane %v2617_v12, 1  ;;  %v2836_v33 = vrot.slane %v2618_v22, 7  ;;  %v2842_v16 = vrot.slane %v2619_v6, 1 }
 0x287   : > { %10357 = vst [vmem:[#allocation17_spill] sm:$0xff] %v8975_v55 }
 0x288   : > { %v8985_v36 = vsel %vm863_vm0, %v2801_v20, %v2802_v40  ;;  %v8988_v45 = vsel %vm863_vm0, %v2802_v40, 0.0  ;;  %v2838_v55 = vsel %vm767_vm1, %v2836_v33, %v2837_v53  ;;  %v2840_v12 = vsel %vm767_vm1, 0.0, %v2836_v33 }
 0x289   : > { %6036 = vrot.lane.b32.xlu1 %v8641_v10, %s6458_s24  ;;  %6041 = vrot.lane.b32.xlu0 %v8638_v61, %s6460_s28  ;;  %v8982_v61 = vpack.i.bf16 %v2619_v6, %v2618_v22  ;;  %10359 = vst [vmem:[#allocation16_spill] sm:$0xff] %v8988_v45  ;;  %v8994_v4 = vpack.i.bf16 %v8988_v45, %v8985_v36  ;;  %v2845_v20 = vsel %vm863_vm0, %v2842_v16, 0.0 }
 0x28a   : > { %v8998_v22 = vpack.i.bf16 %v2838_v55, %v2840_v12  ;;  %v2843_v6 = vsel %vm863_vm0, %v2841_v42, %v2842_v16  ;;  %v10361_v33 = vpack.i.bf16 %v8652_v56, %v8628_v62  ;;  %v10363_v53 = vpack.i.bf16 %v8675_v60, %v8656_v5 }
 0x28b   : > { %10358 = vst [vmem:[#allocation19_spill] sm:$0xff] %v8982_v61  ;;  %v9008_v40 = vpack.i.bf16 %v2845_v20, %v2843_v6  ;;  %v10364_v42 = vrot.slane %v8643_v54, 7  ;;  %v10366_v62 = vrot.slane %v8686_v15, 7  ;;  %v10368_v20 = vpack.i.bf16 %v8746_v63, %v8714_v58 }
 0x28c   : > { %10360 = vst [vmem:[#allocation18_spill] sm:$0xff] %v8998_v22  ;;  %v10373_v58 = vrot.slane %v8707_v34, 7  ;;  %vm3762_vm0 = vcmask 326656  }
 0x28d   : > { %6046 = vrot.lane.b32.xlu1 %v8624_v26, %s6450_s29  ;;  %6051 = vrot.lane.b32.xlu0 %v8666_v9, %s6460_s28  ;;  %10362 = vst [vmem:[#allocation25_spill] sm:$0xff] %v9008_v40  ;;  %v9019_v16 = vsel %vm767_vm1, 0.0, %v10364_v42  ;;  %v9036_v54 = vsel %vm767_vm1, 0.0, %v10366_v62  ;;  %v10370_v42 = vld [vmem:[#allocation58_spill] sm:$0xff]  ;;  %v10371_v62 = vpack.i.bf16 %v8742_v3, %v8754_v43  ;;  %v10372_v26 = vld [vmem:[#allocation35_spill] sm:$0xff] }
 0x28e   : > { %10365 = vst [vmem:[#allocation6_spill] sm:$0xff] %v9019_v16  ;;  %v6075_v55 = vpack.i.bf16 %v8693_v28, %v9019_v16  ;;  %10367 = vst [vmem:[#allocation63_spill] sm:$0xff] %v9036_v54 }
 0x291   : > { %6056 = vrot.lane.b32.xlu1 %v8641_v10, %s6450_s29  ;;  %6061 = vrot.lane.b32.xlu0 %v10361_v33, %s6453_s0 }
 0x295   : > { %6066 = vrot.lane.b32.xlu1 %v10363_v53, %s6453_s0  ;;  %6071 = vrot.lane.b32.xlu0 %v8904_v23, %s6455_s25  ;;  %v10369_v53 = vld [vmem:[#allocation14_spill] sm:$0xff] }
 0x296   : > { %v3635_v63 = vsel %vm1781_vm3, %v10372_v26, %v10369_v53 }
 0x299   : > { %6076 = vrot.lane.b32.xlu1 %v6075_v55, %s6455_s25  ;;  %6081 = vrot.lane.b32.xlu0 %v8641_v10, %s6457_s27  ;;  %v6105_v10 = vpack.i.bf16 %v8732_v11, %v9036_v54 }
 0x29d   : > { %6086 = vrot.lane.b32.xlu1 %v8705_v21, %s6457_s27  ;;  %6091 = vrot.lane.b32.xlu0 %v8666_v9, %s6461_s30 }
 0x2a1   : > { %6096 = vrot.lane.b32.xlu1 %v8720_v39, %s6461_s30  ;;  %6101 = vrot.lane.b32.xlu0 %v6075_v55, %s6459_s26 }
 0x2a3   : > { %v9038_v56 = vpop.permute.xlu0 %5821  ;;  %v9040_v5 = vpop.permute.xlu1 %5816 }
 0x2a5   : > { %6106 = vrot.lane.b32.xlu1 %v6105_v10, %s6459_s26  ;;  %6111 = vrot.lane.b32.xlu0 %v8705_v21, %s6458_s24 }
 0x2a7   : > { %v9047_v9 = vpop.permute.xlu1 %5826  ;;  %v5837_v60 = vpop.permute.xlu0 %5836 }
 0x2a9   : > { %6116 = vrot.lane.b32.xlu1 %v8723_v37, %s6458_s24  ;;  %6121 = vrot.lane.b32.xlu0 %v8720_v39, %s6460_s28 }
 0x2ab   : > { %v5852_v15 = vpop.permute.xlu0 %5851  ;;  %v5832_v23 = vpop.permute.xlu1 %5831 }
 0x2ac   : > { %v5833_v11 = vunpack.i.l.bf16 %v5832_v23  ;;  %v5853_v16 = vunpack.i.l.bf16 %v5852_v15 }
 0x2ad   : > { %6126 = vrot.lane.b32.xlu1 %v8705_v21, %s6450_s29  ;;  %6131 = vrot.lane.b32.xlu0 %v8766_v25, %s6460_s28  ;;  %v3634_v21 = vsel %vm1781_vm3, %v10370_v42, %v10369_v53  ;;  %v5834_v42 = vunpack.i.h.bf16 %v5832_v23  ;;  %v5839_v23 = vunpack.i.h.bf16 %v5837_v60 }
 0x2af   : > { %v9057_v12 = vpop.permute.xlu0 %5856  ;;  %v5842_v6 = vpop.permute.xlu1 %5841 }
 0x2b0   : > { %v5844_v45 = vunpack.i.h.bf16 %v5842_v6 }
 0x2b1   : > { %6136 = vrot.lane.b32.xlu1 %v8723_v37, %s6450_s29  ;;  %6141 = vrot.lane.b32.xlu0 %v10368_v20, %s6453_s0  ;;  %v9081_v20 = vsel %vm767_vm1, 0.0, %v10373_v58  ;;  %v5838_v58 = vunpack.i.l.bf16 %v5837_v60 }
 0x2b2   : > { %10374 = vst [vmem:[#allocation14_spill] sm:$0xff] %v9081_v20  ;;  %v6155_v3 = vpack.i.bf16 %v8794_v2, %v9081_v20  ;;  %v5854_v20 = vunpack.i.h.bf16 %v5852_v15 }
 0x2b3   : > { %v9065_v39 = vpop.permute.xlu1 %5846  ;;  %v5862_v33 = vpop.permute.xlu0 %5861 }
 0x2b4   : > { %v5863_v55 = vunpack.i.l.bf16 %v5862_v33  ;;  %v5864_v43 = vunpack.i.h.bf16 %v5862_v33 }
 0x2b5   : > { %6146 = vrot.lane.b32.xlu1 %v10371_v62, %s6453_s0  ;;  %6151 = vrot.lane.b32.xlu0 %v6105_v10, %s6455_s25 }
 0x2b6   : > { %v3666_v34 = vsel %vm1847_vm5, %v3634_v21, %v5863_v55  ;;  %v3667_v53 = vsel %vm1847_vm5, %v3635_v63, %v5863_v55  ;;  %v10375_v21 = vld [vmem:[#allocation59_spill] sm:$0xff] }
 0x2b7   : > { %v9083_v28 = vpop.permute.xlu1 %5866  ;;  %v5872_v54 = vpop.permute.xlu0 %5871  ;;  %v3637_v55 = vsel %vm1781_vm3, %v10375_v21, %v5834_v42 }
 0x2b8   : > { %v5868_v10 = vunpack.i.l.bf16 %v9083_v28  ;;  %v5874_v62 = vunpack.i.h.bf16 %v5872_v54  ;;  %v5873_v26 = vunpack.i.l.bf16 %v5872_v54  ;;  %v3636_v54 = vsel %vm1781_vm3, %v8506_v49, %v5833_v11 }
 0x2b9   : > { %6156 = vrot.lane.b32.xlu1 %v6155_v3, %s6455_s25  ;;  %6161 = vrot.lane.b32.xlu0 %v8723_v37, %s6457_s27  ;;  %v3668_v37 = vsel %vm1847_vm5, %v3636_v54, %v5864_v43  ;;  %v5824_v49 = vunpack.i.h.bf16 %v9038_v56  ;;  %v5823_v11 = vunpack.i.l.bf16 %v9038_v56  ;;  %v5859_v56 = vunpack.i.h.bf16 %v9057_v12 }
 0x2ba   : > { %v3699_v2 = vsel %vm1913_vm7, %v3667_v53, %v5874_v62  ;;  %v3698_v33 = vsel %vm1913_vm7, %v3666_v34, %v5873_v26  ;;  %v3669_v61 = vsel %vm1847_vm5, %v3637_v55, %v5868_v10  ;;  %v5843_v62 = vunpack.i.l.bf16 %v5842_v6 }
 0x2bb   : > { %v5882_v63 = vpop.permute.xlu1 %5881  ;;  %v5877_v40 = vpop.permute.xlu0 %5876  ;;  %v3730_v26 = vsel %vm1979_vm10, %v3698_v33, %v5838_v58  ;;  %v3731_v15 = vsel %vm1979_vm10, %v3699_v2, %v5839_v23  ;;  %v3701_v43 = vsel %vm1913_vm7, %v3669_v61, %v5844_v45  ;;  %v5818_v23 = vunpack.i.l.bf16 %v9040_v5 }
 0x2bc   : > { %v5879_v22 = vunpack.i.h.bf16 %v5877_v40  ;;  %v5878_v60 = vunpack.i.l.bf16 %v5877_v40  ;;  %v3700_v6 = vsel %vm1913_vm7, %v3668_v37, %v5843_v62  ;;  %v5858_v58 = vunpack.i.l.bf16 %v9057_v12 }
 0x2bd   : > { %6166 = vrot.lane.b32.xlu1 %v8787_v8, %s6457_s27  ;;  %6171 = vrot.lane.b32.xlu0 %v8766_v25, %s6461_s30  ;;  %v5819_v25 = vunpack.i.h.bf16 %v9040_v5  ;;  %v3732_v5 = vsel %vm1979_vm10, %v3700_v6, %v5818_v23  ;;  %v5848_v54 = vunpack.i.l.bf16 %v9065_v39 }
 0x2be   : > { %v3763_v42 = vsel %vm3762_vm0, %v3730_v26, %v5878_v60  ;;  %v3764_v40 = vsel %vm3762_vm0, %v3731_v15, %v5879_v22  ;;  %v10376_v22 = vrot.slane %v8789_v17, 7  ;;  %v5884_v26 = vunpack.i.h.bf16 %v5882_v63 }
 0x2bf   : > { %v3796_v2 = vsel %vm3795_vm6, %v3763_v42, %v5853_v16  ;;  %v3797_v10 = vsel %vm3795_vm6, %v3764_v40, %v5854_v20  ;;  %v9115_v34 = vpop.permute.xlu1 %5886  ;;  %v5897_v53 = vpop.permute.xlu0 %5896  ;;  %v3733_v20 = vsel %vm1979_vm10, %v3701_v43, %v5819_v25  ;;  %v5883_v15 = vunpack.i.l.bf16 %v5882_v63 }
 0x2c0   : > { %v3829_v45 = vsel %vm3828_vm8, %v3796_v2, %v5823_v11  ;;  %v3830_v61 = vsel %vm3828_vm8, %v3797_v10, %v5824_v49  ;;  %v9129_v16 = vsel %vm767_vm1, 0.0, %v10376_v22  ;;  %v3765_v49 = vsel %vm3762_vm0, %v3732_v5, %v5848_v54  ;;  %v10379_v54 = vld [vmem:[#allocation56_spill] sm:$0xff] }
 0x2c1   : > { %6176 = vrot.lane.b32.xlu1 %v8802_v1, %s6461_s30  ;;  %6181 = vrot.lane.b32.xlu0 %v6155_v3, %s6459_s26  ;;  %v3862_v12 = vsel %vm3861_vm9, %v3829_v45, %v5858_v58  ;;  %v3863_v33 = vsel %vm3861_vm9, %v3830_v61, %v5859_v56  ;;  %v5849_v3 = vunpack.i.h.bf16 %v9065_v39  ;;  %v6185_v17 = vpack.i.bf16 %v8825_v35, %v9129_v16 }
 0x2c2   : > { %v3894_v37 = vpack.c.bf16 %v3863_v33, %v3862_v12  ;;  %v5899_v39 = vunpack.i.h.bf16 %v5897_v53  ;;  %v5898_v42 = vunpack.i.l.bf16 %v5897_v53  ;;  %v5829_v45 = vunpack.i.h.bf16 %v9047_v9 }
 0x2c3   : > { %v5892_v21 = vpop.permute.xlu1 %5891  ;;  %v9137_v55 = vpop.permute.xlu0 %5901  ;;  %v3766_v11 = vsel %vm3762_vm0, %v3733_v20, %v5849_v3  ;;  %v5828_v61 = vunpack.i.l.bf16 %v9047_v9  ;;  %v5869_v20 = vunpack.i.h.bf16 %v9083_v28  ;;  %v10377_v12 = vrot.slane %v8818_v51, 7  ;;  %v10380_v51 = vld [vmem:[#allocation55_spill] sm:$0xff] }
 0x2c4   : > { %v5894_v60 = vunpack.i.h.bf16 %v5892_v21  ;;  %v5893_v62 = vunpack.i.l.bf16 %v5892_v21  ;;  %5088 = vmatprep.mubr.msk.bf16.mxu1 %vm4024_vm11, %v3894_v37  ;;  %v5889_v33 = vunpack.i.h.bf16 %v9115_v34  ;;  %v5904_v3 = vunpack.i.h.bf16 %v9137_v55 }
 0x2c5   : > { %6186 = vrot.lane.b32.xlu1 %v6185_v17, %s6459_s26  ;;  %6191 = vrot.lane.b32.xlu0 %v8787_v8, %s6458_s24  ;;  %v10378_v9 = vpack.i.bf16 %v8868_v44, %v8797_v14  ;;  %v3638_v21 = vsel %vm1781_vm3, %v10379_v54, %v5828_v61  ;;  %v3639_v37 = vsel %vm1781_vm3, %v10380_v51, %v5829_v45 }
 0x2c6   : > { %v3798_v40 = vsel %vm3795_vm6, %v3765_v49, %v5893_v62  ;;  %v3799_v6 = vsel %vm3795_vm6, %v3766_v11, %v5894_v60  ;;  %v5903_v60 = vunpack.i.l.bf16 %v9137_v55  ;;  %v3670_v11 = vsel %vm1847_vm5, %v3638_v21, %v5869_v20  ;;  %v10383_v55 = vld [vmem:[#allocation61_spill] sm:$0xff] }
 0x2c7   : > { %v3831_v43 = vsel %vm3828_vm8, %v3798_v40, %v5883_v15  ;;  %v3832_v63 = vsel %vm3828_vm8, %v3799_v6, %v5884_v26  ;;  %v9151_v2 = vpop.permute.xlu1 %5906  ;;  %v5912_v10 = vpop.permute.xlu0 %5911 }
 0x2c8   : > { %v3864_v25 = vsel %vm3861_vm9, %v3831_v43, %v5898_v42  ;;  %v3865_v23 = vsel %vm3861_vm9, %v3832_v63, %v5899_v39  ;;  %v5914_v15 = vunpack.i.h.bf16 %v5912_v10  ;;  %v5913_v49 = vunpack.i.l.bf16 %v5912_v10  ;;  %v10381_v39 = vld [vmem:[#allocation2_spill] sm:$0xff] }
 0x2c9   : > { %v3895_v56 = vpack.c.bf16 %v3865_v23, %v3864_v25  ;;  %6196 = vrot.lane.b32.xlu1 %v8855_v59, %s6458_s24  ;;  %6201 = vrot.lane.b32.xlu0 %v8802_v1, %s6460_s28  ;;  %v5888_v1 = vunpack.i.l.bf16 %v9115_v34  ;;  %v5908_v34 = vunpack.i.l.bf16 %v9151_v2  ;;  %v10382_v43 = vpack.i.bf16 %v8864_v32, %v8871_v52 }
 0x2ca   : > { %v3641_v63 = vsel %vm1781_vm3, %v10383_v55, %v5889_v33  ;;  %v3702_v52 = vsel %vm1913_vm7, %v3670_v11, %v5913_v49 }
 0x2cb   : > { %v5917_v53 = vpop.permute.xlu1 %5916  ;;  %v5922_v58 = vpop.permute.xlu0 %5921  ;;  %5089 = vmatmul.mubr.msk.bf16.vlgmr.msra.gmra.mrb[16].mxu1 %vm4024_vm11, %v3895_v56  ;;  %v3640_v42 = vsel %vm1781_vm3, %v10381_v39, %v5888_v1  ;;  %v3671_v56 = vsel %vm1847_vm5, %v3639_v37, %v5903_v60 }
 0x2cc   : > { %v5919_v14 = vunpack.i.h.bf16 %v5917_v53  ;;  %v5918_v44 = vunpack.i.l.bf16 %v5917_v53  ;;  %v5924_v40 = vunpack.i.h.bf16 %v5922_v58  ;;  %v5923_v6 = vunpack.i.l.bf16 %v5922_v58 }
 0x2cd   : > { %6206 = vrot.lane.b32.xlu1 %v8787_v8, %s6450_s29  ;;  %6211 = vrot.lane.b32.xlu0 %v8879_v50, %s6460_s28  ;;  %v9175_v8 = vsel %vm767_vm1, 0.0, %v10377_v12  ;;  %v3672_v25 = vsel %vm1847_vm5, %v3640_v42, %v5904_v3  ;;  %v3673_v53 = vsel %vm1847_vm5, %v3641_v63, %v5908_v34  ;;  %v3703_v32 = vsel %vm1913_vm7, %v3671_v56, %v5914_v15 }
 0x2ce   : > { %v9185_v28 = vpack.i.bf16 %v8890_v38, %v9175_v8  ;;  %v3704_v1 = vsel %vm1913_vm7, %v3672_v25, %v5918_v44  ;;  %v3705_v12 = vsel %vm1913_vm7, %v3673_v53, %v5919_v14 }
 0x2cf   : > { %v9166_v22 = vpop.permute.xlu1 %5926  ;;  %v5932_v5 = vpop.permute.xlu0 %5931 }
 0x2d0   : > { %v5934_v10 = vunpack.i.h.bf16 %v5932_v5  ;;  %v5933_v23 = vunpack.i.l.bf16 %v5932_v5  ;;  %v3734_v5 = vsel %vm1979_vm10, %v3702_v52, %v5923_v6  ;;  %v5928_v54 = vunpack.i.l.bf16 %v9166_v22 }
 0x2d1   : > { %6216 = vrot.lane.b32.xlu1 %v8855_v59, %s6450_s29  ;;  %6221 = vrot.lane.b32.xlu0 %v10378_v9, %s6453_s0  ;;  %v5929_v9 = vunpack.i.h.bf16 %v9166_v22 }
 0x2d2   : > { %v3767_v21 = vsel %vm3762_vm0, %v3734_v5, %v5933_v23 }
 0x2d3   : > { %v5937_v62 = vpop.permute.xlu1 %5936  ;;  %v5942_v26 = vpop.permute.xlu0 %5941 }
 0x2d4   : > { %v5944_v45 = vunpack.i.h.bf16 %v5942_v26  ;;  %v5943_v58 = vunpack.i.l.bf16 %v5942_v26  ;;  %v5939_v37 = vunpack.i.h.bf16 %v5937_v62  ;;  %v5938_v60 = vunpack.i.l.bf16 %v5937_v62 }
 0x2d5   : > { %6226 = vrot.lane.b32.xlu1 %v10382_v43, %s6453_s0  ;;  %6231 = vrot.lane.b32.xlu0 %v6185_v17, %s6455_s25  ;;  %v3735_v17 = vsel %vm1979_vm10, %v3703_v32, %v5924_v40  ;;  %v3737_v62 = vsel %vm1979_vm10, %v3705_v12, %v5929_v9 }
 0x2d6   : > { %v3768_v51 = vsel %vm3762_vm0, %v3735_v17, %v5934_v10  ;;  %v3800_v34 = vsel %vm3795_vm6, %v3767_v21, %v5943_v58  ;;  %v3770_v25 = vsel %vm3762_vm0, %v3737_v62, %v5939_v37 }
 0x2d7   : > { %v5947_v61 = vpop.permute.xlu1 %5946  ;;  %v5952_v20 = vpop.permute.xlu0 %5951  ;;  %v3801_v26 = vsel %vm3795_vm6, %v3768_v51, %v5944_v45 }
 0x2d8   : > { %v5954_v33 = vunpack.i.h.bf16 %v5952_v20  ;;  %v5953_v3 = vunpack.i.l.bf16 %v5952_v20  ;;  %v5949_v14 = vunpack.i.h.bf16 %v5947_v61  ;;  %v5948_v44 = vunpack.i.l.bf16 %v5947_v61 }
 0x2d9   : > { %6236 = vrot.lane.b32.xlu1 %v9185_v28, %s6455_s25  ;;  %6241 = vrot.lane.b32.xlu0 %v8855_v59, %s6457_s27  ;;  %v3736_v59 = vsel %vm1979_vm10, %v3704_v1, %v5928_v54  ;;  %v10384_v1 = vrot.slane %v8857_v46, 7 }
 0x2da   : > { %v3833_v22 = vsel %vm3828_vm8, %v3800_v34, %v5953_v3  ;;  %v3834_v42 = vsel %vm3828_vm8, %v3801_v26, %v5954_v33  ;;  %v3769_v63 = vsel %vm3762_vm0, %v3736_v59, %v5938_v60  ;;  %v3803_v45 = vsel %vm3795_vm6, %v3770_v25, %v5949_v14 }
 0x2db   : > { %v5957_v15 = vpop.permute.xlu1 %5956  ;;  %v5962_v49 = vpop.permute.xlu0 %5961  ;;  %v3802_v53 = vsel %vm3795_vm6, %v3769_v63, %v5948_v44  ;;  %v9248_v12 = vsel %vm767_vm1, 0.0, %v10384_v1  ;;  %v10385_v26 = vrot.slane %v8851_v18, 7  ;;  %v10387_v44 = vpack.i.bf16 %v8939_v47, %v8899_v7  ;;  %v10388_v18 = vld [vmem:[#allocation5_spill] sm:$0xff]  ;;  %v10389_v7 = vld [vmem:[#allocation38_spill] sm:$0xff] }
 0x2dc   : > { %v5964_v11 = vunpack.i.h.bf16 %v5962_v49  ;;  %v5963_v39 = vunpack.i.l.bf16 %v5962_v49  ;;  %v5959_v40 = vunpack.i.h.bf16 %v5957_v15  ;;  %v5958_v6 = vunpack.i.l.bf16 %v5957_v15  ;;  %v10386_v15 = vld [vmem:[#allocation36_spill] sm:$0xff] }
 0x2dd   : > { %6246 = vrot.lane.b32.xlu1 %v8874_v29, %s6457_s27  ;;  %6251 = vrot.lane.b32.xlu0 %v8879_v50, %s6461_s30  ;;  %v6265_v3 = vpack.i.bf16 %v8925_v24, %v9248_v12 }
 0x2de   : > { %v3866_v43 = vsel %vm3861_vm9, %v3833_v22, %v5963_v39  ;;  %v3867_v55 = vsel %vm3861_vm9, %v3834_v42, %v5964_v11  ;;  %v3835_v20 = vsel %vm3828_vm8, %v3802_v53, %v5958_v6  ;;  %v3836_v52 = vsel %vm3828_vm8, %v3803_v45, %v5959_v40 }
 0x2df   : > { %v5967_v10 = vpop.permute.xlu1 %5966  ;;  %v5972_v23 = vpop.permute.xlu0 %5971  ;;  %v3896_v56 = vpack.c.bf16 %v3867_v55, %v3866_v43  ;;  %v5909_v39 = vunpack.i.h.bf16 %v9151_v2  ;;  %v10390_v2 = vpack.i.bf16 %v8932_v57, %v8942_v31 }
 0x2e0   : > { %v5974_v58 = vunpack.i.h.bf16 %v5972_v23  ;;  %v5973_v61 = vunpack.i.l.bf16 %v5972_v23  ;;  %v5968_v21 = vunpack.i.l.bf16 %v5967_v10  ;;  %v5969_v34 = vunpack.i.h.bf16 %v5967_v10 }
 0x2e1   : > { %6256 = vrot.lane.b32.xlu1 %v8911_v19, %s6461_s30  ;;  %5092 = vmatprep.mubr.msk.bf16.mxu1 %vm4024_vm11, %v3896_v56  ;;  %v10391_v56 = vld [vmem:[#allocation26_spill] sm:$0xff] }
 0x2e2   : > { %v3869_v50 = vsel %vm3861_vm9, %v3836_v52, %v5974_v58  ;;  %v3868_v32 = vsel %vm3861_vm9, %v3835_v20, %v5973_v61  ;;  %6261 = vrot.lane.b32.xlu0 %v9185_v28, %s6459_s26  ;;  %v3643_v47 = vsel %vm1781_vm3, %v10389_v7, %v5969_v34 }
 0x2e3   : > { %v3897_v5 = vpack.c.bf16 %v3869_v50, %v3868_v32  ;;  %v5977_v17 = vpop.permute.xlu1 %5976  ;;  %v5982_v33 = vpop.permute.xlu0 %5981 }
 0x2e4   : > { %v5978_v51 = vunpack.i.l.bf16 %v5977_v17  ;;  %v5979_v49 = vunpack.i.h.bf16 %v5977_v17  ;;  %v5983_v14 = vunpack.i.l.bf16 %v5982_v33  ;;  %v5984_v42 = vunpack.i.h.bf16 %v5982_v33 }
 0x2e5   : > { %6266 = vrot.lane.b32.xlu1 %v6265_v3, %s6459_s26  ;;  %5093 = vmatmul.mubr.msk.bf16.gmra.mrb[20].mxu1 %vm4024_vm11, %v3897_v5 }
 0x2e6   : > { %6271 = vrot.lane.b32.xlu0 %v8874_v29, %s6458_s24  ;;  %v3644_v22 = vsel %vm1781_vm3, %v10388_v18, %v5978_v51  ;;  %v3645_v53 = vsel %vm1781_vm3, %v10391_v56, %v5979_v49  ;;  %v3675_v45 = vsel %vm1847_vm5, %v3643_v47, %v5983_v14 }
 0x2e7   : > { %v9256_v9 = vpop.permute.xlu1 %5986  ;;  %v5992_v28 = vpop.permute.xlu0 %5991  ;;  %v3676_v20 = vsel %vm1847_vm5, %v3644_v22, %v5984_v42 }
 0x2e8   : > { %v5988_v40 = vunpack.i.l.bf16 %v9256_v9  ;;  %v5994_v62 = vunpack.i.h.bf16 %v5992_v28  ;;  %v5993_v43 = vunpack.i.l.bf16 %v5992_v28 }
 0x2e9   : > { %6276 = vrot.lane.b32.xlu1 %v8918_v48, %s6458_s24 }
 0x2ea   : > { %6281 = vrot.lane.b32.xlu0 %v8911_v19, %s6460_s28  ;;  %v9273_v19 = vsel %vm767_vm1, 0.0, %v10385_v26  ;;  %v3677_v52 = vsel %vm1847_vm5, %v3645_v53, %v5988_v40  ;;  %v3707_v31 = vsel %vm1913_vm7, %v3675_v45, %v5994_v62 }
 0x2eb   : > { %v5997_v46 = vpop.permute.xlu1 %5996  ;;  %v6002_v54 = vpop.permute.xlu0 %6001  ;;  %v9283_v11 = vpack.i.bf16 %v8959_v13, %v9273_v19 }
 0x2ec   : > { %v5999_v55 = vunpack.i.h.bf16 %v5997_v46  ;;  %v5998_v63 = vunpack.i.l.bf16 %v5997_v46  ;;  %v6004_v10 = vunpack.i.h.bf16 %v6002_v54  ;;  %v6003_v23 = vunpack.i.l.bf16 %v6002_v54 }
 0x2ed   : > { %6286 = vrot.lane.b32.xlu1 %v8874_v29, %s6450_s29  ;;  %v3642_v29 = vsel %vm1781_vm3, %v10386_v15, %v5968_v21 }
 0x2ee   : > { %6291 = vrot.lane.b32.xlu0 %v8950_v0, %s6460_s28  ;;  %v3674_v25 = vsel %vm1847_vm5, %v3642_v29, %v5909_v39  ;;  %v3708_v17 = vsel %vm1913_vm7, %v3676_v20, %v5998_v63  ;;  %v3709_v33 = vsel %vm1913_vm7, %v3677_v52, %v5999_v55  ;;  %v10393_v52 = vrot.slane %v8920_v41, 7  ;;  %v10395_v41 = vld [vmem:[#allocation17_spill] sm:$0xff] }
 0x2ef   : > { %v9266_v37 = vpop.permute.xlu1 %6006  ;;  %v6012_v60 = vpop.permute.xlu0 %6011  ;;  %v3706_v57 = vsel %vm1913_vm7, %v3674_v25, %v5993_v43 }
 0x2f0   : > { %v6014_v58 = vunpack.i.h.bf16 %v6012_v60  ;;  %v6013_v61 = vunpack.i.l.bf16 %v6012_v60  ;;  %v3738_v28 = vsel %vm1979_vm10, %v3706_v57, %v6003_v23  ;;  %v6009_v21 = vunpack.i.h.bf16 %v9266_v37  ;;  %v10394_v57 = vld [vmem:[#allocation22_spill] sm:$0xff] }
 0x2f1   : > { %6296 = vrot.lane.b32.xlu1 %v8918_v48, %s6450_s29  ;;  %v6008_v51 = vunpack.i.l.bf16 %v9266_v37 }
 0x2f2   : > { %6301 = vrot.lane.b32.xlu0 %v10387_v44, %s6453_s0  ;;  %v3771_v60 = vsel %vm3762_vm0, %v3738_v28, %v6013_v61  ;;  %v10392_v61 = vld [vmem:[#allocation21_spill] sm:$0xff] }
 0x2f3   : > { %v6017_v6 = vpop.permute.xlu1 %6016  ;;  %v6022_v59 = vpop.permute.xlu0 %6021 }
 0x2f4   : > { %v6024_v50 = vunpack.i.h.bf16 %v6022_v59  ;;  %v6023_v32 = vunpack.i.l.bf16 %v6022_v59  ;;  %v6019_v26 = vunpack.i.h.bf16 %v6017_v6  ;;  %v6018_v15 = vunpack.i.l.bf16 %v6017_v6 }
 0x2f5   : > { %6306 = vrot.lane.b32.xlu1 %v10390_v2, %s6453_s0  ;;  %v3741_v6 = vsel %vm1979_vm10, %v3709_v33, %v6009_v21 }
 0x2f6   : > { %6311 = vrot.lane.b32.xlu0 %v6265_v3, %s6455_s25  ;;  %v3739_v3 = vsel %vm1979_vm10, %v3707_v31, %v6004_v10  ;;  %v3804_v29 = vsel %vm3795_vm6, %v3771_v60, %v6023_v32  ;;  %v3774_v7 = vsel %vm3762_vm0, %v3741_v6, %v6019_v26  ;;  %v10396_v60 = vld [vmem:[#allocation3_spill] sm:$0xff] }
 0x2f7   : > { %v6027_v1 = vpop.permute.xlu1 %6026  ;;  %v6032_v5 = vpop.permute.xlu0 %6031  ;;  %v3772_v34 = vsel %vm3762_vm0, %v3739_v3, %v6014_v58 }
 0x2f8   : > { %v6034_v46 = vunpack.i.h.bf16 %v6032_v5  ;;  %v6033_v54 = vunpack.i.l.bf16 %v6032_v5  ;;  %v3805_v49 = vsel %vm3795_vm6, %v3772_v34, %v6024_v50  ;;  %v6029_v39 = vunpack.i.h.bf16 %v6027_v1 }
 0x2f9   : > { %6316 = vrot.lane.b32.xlu1 %v9283_v11, %s6455_s25  ;;  %v6028_v18 = vunpack.i.l.bf16 %v6027_v1  ;;  %v9344_v50 = vsel %vm767_vm1, 0.0, %v10393_v52 }
 0x2fa   : > { %6321 = vrot.lane.b32.xlu0 %v8918_v48, %s6457_s27  ;;  %v3837_v37 = vsel %vm3828_vm8, %v3804_v29, %v6033_v54  ;;  %v3838_v40 = vsel %vm3828_vm8, %v3805_v49, %v6034_v46  ;;  %v3740_v48 = vsel %vm1979_vm10, %v3708_v17, %v6008_v51  ;;  %v3807_v2 = vsel %vm3795_vm6, %v3774_v7, %v6029_v39  ;;  %v10398_v49 = vld [vmem:[#allocation23_spill] sm:$0xff] }
 0x2fb   : > { %v6037_v14 = vpop.permute.xlu1 %6036  ;;  %v6042_v44 = vpop.permute.xlu0 %6041  ;;  %v3773_v63 = vsel %vm3762_vm0, %v3740_v48, %v6018_v15  ;;  %v6345_v31 = vpack.i.bf16 %v10394_v57, %v9344_v50  ;;  %v5989_v29 = vunpack.i.h.bf16 %v9256_v9  ;;  %v10400_v9 = vld [vmem:[#allocation16_spill] sm:$0xff] }
 0x2fc   : > { %v6044_v22 = vunpack.i.h.bf16 %v6042_v44  ;;  %v6043_v42 = vunpack.i.l.bf16 %v6042_v44  ;;  %v6039_v59 = vunpack.i.h.bf16 %v6037_v14  ;;  %v6038_v62 = vunpack.i.l.bf16 %v6037_v14 }
 0x2fd   : > { %6326 = vrot.lane.b32.xlu1 %v8936_v30, %s6457_s27  ;;  %v3806_v23 = vsel %vm3795_vm6, %v3773_v63, %v6028_v18 }
 0x2fe   : > { %v3870_v43 = vsel %vm3861_vm9, %v3837_v37, %v6043_v42  ;;  %v3871_v55 = vsel %vm3861_vm9, %v3838_v40, %v6044_v22  ;;  %6331 = vrot.lane.b32.xlu0 %v8950_v0, %s6461_s30  ;;  %v3839_v45 = vsel %vm3828_vm8, %v3806_v23, %v6038_v62  ;;  %v3840_v58 = vsel %vm3828_vm8, %v3807_v2, %v6039_v59  ;;  %v10399_v62 = vld [vmem:[#allocation57_spill] sm:$0xff] }
 0x2ff   : > { %v3898_v47 = vpack.c.bf16 %v3871_v55, %v3870_v43  ;;  %v6047_v25 = vpop.permute.xlu1 %6046  ;;  %v6052_v10 = vpop.permute.xlu0 %6051  ;;  %v10401_v43 = vld [vmem:[#allocation60_spill] sm:$0xff] }
 0x300   : > { %v6054_v56 = vunpack.i.h.bf16 %v6052_v10  ;;  %v6053_v53 = vunpack.i.l.bf16 %v6052_v10  ;;  %v6048_v3 = vunpack.i.l.bf16 %v6047_v25  ;;  %v6049_v51 = vunpack.i.h.bf16 %v6047_v25 }
 0x301   : > { %6336 = vrot.lane.b32.xlu1 %v10392_v61, %s6461_s30  ;;  %5096 = vmatprep.mubr.msk.bf16.mxu1 %vm4024_vm11, %v3898_v47 }
 0x302   : > { %v3873_v0 = vsel %vm3861_vm9, %v3840_v58, %v6054_v56  ;;  %v3872_v20 = vsel %vm3861_vm9, %v3839_v45, %v6053_v53  ;;  %6341 = vrot.lane.b32.xlu0 %v9283_v11, %s6459_s26  ;;  %v3646_v34 = vsel %vm1781_vm3, %v10396_v60, %v6048_v3  ;;  %v3647_v48 = vsel %vm1781_vm3, %v10399_v62, %v6049_v51 }
 0x303   : > { %v3899_v32 = vpack.c.bf16 %v3873_v0, %v3872_v20  ;;  %v6057_v1 = vpop.permute.xlu1 %6056  ;;  %v6062_v5 = vpop.permute.xlu0 %6061 }
 0x304   : > { %v6058_v46 = vunpack.i.l.bf16 %v6057_v1  ;;  %v6059_v26 = vunpack.i.h.bf16 %v6057_v1  ;;  %v6063_v15 = vunpack.i.l.bf16 %v6062_v5  ;;  %v6064_v44 = vunpack.i.h.bf16 %v6062_v5  ;;  %v10402_v5 = vld [vmem:[#allocation18_spill] sm:$0xff] }
 0x305   : > { %6346 = vrot.lane.b32.xlu1 %v6345_v31, %s6459_s26  ;;  %5097 = vmatmul.mubr.msk.bf16.gmra.mrb[24].mxu1 %vm4024_vm11, %v3899_v32 }
 0x306   : > { %6351 = vrot.lane.b32.xlu0 %v8936_v30, %s6458_s24  ;;  %v3648_v14 = vsel %vm1781_vm3, %v10398_v49, %v6058_v46  ;;  %v3649_v55 = vsel %vm1781_vm3, %v10401_v43, %v6059_v26  ;;  %v3679_v63 = vsel %vm1847_vm5, %v3647_v48, %v6063_v15 }
 0x307   : > { %v9352_v17 = vpop.permute.xlu1 %6066  ;;  %v6072_v11 = vpop.permute.xlu0 %6071  ;;  %v3680_v25 = vsel %vm1847_vm5, %v3648_v14, %v6064_v44 }
 0x308   : > { %v6068_v39 = vunpack.i.l.bf16 %v9352_v17  ;;  %v6074_v42 = vunpack.i.h.bf16 %v6072_v11  ;;  %v6073_v37 = vunpack.i.l.bf16 %v6072_v11 }
 0x309   : > { %6356 = vrot.lane.b32.xlu1 %v10395_v41, %s6458_s24 }
 0x30a   : > { %6361 = vrot.lane.b32.xlu0 %v10392_v61, %s6460_s28  ;;  %v3681_v10 = vsel %vm1847_vm5, %v3649_v55, %v6068_v39  ;;  %v3711_v58 = vsel %vm1913_vm7, %v3679_v63, %v6074_v42 }
 0x30b   : > { %v6077_v33 = vpop.permute.xlu1 %6076  ;;  %v6082_v28 = vpop.permute.xlu0 %6081 }
 0x30c   : > { %v6079_v40 = vunpack.i.h.bf16 %v6077_v33  ;;  %v6078_v59 = vunpack.i.l.bf16 %v6077_v33  ;;  %v6083_v6 = vunpack.i.l.bf16 %v6082_v28 }
 0x30d   : > { %6366 = vrot.lane.b32.xlu1 %v8936_v30, %s6450_s29  ;;  %v10397_v30 = vpack.i.bf16 %v8985_v36, %v8945_v27  ;;  %v3678_v27 = vsel %vm1847_vm5, %v3646_v34, %v5989_v29  ;;  %v6084_v36 = vunpack.i.h.bf16 %v6082_v28 }
 0x30e   : > { %6371 = vrot.lane.b32.xlu0 %v8994_v4, %s6460_s28  ;;  %v3710_v45 = vsel %vm1913_vm7, %v3678_v27, %v6073_v37  ;;  %v3712_v61 = vsel %vm1913_vm7, %v3680_v25, %v6078_v59  ;;  %v3713_v0 = vsel %vm1913_vm7, %v3681_v10, %v6079_v40 }
 0x30f   : > { %v9362_v54 = vpop.permute.xlu1 %6086  ;;  %v6092_v21 = vpop.permute.xlu0 %6091  ;;  %v3742_v20 = vsel %vm1979_vm10, %v3710_v45, %v6083_v6  ;;  %v3743_v52 = vsel %vm1979_vm10, %v3711_v58, %v6084_v36 }
 0x310   : > { %v6094_v7 = vunpack.i.h.bf16 %v6092_v21  ;;  %v6093_v47 = vunpack.i.l.bf16 %v6092_v21  ;;  %v6088_v11 = vunpack.i.l.bf16 %v9362_v54 }
 0x311   : > { %6376 = vrot.lane.b32.xlu1 %v10395_v41, %s6450_s29  ;;  %s4917_s29 = sshll.u32 %s10447_s22, 3 }
 0x312   : > { %6381 = vrot.lane.b32.xlu0 %v10397_v30, %s6453_s0  ;;  %v3775_v33 = vsel %vm3762_vm0, %v3742_v20, %v6093_v47  ;;  %v3776_v28 = vsel %vm3762_vm0, %v3743_v52, %v6094_v7  ;;  %v3744_v39 = vsel %vm1979_vm10, %v3712_v61, %v6088_v11 }
 0x313   : > { %v6097_v18 = vpop.permute.xlu1 %6096  ;;  %v6102_v22 = vpop.permute.xlu0 %6101 }
 0x314   : > { %v6104_v23 = vunpack.i.h.bf16 %v6102_v22  ;;  %v6103_v2 = vunpack.i.l.bf16 %v6102_v22  ;;  %v6099_v3 = vunpack.i.h.bf16 %v6097_v18  ;;  %v6098_v46 = vunpack.i.l.bf16 %v6097_v18 }
 0x315   : > { %3011 = vrot.lane.b32.xlu1 %v10400_v9, %s6453_s0 }
 0x316   : > { %6386 = vrot.lane.b32.xlu0 %v6345_v31, %s6455_s25  ;;  %v6089_v31 = vunpack.i.h.bf16 %v9362_v54  ;;  %v3808_v21 = vsel %vm3795_vm6, %v3775_v33, %v6103_v2  ;;  %v3809_v51 = vsel %vm3795_vm6, %v3776_v28, %v6104_v23  ;;  %v3777_v37 = vsel %vm3762_vm0, %v3744_v39, %v6098_v46  ;;  %v10405_v23 = vld [vmem:[#allocation13_spill] sm:$0xff] }
 0x317   : > { %v6107_v56 = vpop.permute.xlu1 %6106  ;;  %v6112_v53 = vpop.permute.xlu0 %6111 }
 0x318   : > { %v6114_v32 = vunpack.i.h.bf16 %v6112_v53  ;;  %v6113_v1 = vunpack.i.l.bf16 %v6112_v53  ;;  %v6109_v26 = vunpack.i.h.bf16 %v6107_v56  ;;  %v6108_v15 = vunpack.i.l.bf16 %v6107_v56 }
 0x319   : > { %6391 = vrot.lane.b32.xlu1 %v10402_v5, %s6455_s25  ;;  %v3745_v18 = vsel %vm1979_vm10, %v3713_v0, %v6089_v31  ;;  %v10406_v53 = vmov 0.0   ;;  %v10407_v0 = vld [vmem:[#allocation62_spill] sm:$0xff]  ;;  %s9808_s25 = scalar_lea.vmem %s9919_s2, %s6558_s23 }
 0x31a   : > { %6396 = vrot.lane.b32.xlu0 %v10395_v41, %s6457_s27  ;;  %v3841_v54 = vsel %vm3828_vm8, %v3808_v21, %v6113_v1  ;;  %v3842_v49 = vsel %vm3828_vm8, %v3809_v51, %v6114_v32  ;;  %v10403_v41 = vld [vmem:[#allocation19_spill] sm:$0xff]  ;;  %v3778_v40 = vsel %vm3762_vm0, %v3745_v18, %v6099_v3  ;;  %v3810_v27 = vsel %vm3795_vm6, %v3777_v37, %v6108_v15  ;;  %v10408_v31 = vld [vmem:[#allocation6_spill] sm:$0xff] }
 0x31b   : > { %v6117_v60 = vpop.permute.xlu1 %6116  ;;  %v6122_v34 = vpop.permute.xlu0 %6121  ;;  %v3811_v36 = vsel %vm3795_vm6, %v3778_v40, %v6109_v26  ;;  %v6069_v21 = vunpack.i.h.bf16 %v9352_v17  ;;  %v10409_v51 = vld [vmem:[#allocation63_spill] sm:$0xff] }
 0x31c   : > { %v6124_v30 = vunpack.i.h.bf16 %v6122_v34  ;;  %v6123_v29 = vunpack.i.l.bf16 %v6122_v34  ;;  %v6119_v14 = vunpack.i.h.bf16 %v6117_v60  ;;  %v6118_v44 = vunpack.i.l.bf16 %v6117_v60  ;;  %v10411_v18 = vld [vmem:[#allocation15_spill] sm:$0xff] }
 0x31d   : > { %6401 = vrot.lane.b32.xlu1 %v10403_v41, %s6457_s27  ;;  %s649_s27 = scalar_lea.vmem %s9924_s7, %s4917_s29 }
 0x31e   : > { %v3874_v22 = vsel %vm3861_vm9, %v3841_v54, %v6123_v29  ;;  %v3875_v42 = vsel %vm3861_vm9, %v3842_v49, %v6124_v30  ;;  %6406 = vrot.lane.b32.xlu0 %v8994_v4, %s6461_s30  ;;  %v3843_v43 = vsel %vm3828_vm8, %v3810_v27, %v6118_v44  ;;  %v3844_v55 = vsel %vm3828_vm8, %v3811_v36, %v6119_v14  ;;  %v10404_v4 = vld [vmem:[#allocation25_spill] sm:$0xff]  ;;  %v4405_v61 = vld [vmem:[%s649_s27] sm:$0xff] }
 0x31f   : > { %v3900_v59 = vpack.c.bf16 %v3875_v42, %v3874_v22  ;;  %v6127_v62 = vpop.permute.xlu1 %6126  ;;  %v6132_v48 = vpop.permute.xlu0 %6131  ;;  %v10410_v49 = vld [vmem:[#allocation37_spill] sm:$0xff] }
 0x320   : > { %v6134_v6 = vunpack.i.h.bf16 %v6132_v48  ;;  %v6133_v9 = vunpack.i.l.bf16 %v6132_v48  ;;  %v6128_v20 = vunpack.i.l.bf16 %v6127_v62 }
 0x321   : > { %6411 = vrot.lane.b32.xlu1 %v10404_v4, %s6461_s30  ;;  %5100 = vmatprep.mubr.msk.bf16.mxu1 %vm4024_vm11, %v3900_v59 }
 0x322   : > { %v3877_v63 = vsel %vm3861_vm9, %v3844_v55, %v6134_v6  ;;  %v3876_v7 = vsel %vm3861_vm9, %v3843_v43, %v6133_v9  ;;  %6416 = vrot.lane.b32.xlu0 %v10402_v5, %s6459_s26  ;;  %v6129_v5 = vunpack.i.h.bf16 %v6127_v62  ;;  %v3650_v11 = vsel %vm1781_vm3, %v10408_v31, %v6128_v20 }
 0x323   : > { %v3901_v47 = vpack.c.bf16 %v3877_v63, %v3876_v7  ;;  %v6137_v25 = vpop.permute.xlu1 %6136  ;;  %v6142_v10 = vpop.permute.xlu0 %6141  ;;  %v3682_v44 = vsel %vm1847_vm5, %v3650_v11, %v6069_v21 }
 0x324   : > { %v6138_v1 = vunpack.i.l.bf16 %v6137_v25  ;;  %v6139_v33 = vunpack.i.h.bf16 %v6137_v25  ;;  %v6143_v28 = vunpack.i.l.bf16 %v6142_v10  ;;  %v6144_v34 = vunpack.i.h.bf16 %v6142_v10 }
 0x325   : > { %6421 = vrot.lane.b32.xlu1 %v10405_v23, %s6459_s26  ;;  %5101 = vmatmul.mubr.msk.bf16.gmra.mrb[28].mxu1 %vm4024_vm11, %v3901_v47  ;;  %v3651_v14 = vsel %vm1781_vm3, %v10410_v49, %v6129_v5  ;;  %s9632_s26 = scalar_lea.vmem %s9932_s15, %s6558_s23 }
 0x326   : > { %6426 = vrot.lane.b32.xlu0 %v10403_v41, %s6458_s24  ;;  %v3652_v60 = vsel %vm1781_vm3, %v10409_v51, %v6138_v1  ;;  %v3653_v17 = vsel %vm1781_vm3, %v10411_v18, %v6139_v33  ;;  %v3683_v22 = vsel %vm1847_vm5, %v3651_v14, %v6143_v28 }
 0x327   : > { %v9432_v2 = vpop.permute.xlu1 %6146  ;;  %v6152_v56 = vpop.permute.xlu0 %6151  ;;  %v3684_v59 = vsel %vm1847_vm5, %v3652_v60, %v6144_v34 }
 0x328   : > { %v6148_v26 = vunpack.i.l.bf16 %v9432_v2  ;;  %v6154_v15 = vunpack.i.h.bf16 %v6152_v56  ;;  %v6153_v30 = vunpack.i.l.bf16 %v6152_v56 }
 0x329   : > { %3505 = vrot.lane.b32.xlu1 %v10406_v53, %s6458_s24 }
 0x32a   : > { %6431 = vrot.lane.b32.xlu0 %v10404_v4, %s6460_s28  ;;  %v3685_v62 = vsel %vm1847_vm5, %v3653_v17, %v6148_v26  ;;  %v3714_v6 = vsel %vm1913_vm7, %v3682_v44, %v6153_v30  ;;  %v3715_v9 = vsel %vm1913_vm7, %v3683_v22, %v6154_v15 }
 0x32b   : > { %v6157_v45 = vpop.permute.xlu1 %6156  ;;  %v6162_v58 = vpop.permute.xlu0 %6161 }
 0x32c   : > { %v6159_v29 = vunpack.i.h.bf16 %v6157_v45  ;;  %v6158_v54 = vunpack.i.l.bf16 %v6157_v45  ;;  %v6164_v41 = vunpack.i.h.bf16 %v6162_v58  ;;  %v6163_v39 = vunpack.i.l.bf16 %v6162_v58 }
 0x32d   : > { %6436 = vrot.lane.b32.xlu1 %v10407_v0, %s6460_s28 }
 0x32e   : > { %4408 = vperm.xlu0 %5588, %v4405_v61   ;;  %v3716_v43 = vsel %vm1913_vm7, %v3684_v59, %v6158_v54  ;;  %v3717_v55 = vsel %vm1913_vm7, %v3685_v62, %v6159_v29  ;;  %v3746_v4 = vsel %vm1979_vm10, %v3714_v6, %v6163_v39  ;;  %v3747_v63 = vsel %vm1979_vm10, %v3715_v9, %v6164_v41 }
 0x32f   : > { %v6167_v52 = vpop.permute.xlu1 %6166  ;;  %v6172_v32 = vpop.permute.xlu0 %6171 }
 0x330   : > { %v6174_v42 = vunpack.i.h.bf16 %v6172_v32  ;;  %v6173_v37 = vunpack.i.l.bf16 %v6172_v32  ;;  %v6169_v25 = vunpack.i.h.bf16 %v6167_v52  ;;  %v6168_v10 = vunpack.i.l.bf16 %v6167_v52 }
 0x332   : > { %v3779_v23 = vsel %vm3762_vm0, %v3746_v4, %v6173_v37  ;;  %v3780_v56 = vsel %vm3762_vm0, %v3747_v63, %v6174_v42  ;;  %v3749_v21 = vsel %vm1979_vm10, %v3717_v55, %v6169_v25 }
 0x333   : > { %v6177_v3 = vpop.permute.xlu1 %6176  ;;  %v6182_v46 = vpop.permute.xlu0 %6181 }
 0x334   : > { %v6184_v48 = vunpack.i.h.bf16 %v6182_v46  ;;  %v6183_v27 = vunpack.i.l.bf16 %v6182_v46  ;;  %v6179_v45 = vunpack.i.h.bf16 %v6177_v3  ;;  %v6178_v58 = vunpack.i.l.bf16 %v6177_v3 }
 0x335   : > { %v3748_v46 = vsel %vm1979_vm10, %v3716_v43, %v6168_v10  ;;  %v10412_v43 = vld [vmem:[#allocation14_spill] sm:$0xff] }
 0x336   : > { %v3812_v61 = vsel %vm3795_vm6, %v3779_v23, %v6183_v27  ;;  %v3813_v0 = vsel %vm3795_vm6, %v3780_v56, %v6184_v48  ;;  %v3781_v34 = vsel %vm3762_vm0, %v3748_v46, %v6178_v58  ;;  %v3782_v26 = vsel %vm3762_vm0, %v3749_v21, %v6179_v45 }
 0x337   : > { %v6187_v40 = vpop.permute.xlu1 %6186  ;;  %v6192_v36 = vpop.permute.xlu0 %6191 }
 0x338   : > { %v6194_v7 = vunpack.i.h.bf16 %v6192_v36  ;;  %v6193_v47 = vunpack.i.l.bf16 %v6192_v36  ;;  %v6189_v32 = vunpack.i.h.bf16 %v6187_v40  ;;  %v6188_v1 = vunpack.i.l.bf16 %v6187_v40 }
 0x33a   : > { %v3845_v11 = vsel %vm3828_vm8, %v3812_v61, %v6193_v47  ;;  %v3846_v52 = vsel %vm3828_vm8, %v3813_v0, %v6194_v7  ;;  %v3814_v29 = vsel %vm3795_vm6, %v3781_v34, %v6188_v1  ;;  %v3815_v54 = vsel %vm3795_vm6, %v3782_v26, %v6189_v32  ;;  %v10413_v0 = vld [vmem:[#allocation27_spill] sm:$0xff] }
 0x33b   : > { %v6197_v53 = vpop.permute.xlu1 %6196  ;;  %v6202_v20 = vpop.permute.xlu0 %6201  ;;  %v6149_v47 = vunpack.i.h.bf16 %v9432_v2 }
 0x33c   : > { %v6204_v5 = vunpack.i.h.bf16 %v6202_v20  ;;  %v6203_v31 = vunpack.i.l.bf16 %v6202_v20  ;;  %v6199_v33 = vunpack.i.h.bf16 %v6197_v53  ;;  %v6198_v28 = vunpack.i.l.bf16 %v6197_v53 }
 0x33e   : > { %v3878_v3 = vsel %vm3861_vm9, %v3845_v11, %v6203_v31  ;;  %v3879_v51 = vsel %vm3861_vm9, %v3846_v52, %v6204_v5  ;;  %v3847_v44 = vsel %vm3828_vm8, %v3814_v29, %v6198_v28  ;;  %v3848_v41 = vsel %vm3828_vm8, %v3815_v54, %v6199_v33 }
 0x33f   : > { %v6207_v60 = vpop.permute.xlu1 %6206  ;;  %v3902_v15 = vpack.c.bf16 %v3879_v51, %v3878_v3  ;;  %v6212_v30 = vpop.permute.xlu0 %6211 }
 0x340   : > { %v6214_v49 = vunpack.i.h.bf16 %v6212_v30  ;;  %v6213_v14 = vunpack.i.l.bf16 %v6212_v30  ;;  %v6208_v48 = vunpack.i.l.bf16 %v6207_v60  ;;  %v6209_v9 = vunpack.i.h.bf16 %v6207_v60 }
 0x341   : > { %5104 = vmatprep.mubr.msk.bf16.mxu1 %vm4024_vm11, %v3902_v15 }
 0x342   : > { %v3881_v39 = vsel %vm3861_vm9, %v3848_v41, %v6214_v49  ;;  %v3880_v18 = vsel %vm3861_vm9, %v3847_v44, %v6213_v14  ;;  %v3654_v55 = vsel %vm1781_vm3, %v10412_v43, %v6208_v48  ;;  %v3655_v20 = vsel %vm1781_vm3, %v10413_v0, %v6209_v9 }
 0x343   : > { %v6217_v17 = vpop.permute.xlu1 %6216  ;;  %v3903_v22 = vpack.c.bf16 %v3881_v39, %v3880_v18  ;;  %v6222_v42 = vpop.permute.xlu0 %6221  ;;  %v3686_v32 = vsel %vm1847_vm5, %v3654_v55, %v6149_v47 }
 0x344   : > { %v6218_v36 = vunpack.i.l.bf16 %v6217_v17  ;;  %v6219_v4 = vunpack.i.h.bf16 %v6217_v17  ;;  %v6224_v63 = vunpack.i.h.bf16 %v6222_v42  ;;  %v6223_v10 = vunpack.i.l.bf16 %v6222_v42 }
 0x345   : > { %5105 = vmatmul.mubr.msk.bf16.gmra.mrb[32].mxu1 %vm4024_vm11, %v3903_v22 }
 0x346   : > { %v3656_v25 = vsel %vm1781_vm3, %v9129_v16, %v6218_v36  ;;  %v3657_v2 = vsel %vm1781_vm3, %v8825_v35, %v6219_v4  ;;  %v3687_v33 = vsel %vm1847_vm5, %v3655_v20, %v6223_v10 }
 0x347   : > { %v9483_v37 = vpop.permute.xlu1 %6226  ;;  %v6232_v40 = vpop.permute.xlu0 %6231  ;;  %v3688_v16 = vsel %vm1847_vm5, %v3656_v25, %v6224_v63 }
 0x348   : > { %v6228_v23 = vunpack.i.l.bf16 %v9483_v37  ;;  %v6234_v53 = vunpack.i.h.bf16 %v6232_v40  ;;  %v6233_v45 = vunpack.i.l.bf16 %v6232_v40 }
 0x34a   : > { %v3689_v28 = vsel %vm1847_vm5, %v3657_v2, %v6228_v23  ;;  %v3718_v51 = vsel %vm1913_vm7, %v3686_v32, %v6233_v45  ;;  %v3719_v60 = vsel %vm1913_vm7, %v3687_v33, %v6234_v53 }
 0x34b   : > { %v6237_v59 = vpop.permute.xlu1 %6236  ;;  %v6242_v62 = vpop.permute.xlu0 %6241 }
 0x34c   : > { %v6239_v58 = vunpack.i.h.bf16 %v6237_v59  ;;  %v6238_v61 = vunpack.i.l.bf16 %v6237_v59  ;;  %v6244_v1 = vunpack.i.h.bf16 %v6242_v62  ;;  %v6243_v5 = vunpack.i.l.bf16 %v6242_v62 }
 0x34e   : > { %v3720_v34 = vsel %vm1913_vm7, %v3688_v16, %v6238_v61  ;;  %v3721_v35 = vsel %vm1913_vm7, %v3689_v28, %v6239_v58  ;;  %v3750_v26 = vsel %vm1979_vm10, %v3718_v51, %v6243_v5  ;;  %v3751_v15 = vsel %vm1979_vm10, %v3719_v60, %v6244_v1 }
 0x34f   : > { %v6247_v27 = vpop.permute.xlu1 %6246  ;;  %v6252_v6 = vpop.permute.xlu0 %6251 }
 0x350   : > { %v6254_v31 = vunpack.i.h.bf16 %v6252_v6  ;;  %v6253_v11 = vunpack.i.l.bf16 %v6252_v6  ;;  %v6249_v54 = vunpack.i.h.bf16 %v6247_v27  ;;  %v6248_v49 = vunpack.i.l.bf16 %v6247_v27 }
 0x352   : > { %v3783_v14 = vsel %vm3762_vm0, %v3750_v26, %v6253_v11  ;;  %v3784_v44 = vsel %vm3762_vm0, %v3751_v15, %v6254_v31  ;;  %v3752_v43 = vsel %vm1979_vm10, %v3720_v34, %v6248_v49  ;;  %v3753_v55 = vsel %vm1979_vm10, %v3721_v35, %v6249_v54 }
 0x353   : > { %v6257_v7 = vpop.permute.xlu1 %6256  ;;  %v6229_v26 = vunpack.i.h.bf16 %v9483_v37 }
 0x354   : > { %v6262_v56 = vpop.permute.xlu0 %6261  ;;  %v6259_v39 = vunpack.i.h.bf16 %v6257_v7  ;;  %v6258_v18 = vunpack.i.l.bf16 %v6257_v7 }
 0x355   : > { %v6264_v46 = vunpack.i.h.bf16 %v6262_v56  ;;  %v6263_v21 = vunpack.i.l.bf16 %v6262_v56 }
 0x356   : > { %v3785_v47 = vsel %vm3762_vm0, %v3752_v43, %v6258_v18  ;;  %v3786_v25 = vsel %vm3762_vm0, %v3753_v55, %v6259_v39 }
 0x357   : > { %v6267_v52 = vpop.permute.xlu1 %6266  ;;  %v3816_v17 = vsel %vm3795_vm6, %v3783_v14, %v6263_v21  ;;  %v3817_v22 = vsel %vm3795_vm6, %v3784_v44, %v6264_v46 }
 0x358   : > { %v6272_v3 = vpop.permute.xlu0 %6271  ;;  %v6269_v40 = vunpack.i.h.bf16 %v6267_v52  ;;  %v6268_v59 = vunpack.i.l.bf16 %v6267_v52 }
 0x359   : > { %v6274_v30 = vunpack.i.h.bf16 %v6272_v3  ;;  %v6273_v29 = vunpack.i.l.bf16 %v6272_v3 }
 0x35a   : > { %v3818_v56 = vsel %vm3795_vm6, %v3785_v47, %v6268_v59  ;;  %v3819_v53 = vsel %vm3795_vm6, %v3786_v25, %v6269_v40 }
 0x35b   : > { %v6277_v41 = vpop.permute.xlu1 %6276  ;;  %v3849_v36 = vsel %vm3828_vm8, %v3816_v17, %v6273_v29  ;;  %v3850_v27 = vsel %vm3828_vm8, %v3817_v22, %v6274_v30 }
 0x35c   : > { %v6282_v42 = vpop.permute.xlu0 %6281  ;;  %v6279_v6 = vunpack.i.h.bf16 %v6277_v41  ;;  %v6278_v9 = vunpack.i.l.bf16 %v6277_v41 }
 0x35d   : > { %v6284_v62 = vunpack.i.h.bf16 %v6282_v42  ;;  %v6283_v48 = vunpack.i.l.bf16 %v6282_v42 }
 0x35e   : > { %v3851_v61 = vsel %vm3828_vm8, %v3818_v56, %v6278_v9  ;;  %v3852_v0 = vsel %vm3828_vm8, %v3819_v53, %v6279_v6 }
 0x35f   : > { %v3882_v4 = vsel %vm3861_vm9, %v3849_v36, %v6283_v48  ;;  %v3883_v63 = vsel %vm3861_vm9, %v3850_v27, %v6284_v62  ;;  %v6287_v7 = vpop.permute.xlu1 %6286 }
 0x360   : > { %v3904_v10 = vpack.c.bf16 %v3883_v63, %v3882_v4  ;;  %v6292_v23 = vpop.permute.xlu0 %6291  ;;  %v6288_v33 = vunpack.i.l.bf16 %v6287_v7  ;;  %v6289_v3 = vunpack.i.h.bf16 %v6287_v7 }
 0x361   : > { %v6294_v45 = vunpack.i.h.bf16 %v6292_v23  ;;  %v6293_v58 = vunpack.i.l.bf16 %v6292_v23 }
 0x362   : > { %5108 = vmatprep.mubr.msk.bf16.mxu1 %vm4024_vm11, %v3904_v10  ;;  %v3658_v51 = vsel %vm1781_vm3, %v9175_v8, %v6288_v33  ;;  %v3659_v39 = vsel %vm1781_vm3, %v8890_v38, %v6289_v3 }
 0x363   : > { %v3885_v20 = vsel %vm3861_vm9, %v3852_v0, %v6294_v45  ;;  %v3884_v32 = vsel %vm3861_vm9, %v3851_v61, %v6293_v58  ;;  %v6297_v1 = vpop.permute.xlu1 %6296  ;;  %v3690_v8 = vsel %vm1847_vm5, %v3658_v51, %v6229_v26 }
 0x364   : > { %v3905_v5 = vpack.c.bf16 %v3885_v20, %v3884_v32  ;;  %v6302_v2 = vpop.permute.xlu0 %6301  ;;  %v6298_v46 = vunpack.i.l.bf16 %v6297_v1  ;;  %v6299_v60 = vunpack.i.h.bf16 %v6297_v1 }
 0x365   : > { %v6304_v34 = vunpack.i.h.bf16 %v6302_v2  ;;  %v6303_v30 = vunpack.i.l.bf16 %v6302_v2 }
 0x366   : > { %5109 = vmatmul.mubr.msk.bf16.gmra.mrb[36].mxu1 %vm4024_vm11, %v3905_v5  ;;  %v3660_v15 = vsel %vm1781_vm3, %v9248_v12, %v6298_v46  ;;  %v3661_v37 = vsel %vm1781_vm3, %v8925_v24, %v6299_v60 }
 0x367   : > { %v9525_v16 = vpop.permute.xlu1 %6306  ;;  %v3692_v12 = vsel %vm1847_vm5, %v3660_v15, %v6304_v34  ;;  %v3691_v59 = vsel %vm1847_vm5, %v3659_v39, %v6303_v30 }
 0x368   : > { %v6312_v31 = vpop.permute.xlu0 %6311  ;;  %v6308_v29 = vunpack.i.l.bf16 %v9525_v16 }
 0x369   : > { %v6314_v49 = vunpack.i.h.bf16 %v6312_v31  ;;  %v6313_v14 = vunpack.i.l.bf16 %v6312_v31 }
 0x36a   : > { %v3693_v62 = vsel %vm1847_vm5, %v3661_v37, %v6308_v29 }
 0x36b   : > { %v6317_v11 = vpop.permute.xlu1 %6316  ;;  %v3722_v38 = vsel %vm1913_vm7, %v3690_v8, %v6313_v14  ;;  %v3723_v6 = vsel %vm1913_vm7, %v3691_v59, %v6314_v49 }
 0x36c   : > { %v6322_v52 = vpop.permute.xlu0 %6321  ;;  %v6319_v44 = vunpack.i.h.bf16 %v6317_v11  ;;  %v6318_v41 = vunpack.i.l.bf16 %v6317_v11 }
 0x36d   : > { %v6324_v18 = vunpack.i.h.bf16 %v6322_v52  ;;  %v6323_v17 = vunpack.i.l.bf16 %v6322_v52 }
 0x36e   : > { %v3724_v9 = vsel %vm1913_vm7, %v3692_v12, %v6318_v41  ;;  %v3725_v24 = vsel %vm1913_vm7, %v3693_v62, %v6319_v44 }
 0x36f   : > { %v6327_v28 = vpop.permute.xlu1 %6326  ;;  %v3754_v43 = vsel %vm1979_vm10, %v3722_v38, %v6323_v17  ;;  %v3755_v55 = vsel %vm1979_vm10, %v3723_v6, %v6324_v18 }
 0x370   : > { %v6332_v21 = vpop.permute.xlu0 %6331  ;;  %v6329_v7 = vunpack.i.h.bf16 %v6327_v28  ;;  %v6328_v47 = vunpack.i.l.bf16 %v6327_v28 }
 0x371   : > { %v6334_v22 = vunpack.i.h.bf16 %v6332_v21  ;;  %v6333_v42 = vunpack.i.l.bf16 %v6332_v21 }
 0x372   : > { %v3756_v52 = vsel %vm1979_vm10, %v3724_v9, %v6328_v47  ;;  %v3757_v33 = vsel %vm1979_vm10, %v3725_v24, %v6329_v7  ;;  %v6309_v24 = vunpack.i.h.bf16 %v9525_v16  ;;  %v10414_v47 = vld [vmem:[#allocation43_spill] sm:$0xff] }
 0x373   : > { %v6337_v35 = vpop.permute.xlu1 %6336  ;;  %v3787_v25 = vsel %vm3762_vm0, %v3754_v43, %v6333_v42  ;;  %v3788_v10 = vsel %vm3762_vm0, %v3755_v55, %v6334_v22 }
 0x374   : > { %v6342_v54 = vpop.permute.xlu0 %6341  ;;  %v6339_v56 = vunpack.i.h.bf16 %v6337_v35  ;;  %v6338_v53 = vunpack.i.l.bf16 %v6337_v35 }
 0x375   : > { %v6344_v48 = vunpack.i.h.bf16 %v6342_v54  ;;  %v6343_v36 = vunpack.i.l.bf16 %v6342_v54 }
 0x376   : > { %v3789_v3 = vsel %vm3762_vm0, %v3756_v52, %v6338_v53  ;;  %v3790_v51 = vsel %vm3762_vm0, %v3757_v33, %v6339_v56 }
 0x377   : > { %v6347_v40 = vpop.permute.xlu1 %6346  ;;  %v3820_v45 = vsel %vm3795_vm6, %v3787_v25, %v6343_v36  ;;  %v3821_v58 = vsel %vm3795_vm6, %v3788_v10, %v6344_v48  ;;  %v9570_v36 = vld [vmem:[%s9929_s12] ss:$0 sm:$0xff] }
 0x378   : > { %v6352_v27 = vpop.permute.xlu0 %6351  ;;  %v6349_v0 = vunpack.i.h.bf16 %v6347_v40  ;;  %v6348_v20 = vunpack.i.l.bf16 %v6347_v40  ;;  %v3994_v25 = vmul.f32 %v9570_v36, %v10414_v47 }
 0x379   : > { %v6354_v4 = vunpack.i.h.bf16 %v6352_v27  ;;  %v6353_v63 = vunpack.i.l.bf16 %v6352_v27 }
 0x37a   : > { %v3822_v35 = vsel %vm3795_vm6, %v3789_v3, %v6348_v20  ;;  %v3823_v26 = vsel %vm3795_vm6, %v3790_v51, %v6349_v0 }
 0x37b   : > { %v6357_v23 = vpop.permute.xlu1 %6356  ;;  %v3853_v5 = vsel %vm3828_vm8, %v3820_v45, %v6353_v63  ;;  %v3854_v2 = vsel %vm3828_vm8, %v3821_v58, %v6354_v4 }
 0x37c   : > { %v6362_v61 = vpop.permute.xlu0 %6361  ;;  %v6359_v31 = vunpack.i.h.bf16 %v6357_v23  ;;  %v6358_v11 = vunpack.i.l.bf16 %v6357_v23  ;;  %v10416_v23 = vld [vmem:[#allocation42_spill] sm:$0xff] }
 0x37d   : > { %v6364_v32 = vunpack.i.h.bf16 %v6362_v61  ;;  %v6363_v1 = vunpack.i.l.bf16 %v6362_v61  ;;  %v9587_v16 = vmul.f32 %v9570_v36, %v10416_v23 }
 0x37e   : > { %v3855_v29 = vsel %vm3828_vm8, %v3822_v35, %v6358_v11  ;;  %v3856_v54 = vsel %vm3828_vm8, %v3823_v26, %v6359_v31 }
 0x37f   : > { %v3886_v28 = vsel %vm3861_vm9, %v3853_v5, %v6363_v1  ;;  %v3887_v46 = vsel %vm3861_vm9, %v3854_v2, %v6364_v32  ;;  %v6367_v21 = vpop.permute.xlu1 %6366 }
 0x380   : > { %v3906_v60 = vpack.c.bf16 %v3887_v46, %v3886_v28  ;;  %v6372_v34 = vpop.permute.xlu0 %6371  ;;  %v6368_v12 = vunpack.i.l.bf16 %v6367_v21  ;;  %v6369_v59 = vunpack.i.h.bf16 %v6367_v21 }
 0x381   : > { %v6374_v15 = vunpack.i.h.bf16 %v6372_v34  ;;  %v6373_v30 = vunpack.i.l.bf16 %v6372_v34 }
 0x382   : > { %5112 = vmatprep.mubr.msk.bf16.mxu1 %vm4024_vm11, %v3906_v60  ;;  %v3662_v27 = vsel %vm1781_vm3, %v9273_v19, %v6368_v12  ;;  %v3663_v63 = vsel %vm1781_vm3, %v8959_v13, %v6369_v59  ;;  %v10415_v19 = vld [vmem:[#allocation41_spill] sm:$0xff]  ;;  %v9614_v59 = vld [vmem:[%s9930_s13] ss:$0 sm:$0xff] }
 0x383   : > { %v3889_v49 = vsel %vm3861_vm9, %v3856_v54, %v6374_v15  ;;  %v3888_v14 = vsel %vm3861_vm9, %v3855_v29, %v6373_v30  ;;  %v6377_v44 = vpop.permute.xlu1 %6376  ;;  %v3992_v10 = vmul.f32 %v9570_v36, %v10415_v19  ;;  %v3694_v56 = vsel %vm1847_vm5, %v3662_v27, %v6309_v24  ;;  %v10417_v24 = vld [vmem:[#allocation20_spill] sm:$0xff] }
 0x384   : > { %v3907_v41 = vpack.c.bf16 %v3889_v49, %v3888_v14  ;;  %v6382_v39 = vpop.permute.xlu0 %6381  ;;  %v6379_v22 = vunpack.i.h.bf16 %v6377_v44  ;;  %v6378_v42 = vunpack.i.l.bf16 %v6377_v44 }
 0x385   : > { %v6383_v48 = vunpack.i.l.bf16 %v6382_v39  ;;  %v6384_v38 = vunpack.i.h.bf16 %v6382_v39 }
 0x386   : > { %5113 = vmatmul.mubr.msk.bf16.gmra.mrb[40].mxu1 %vm4024_vm11, %v3907_v41  ;;  %v3664_v43 = vsel %vm1781_vm3, %v9344_v50, %v6378_v42  ;;  %v3665_v55 = vsel %vm1781_vm3, %v10394_v57, %v6379_v22 }
 0x387   : > { %v3012_v8 = vpop.permute.xlu1 %3011  ;;  %v3695_v50 = vsel %vm1847_vm5, %v3663_v63, %v6383_v48  ;;  %v3696_v45 = vsel %vm1847_vm5, %v3664_v43, %v6384_v38  ;;  %v3995_v43 = vmul.f32 %v9570_v36, %v10417_v24 }
 0x388   : > { %v6387_v18 = vpop.permute.xlu0 %6386  ;;  %v3697_v13 = vsel %vm1847_vm5, %v3665_v55, %v3012_v8 }
 0x389   : > { %v6389_v6 = vunpack.i.h.bf16 %v6387_v18  ;;  %v6388_v9 = vunpack.i.l.bf16 %v6387_v18 }
 0x38b   : > { %v6392_v17 = vpop.permute.xlu1 %6391  ;;  %v3726_v58 = vsel %vm1913_vm7, %v3694_v56, %v6388_v9  ;;  %v3727_v61 = vsel %vm1913_vm7, %v3695_v50, %v6389_v6 }
 0x38c   : > { %v6397_v37 = vpop.permute.xlu0 %6396  ;;  %v6394_v57 = vunpack.i.h.bf16 %v6392_v17  ;;  %v6393_v53 = vunpack.i.l.bf16 %v6392_v17 }
 0x38d   : > { %v6399_v0 = vunpack.i.h.bf16 %v6397_v37  ;;  %v6398_v20 = vunpack.i.l.bf16 %v6397_v37 }
 0x38e   : > { %v3728_v28 = vsel %vm1913_vm7, %v3696_v45, %v6393_v53  ;;  %v3729_v46 = vsel %vm1913_vm7, %v3697_v13, %v6394_v57 }
 0x38f   : > { %v6402_v40 = vpop.permute.xlu1 %6401  ;;  %v3758_v26 = vsel %vm1979_vm10, %v3726_v58, %v6398_v20  ;;  %v3759_v15 = vsel %vm1979_vm10, %v3727_v61, %v6399_v0 }
 0x390   : > { %v6407_v62 = vpop.permute.xlu0 %6406  ;;  %v6404_v32 = vunpack.i.h.bf16 %v6402_v40  ;;  %v6403_v1 = vunpack.i.l.bf16 %v6402_v40 }
 0x391   : > { %v6409_v2 = vunpack.i.h.bf16 %v6407_v62  ;;  %v6408_v31 = vunpack.i.l.bf16 %v6407_v62 }
 0x392   : > { %v3760_v30 = vsel %vm1979_vm10, %v3728_v28, %v6403_v1  ;;  %v3761_v29 = vsel %vm1979_vm10, %v3729_v46, %v6404_v32 }
 0x393   : > { %v6412_v4 = vpop.permute.xlu1 %6411  ;;  %v3791_v49 = vsel %vm3762_vm0, %v3758_v26, %v6408_v31  ;;  %v3792_v14 = vsel %vm3762_vm0, %v3759_v15, %v6409_v2 }
 0x394   : > { %v6417_v7 = vpop.permute.xlu0 %6416  ;;  %v6414_v11 = vunpack.i.h.bf16 %v6412_v4  ;;  %v6413_v52 = vunpack.i.l.bf16 %v6412_v4 }
 0x395   : > { %v6419_v21 = vunpack.i.h.bf16 %v6417_v7  ;;  %v6418_v3 = vunpack.i.l.bf16 %v6417_v7 }
 0x396   : > { %v3793_v44 = vsel %vm3762_vm0, %v3760_v30, %v6413_v52  ;;  %v3794_v41 = vsel %vm3762_vm0, %v3761_v29, %v6414_v11  ;;  %v10420_v29 = vld [vmem:[#allocation30_spill] sm:$0xff] }
 0x397   : > { %v6422_v5 = vpop.permute.xlu1 %6421  ;;  %v3824_v8 = vsel %vm3795_vm6, %v3791_v49, %v6418_v3  ;;  %v3825_v18 = vsel %vm3795_vm6, %v3792_v14, %v6419_v21 }
 0x398   : > { %v6427_v33 = vpop.permute.xlu0 %6426  ;;  %v6424_v51 = vunpack.i.h.bf16 %v6422_v5  ;;  %v6423_v60 = vunpack.i.l.bf16 %v6422_v5 }
 0x399   : > { %v6429_v34 = vunpack.i.h.bf16 %v6427_v33  ;;  %v6428_v35 = vunpack.i.l.bf16 %v6427_v33  ;;  %v4404_v33 = vld [vmem:[%s9931_s14] sm:$0xff] }
 0x39a   : > { %v3826_v42 = vsel %vm3795_vm6, %v3793_v44, %v6423_v60  ;;  %v3827_v40 = vsel %vm3795_vm6, %v3794_v41, %v6424_v51  ;;  %v10418_v51 = vld [vmem:[#allocation4_spill] sm:$0xff]  ;;  %v10421_v44 = vld [vmem:[#allocation29_spill] sm:$0xff] }
 0x39b   : > { %v3506_v54 = vpop.permute.xlu1 %3505  ;;  %v3857_v12 = vsel %vm3828_vm8, %v3824_v8, %v6428_v35  ;;  %v3858_v22 = vsel %vm3828_vm8, %v3825_v18, %v6429_v34  ;;  %v3998_v60 = vmul.f32 %v9570_v36, %v10418_v51  ;;  %v10419_v35 = vld [vmem:[#allocation8_spill] sm:$0xff]  ;;  %v3997_v41 = vmul.f32 %v9570_v36, %v10421_v44 }
 0x39c   : > { %v6432_v39 = vpop.permute.xlu0 %6431  ;;  %v3859_v19 = vsel %vm3828_vm8, %v3826_v42, %v3506_v54  ;;  %v3860_v23 = vsel %vm3828_vm8, %v3827_v40, %v3506_v54  ;;  %v3996_v26 = vmul.f32 %v9570_v36, %v10419_v35  ;;  %v3999_v54 = vmul.f32 %v9570_v36, %v10420_v29 }
 0x39d   : > { %v6434_v17 = vunpack.i.h.bf16 %v6432_v39  ;;  %v6433_v37 = vunpack.i.l.bf16 %v6432_v39 }
 0x39e   : > { %v5090_v62 = vpop.f32.mrb[16].mxu1 }
 0x39f   : > { %v3890_v48 = vsel %vm3861_vm9, %v3857_v12, %v6433_v37  ;;  %v3891_v27 = vsel %vm3861_vm9, %v3858_v22, %v6434_v17  ;;  %v4120_v38 = vadd.f32 %v5090_v62, %v3994_v25  ;;  %v6437_v6 = vpop.permute.xlu1 %6436  ;;  %v4111_v9 = vpop.f32.mrb[17].mxu1 }
 0x3a0   : > { %v3908_v55 = vpack.c.bf16 %v3891_v27, %v3890_v48  ;;  %v6439_v4 = vunpack.i.h.bf16 %v6437_v6  ;;  %v6438_v63 = vunpack.i.l.bf16 %v6437_v6  ;;  %v4112_v7 = vadd.f32 %v4111_v9, %v3992_v10  ;;  %v5091_v47 = vpop.f32.mrb[18].mxu1 }
 0x3a1   : > { %v4246_v50 = vadd.f32 %v9614_v59, %v4120_v38  ;;  %v4123_v56 = vadd.f32 %v5091_v47, %v3995_v43  ;;  %v4114_v57 = vpop.f32.mrb[19].mxu1 }
 0x3a2   : > { %v3892_v25 = vsel %vm3861_vm9, %v3859_v19, %v6438_v63  ;;  %v3893_v53 = vsel %vm3861_vm9, %v3860_v23, %v6439_v4  ;;  %v4244_v45 = vadd.f32 %v9614_v59, %v4112_v7  ;;  %v4115_v13 = vadd.f32 %v4114_v57, %v9587_v16  ;;  %5116 = vmatprep.mubr.msk.bf16.mxu1 %vm4024_vm11, %v3908_v55  ;;  %v10422_v55 = vld [vmem:[#allocation33_spill] sm:$0xff]  ;;  %v10423_v7 = vld [vmem:[#allocation24_spill] sm:$0xff] }
 0x3a3   : > { %vm4278_vm1 = vcmp.ge.f32.partialorder %v4246_v50, 0.0  ;;  %v4310_v10 = vmul.f32 0.2, %v4246_v50  ;;  %v3909_v58 = vpack.c.bf16 %v3893_v53, %v3892_v25  ;;  %v4247_v61 = vadd.f32 %v9614_v59, %v4123_v56  ;;  %v10425_v53 = vld [vmem:[#allocation32_spill] sm:$0xff] }
 0x3a4   : > { %vm4276_vm5 = vcmp.ge.f32.partialorder %v4244_v45, 0.0  ;;  %v4308_v0 = vmul.f32 0.2, %v4244_v45  ;;  %v4245_v16 = vadd.f32 %v9614_v59, %v4115_v13  ;;  %v4002_v4 = vmul.f32 %v9570_v36, %v10422_v55 }
 0x3a5   : > { %v4342_v20 = vsel %vm4278_vm1, %v4246_v50, %v4310_v10  ;;  %vm4279_vm7 = vcmp.ge.f32.partialorder %v4247_v61, 0.0  ;;  %v4311_v32 = vmul.f32 0.2, %v4247_v61  ;;  %5117 = vmatmul.mubr.msk.bf16.gmra.mrb[44].mxu1 %vm4024_vm11, %v3909_v58  ;;  %v4000_v47 = vmul.f32 %v9570_v36, %v10423_v7  ;;  %v10424_v50 = vld [vmem:[#allocation10_spill] sm:$0xff] }
 0x3a6   : > { %4374 = vst.msk [vmem:[%s9632_s26 + $0x10] sm:$0xff] %vm1781_vm3, %v4342_v20  ;;  %v4340_v1 = vsel %vm4276_vm5, %v4244_v45, %v4308_v0  ;;  %vm4277_vm10 = vcmp.ge.f32.partialorder %v4245_v16, 0.0  ;;  %v4309_v5 = vmul.f32 0.2, %v4245_v16  ;;  %v4003_v56 = vmul.f32 %v9570_v36, %v10424_v50 }
 0x3a7   : > { %4372 = vst.msk [vmem:[%s9632_s26] sm:$0xff] %vm1781_vm3, %v4340_v1  ;;  %v4343_v2 = vsel %vm4279_vm7, %v4247_v61, %v4311_v32  ;;  %v4001_v45 = vmul.f32 %v9570_v36, %v10425_v53 }
 0x3a8   : > { %4375 = vst.msk [vmem:[%s9632_s26 + $0x18] sm:$0xff] %vm1781_vm3, %v4343_v2  ;;  %v4414_v31 = vpack.c.bf16 %v4343_v2, %v4342_v20  ;;  %v4341_v11 = vsel %vm4277_vm10, %v4245_v16, %v4309_v5 }
 0x3a9   : > { %4373 = vst.msk [vmem:[%s9632_s26 + $0x8] sm:$0xff] %vm1781_vm3, %v4341_v11  ;;  %v4413_v52 = vpack.c.bf16 %v4341_v11, %v4340_v1 }
 0x3ab   : > { %5122 = vmatprep.mubr.msk.bf16.mxu0 %vm1781_vm3, %v4413_v52 }
 0x3ad   : > { %v4409_v28 = vpop.permute.xlu0 %4408 }
 0x3ae   : > { %v4411_v46 = vmul.f32 %v4409_v28, %v4404_v33 }
 0x3b0   : > { %v4412_v21 = vpack.c.bf16 %v4411_v46, %v4411_v46 }
 0x3b2   : > { %v4478_v3 = vsel %vm4073_vm12, %v4412_v21, 0  ;;  %5163 = vmatprep.subr.msk.bf16.mxu0 %vm4073_vm12, %v4412_v21  ;;  %v10426_v21 = vld [vmem:[#allocation39_spill] sm:$0xff] }
 0x3b3   : > { %5121 = vmatpush3.bf16.msra.mxu0 %v4478_v3  ;;  %v4006_v3 = vmul.f32 %v9570_v36, %v10426_v21 }
 0x3b6   : > { %5123 = vmatmul.mubr.msk.bf16.vlgmr.msra.gmra.mrb[16].mxu0 %vm1781_vm3, %v4414_v31 }
 0x3b8   : > { %v5094_v34 = vpop.f32.mrb[20].mxu1 }
 0x3b9   : > { %v4136_v15 = vadd.f32 %v5094_v34, %v3998_v60  ;;  %v4127_v30 = vpop.f32.mrb[21].mxu1  ;;  %v10427_v60 = vld [vmem:[#allocation34_spill] sm:$0xff] }
 0x3ba   : > { %v4128_v49 = vadd.f32 %v4127_v30, %v3996_v26  ;;  %v5095_v14 = vpop.f32.mrb[22].mxu1  ;;  %v4004_v34 = vmul.f32 %v9570_v36, %v10427_v60 }
 0x3bb   : > { %v4250_v39 = vadd.f32 %v9614_v59, %v4136_v15  ;;  %v4139_v8 = vadd.f32 %v5095_v14, %v3999_v54  ;;  %v4130_v18 = vpop.f32.mrb[23].mxu1  ;;  %v10428_v15 = vld [vmem:[#allocation40_spill] sm:$0xff] }
 0x3bc   : > { %v4248_v17 = vadd.f32 %v9614_v59, %v4128_v49  ;;  %v4131_v37 = vadd.f32 %v4130_v18, %v3997_v41  ;;  %v4007_v30 = vmul.f32 %v9570_v36, %v10428_v15  ;;  %v10429_v49 = vld [vmem:[#allocation28_spill] sm:$0xff] }
 0x3bd   : > { %vm4282_vm12 = vcmp.ge.f32.partialorder %v4250_v39, 0.0  ;;  %v4314_v12 = vmul.f32 0.2, %v4250_v39  ;;  %v4251_v22 = vadd.f32 %v9614_v59, %v4139_v8  ;;  %v4005_v14 = vmul.f32 %v9570_v36, %v10429_v49 }
 0x3be   : > { %vm4280_vm13 = vcmp.ge.f32.partialorder %v4248_v17, 0.0  ;;  %v4312_v42 = vmul.f32 0.2, %v4248_v17  ;;  %v4249_v40 = vadd.f32 %v9614_v59, %v4131_v37 }
 0x3bf   : > { %v4346_v62 = vsel %vm4282_vm12, %v4250_v39, %v4314_v12  ;;  %vm4283_vm14 = vcmp.ge.f32.partialorder %v4251_v22, 0.0  ;;  %v4315_v48 = vmul.f32 0.2, %v4251_v22 }
 0x3c0   : > { %4378 = vst.msk [vmem:[%s9632_s26 + $0x30] sm:$0xff] %vm1781_vm3, %v4346_v62  ;;  %v4344_v27 = vsel %vm4280_vm13, %v4248_v17, %v4312_v42  ;;  %vm4281_vm15 = vcmp.ge.f32.partialorder %v4249_v40, 0.0  ;;  %v4313_v38 = vmul.f32 0.2, %v4249_v40 }
 0x3c1   : > { %4376 = vst.msk [vmem:[%s9632_s26 + $0x20] sm:$0xff] %vm1781_vm3, %v4344_v27  ;;  %v4347_v6 = vsel %vm4283_vm14, %v4251_v22, %v4315_v48 }
 0x3c2   : > { %4379 = vst.msk [vmem:[%s9632_s26 + $0x38] sm:$0xff] %vm1781_vm3, %v4347_v6  ;;  %v4345_v9 = vsel %vm4281_vm15, %v4249_v40, %v4313_v38  ;;  %v4416_v24 = vpack.c.bf16 %v4347_v6, %v4346_v62 }
 0x3c3   : > { %4377 = vst.msk [vmem:[%s9632_s26 + $0x28] sm:$0xff] %vm1781_vm3, %v4345_v9  ;;  %v4415_v43 = vpack.c.bf16 %v4345_v9, %v4344_v27 }
 0x3c5   : > { %5126 = vmatprep.mubr.msk.bf16.mxu0 %vm1781_vm3, %v4415_v43 }
 0x3c6   : > { %5127 = vmatmul.mubr.msk.bf16.gmra.mrb[20].mxu0 %vm1781_vm3, %v4416_v24  ;;  %v10430_v24 = vld [vmem:[#allocation12_spill] sm:$0xff] }
 0x3c7   : > { %v4010_v43 = vmul.f32 %v9570_v36, %v10430_v24 }
 0x3d8   : > { %v5098_v63 = vpop.f32.mrb[24].mxu1 }
 0x3d9   : > { %v4152_v19 = vadd.f32 %v5098_v63, %v4002_v4  ;;  %v4143_v23 = vpop.f32.mrb[25].mxu1  ;;  %v10431_v4 = vld [vmem:[#allocation31_spill] sm:$0xff] }
 0x3da   : > { %v4144_v57 = vadd.f32 %v4143_v23, %v4000_v47  ;;  %v5099_v25 = vpop.f32.mrb[26].mxu1  ;;  %v4008_v63 = vmul.f32 %v9570_v36, %v10431_v4 }
 0x3db   : > { %v4254_v13 = vadd.f32 %v9614_v59, %v4152_v19  ;;  %v4155_v10 = vadd.f32 %v5099_v25, %v4003_v56  ;;  %v4146_v58 = vpop.f32.mrb[27].mxu1  ;;  %v10432_v19 = vld [vmem:[#allocation9_spill] sm:$0xff] }
 0x3dc   : > { %v4252_v61 = vadd.f32 %v9614_v59, %v4144_v57  ;;  %v4147_v0 = vadd.f32 %v4146_v58, %v4001_v45  ;;  %v4011_v23 = vmul.f32 %v9570_v36, %v10432_v19  ;;  %v10433_v57 = vld [vmem:[#allocation11_spill] sm:$0xff] }
 0x3dd   : > { %vm4286_vm2 = vcmp.ge.f32.partialorder %v4254_v13, 0.0  ;;  %v4318_v16 = vmul.f32 0.2, %v4254_v13  ;;  %v4255_v20 = vadd.f32 %v9614_v59, %v4155_v10  ;;  %v4009_v25 = vmul.f32 %v9570_v36, %v10433_v57 }
 0x3de   : > { %vm4284_vm4 = vcmp.ge.f32.partialorder %v4252_v61, 0.0  ;;  %v4316_v32 = vmul.f32 0.2, %v4252_v61  ;;  %v4253_v1 = vadd.f32 %v9614_v59, %v4147_v0 }
 0x3df   : > { %v4350_v5 = vsel %vm4286_vm2, %v4254_v13, %v4318_v16  ;;  %vm4287_vm0 = vcmp.ge.f32.partialorder %v4255_v20, 0.0  ;;  %v4319_v2 = vmul.f32 0.2, %v4255_v20 }
 0x3e0   : > { %4382 = vst.msk [vmem:[%s9632_s26 + $0x50] sm:$0xff] %vm1781_vm3, %v4350_v5  ;;  %v4348_v31 = vsel %vm4284_vm4, %v4252_v61, %v4316_v32  ;;  %vm4285_vm6 = vcmp.ge.f32.partialorder %v4253_v1, 0.0  ;;  %v4317_v11 = vmul.f32 0.2, %v4253_v1 }
 0x3e1   : > { %4380 = vst.msk [vmem:[%s9632_s26 + $0x40] sm:$0xff] %vm1781_vm3, %v4348_v31  ;;  %v4351_v52 = vsel %vm4287_vm0, %v4255_v20, %v4319_v2 }
 0x3e2   : > { %4383 = vst.msk [vmem:[%s9632_s26 + $0x58] sm:$0xff] %vm1781_vm3, %v4351_v52  ;;  %v4349_v33 = vsel %vm4285_vm6, %v4253_v1, %v4317_v11  ;;  %v4418_v28 = vpack.c.bf16 %v4351_v52, %v4350_v5 }
 0x3e3   : > { %4381 = vst.msk [vmem:[%s9632_s26 + $0x48] sm:$0xff] %vm1781_vm3, %v4349_v33  ;;  %v4417_v46 = vpack.c.bf16 %v4349_v33, %v4348_v31 }
 0x3e5   : > { %5130 = vmatprep.mubr.msk.bf16.mxu0 %vm1781_vm3, %v4417_v46 }
 0x3e6   : > { %5131 = vmatmul.mubr.msk.bf16.gmra.mrb[24].mxu0 %vm1781_vm3, %v4418_v28  ;;  %v10434_v28 = vld [vmem:[#allocation45_spill] sm:$0xff] }
 0x3e7   : > { %v4014_v46 = vmul.f32 %v9570_v36, %v10434_v28 }
 0x3f8   : > { %v5102_v51 = vpop.f32.mrb[28].mxu1 }
 0x3f9   : > { %v4168_v35 = vadd.f32 %v5102_v51, %v4006_v3  ;;  %v4159_v26 = vpop.f32.mrb[29].mxu1  ;;  %v10435_v3 = vld [vmem:[#allocation44_spill] sm:$0xff] }
 0x3fa   : > { %v4160_v29 = vadd.f32 %v4159_v26, %v4004_v34  ;;  %v5103_v54 = vpop.f32.mrb[30].mxu1  ;;  %v4012_v51 = vmul.f32 %v9570_v36, %v10435_v3 }
 0x3fb   : > { %v4258_v44 = vadd.f32 %v9614_v59, %v4168_v35  ;;  %v4171_v41 = vadd.f32 %v5103_v54, %v4007_v30  ;;  %v4162_v39 = vpop.f32.mrb[31].mxu1  ;;  %v10436_v35 = vld [vmem:[#allocation46_spill] sm:$0xff] }
 0x3fc   : > { %v4256_v8 = vadd.f32 %v9614_v59, %v4160_v29  ;;  %v4163_v18 = vadd.f32 %v4162_v39, %v4005_v14  ;;  %v4015_v26 = vmul.f32 %v9570_v36, %v10436_v35  ;;  %v10437_v29 = vld [vmem:[#allocation7_spill] sm:$0xff] }
 0x3fd   : > { %vm4290_vm8 = vcmp.ge.f32.partialorder %v4258_v44, 0.0  ;;  %v4322_v17 = vmul.f32 0.2, %v4258_v44  ;;  %v4259_v37 = vadd.f32 %v9614_v59, %v4171_v41  ;;  %v4013_v54 = vmul.f32 %v9570_v36, %v10437_v29 }
 0x3fe   : > { %vm4288_vm9 = vcmp.ge.f32.partialorder %v4256_v8, 0.0  ;;  %v4320_v12 = vmul.f32 0.2, %v4256_v8  ;;  %v4257_v22 = vadd.f32 %v9614_v59, %v4163_v18 }
 0x3ff   : > { %v4354_v42 = vsel %vm4290_vm8, %v4258_v44, %v4322_v17  ;;  %vm4291_vm11 = vcmp.ge.f32.partialorder %v4259_v37, 0.0  ;;  %v4323_v40 = vmul.f32 0.2, %v4259_v37 }
 0x400   : > { %4386 = vst.msk [vmem:[%s9632_s26 + $0x70] sm:$0xff] %vm1781_vm3, %v4354_v42  ;;  %v4352_v62 = vsel %vm4288_vm9, %v4256_v8, %v4320_v12  ;;  %vm4289_vm1 = vcmp.ge.f32.partialorder %v4257_v22, 0.0  ;;  %v4321_v48 = vmul.f32 0.2, %v4257_v22 }
 0x401   : > { %4384 = vst.msk [vmem:[%s9632_s26 + $0x60] sm:$0xff] %vm1781_vm3, %v4352_v62  ;;  %v4355_v27 = vsel %vm4291_vm11, %v4259_v37, %v4323_v40 }
 0x402   : > { %4387 = vst.msk [vmem:[%s9632_s26 + $0x78] sm:$0xff] %vm1781_vm3, %v4355_v27  ;;  %v4353_v38 = vsel %vm4289_vm1, %v4257_v22, %v4321_v48  ;;  %v4420_v6 = vpack.c.bf16 %v4355_v27, %v4354_v42 }
 0x403   : > { %4385 = vst.msk [vmem:[%s9632_s26 + $0x68] sm:$0xff] %vm1781_vm3, %v4353_v38  ;;  %v4419_v9 = vpack.c.bf16 %v4353_v38, %v4352_v62 }
 0x405   : > { %5134 = vmatprep.mubr.msk.bf16.mxu0 %vm1781_vm3, %v4419_v9 }
 0x406   : > { %5135 = vmatmul.mubr.msk.bf16.gmra.mrb[28].mxu0 %vm1781_vm3, %v4420_v6  ;;  %v10438_v6 = vld [vmem:[#allocation49_spill] sm:$0xff] }
 0x407   : > { %v4018_v9 = vmul.f32 %v9570_v36, %v10438_v6 }
 0x418   : > { %v5106_v55 = vpop.f32.mrb[32].mxu1 }
 0x419   : > { %v4184_v7 = vadd.f32 %v5106_v55, %v4010_v43  ;;  %v4175_v47 = vpop.f32.mrb[33].mxu1  ;;  %v10439_v43 = vld [vmem:[#allocation47_spill] sm:$0xff] }
 0x41a   : > { %v4176_v50 = vadd.f32 %v4175_v47, %v4008_v63  ;;  %v5107_v56 = vpop.f32.mrb[34].mxu1  ;;  %v4016_v55 = vmul.f32 %v9570_v36, %v10439_v43 }
 0x41b   : > { %v4262_v53 = vadd.f32 %v9614_v59, %v4184_v7  ;;  %v4187_v45 = vadd.f32 %v5107_v56, %v4011_v23  ;;  %v4178_v13 = vpop.f32.mrb[35].mxu1  ;;  %v10440_v7 = vld [vmem:[#allocation50_spill] sm:$0xff] }
 0x41c   : > { %v4260_v10 = vadd.f32 %v9614_v59, %v4176_v50  ;;  %v4179_v58 = vadd.f32 %v4178_v13, %v4009_v25  ;;  %v4019_v47 = vmul.f32 %v9570_v36, %v10440_v7  ;;  %v10441_v50 = vld [vmem:[#allocation48_spill] sm:$0xff] }
 0x41d   : > { %vm4294_vm5 = vcmp.ge.f32.partialorder %v4262_v53, 0.0  ;;  %v4326_v61 = vmul.f32 0.2, %v4262_v53  ;;  %v4263_v0 = vadd.f32 %v9614_v59, %v4187_v45  ;;  %v4017_v56 = vmul.f32 %v9570_v36, %v10441_v50  ;;  %v4648_v50 = vld [vmem:[%s9808_s25 + $0x38] sm:$0xff] }
 0x41e   : > { %vm4292_vm7 = vcmp.ge.f32.partialorder %v4260_v10, 0.0  ;;  %v4324_v16 = vmul.f32 0.2, %v4260_v10  ;;  %v4261_v20 = vadd.f32 %v9614_v59, %v4179_v58 }
 0x41f   : > { %v4358_v32 = vsel %vm4294_vm5, %v4262_v53, %v4326_v61  ;;  %vm4295_vm10 = vcmp.ge.f32.partialorder %v4263_v0, 0.0  ;;  %v4327_v1 = vmul.f32 0.2, %v4263_v0 }
 0x420   : > { %4390 = vst.msk [vmem:[%s9632_s26 + $0x90] sm:$0xff] %vm1781_vm3, %v4358_v32  ;;  %v4356_v5 = vsel %vm4292_vm7, %v4260_v10, %v4324_v16  ;;  %vm4293_vm12 = vcmp.ge.f32.partialorder %v4261_v20, 0.0  ;;  %v4325_v2 = vmul.f32 0.2, %v4261_v20  ;;  %vm4705_vm7 = vcmask 23552  }
 0x421   : > { %4388 = vst.msk [vmem:[%s9632_s26 + $0x80] sm:$0xff] %vm1781_vm3, %v4356_v5  ;;  %v4359_v31 = vsel %vm4295_vm10, %v4263_v0, %v4327_v1 }
 0x422   : > { %4391 = vst.msk [vmem:[%s9632_s26 + $0x98] sm:$0xff] %vm1781_vm3, %v4359_v31  ;;  %v4357_v11 = vsel %vm4293_vm12, %v4261_v20, %v4325_v2  ;;  %v4422_v52 = vpack.c.bf16 %v4359_v31, %v4358_v32 }
 0x423   : > { %4389 = vst.msk [vmem:[%s9632_s26 + $0x88] sm:$0xff] %vm1781_vm3, %v4357_v11  ;;  %v4421_v33 = vpack.c.bf16 %v4357_v11, %v4356_v5 }
 0x425   : > { %5138 = vmatprep.mubr.msk.bf16.mxu0 %vm1781_vm3, %v4421_v33 }
 0x426   : > { %5139 = vmatmul.mubr.msk.bf16.gmra.mrb[32].mxu0 %vm1781_vm3, %v4422_v52  ;;  %v10442_v52 = vld [vmem:[#allocation53_spill] sm:$0xff] }
 0x427   : > { %v4022_v33 = vmul.f32 %v9570_v36, %v10442_v52 }
 0x439   : > { %v5110_v21 = vpop.f32.mrb[36].mxu1 }
 0x43a   : > { %v4200_v60 = vadd.f32 %v5110_v21, %v4014_v46  ;;  %v4191_v34 = vpop.f32.mrb[37].mxu1  ;;  %v10443_v46 = vld [vmem:[#allocation51_spill] sm:$0xff] }
 0x43b   : > { %v4192_v15 = vadd.f32 %v4191_v34, %v4012_v51  ;;  %v5111_v30 = vpop.f32.mrb[38].mxu1  ;;  %v4020_v21 = vmul.f32 %v9570_v36, %v10443_v46  ;;  %v4653_v46 = vld [vmem:[%s9808_s25 + $0x60] sm:$0xff] }
 0x43c   : > { %v4266_v49 = vadd.f32 %v9614_v59, %v4200_v60  ;;  %v4203_v14 = vadd.f32 %v5111_v30, %v4015_v26  ;;  %v4194_v44 = vpop.f32.mrb[39].mxu1  ;;  %v10444_v60 = vld [vmem:[#allocation54_spill] sm:$0xff] }
 0x43d   : > { %v4264_v41 = vadd.f32 %v9614_v59, %v4192_v15  ;;  %v4195_v39 = vadd.f32 %v4194_v44, %v4013_v54  ;;  %v4023_v34 = vmul.f32 %v9570_v36, %v10444_v60  ;;  %v10445_v15 = vld [vmem:[#allocation52_spill] sm:$0xff] }
 0x43e   : > { %vm4298_vm13 = vcmp.ge.f32.partialorder %v4266_v49, 0.0  ;;  %v4330_v8 = vmul.f32 0.2, %v4266_v49  ;;  %v4267_v18 = vadd.f32 %v9614_v59, %v4203_v14  ;;  %v4021_v30 = vmul.f32 %v9570_v36, %v10445_v15 }
 0x43f   : > { %vm4296_vm14 = vcmp.ge.f32.partialorder %v4264_v41, 0.0  ;;  %v4328_v17 = vmul.f32 0.2, %v4264_v41  ;;  %v4265_v37 = vadd.f32 %v9614_v59, %v4195_v39 }
 0x440   : > { %v4362_v12 = vsel %vm4298_vm13, %v4266_v49, %v4330_v8  ;;  %vm4299_vm15 = vcmp.ge.f32.partialorder %v4267_v18, 0.0  ;;  %v4331_v22 = vmul.f32 0.2, %v4267_v18 }
 0x441   : > { %4394 = vst.msk [vmem:[%s9632_s26 + $0xb0] sm:$0xff] %vm1781_vm3, %v4362_v12  ;;  %v4360_v42 = vsel %vm4296_vm14, %v4264_v41, %v4328_v17  ;;  %vm4297_vm2 = vcmp.ge.f32.partialorder %v4265_v37, 0.0  ;;  %v4329_v40 = vmul.f32 0.2, %v4265_v37 }
 0x442   : > { %4392 = vst.msk [vmem:[%s9632_s26 + $0xa0] sm:$0xff] %vm1781_vm3, %v4360_v42  ;;  %v4363_v62 = vsel %vm4299_vm15, %v4267_v18, %v4331_v22 }
 0x443   : > { %4395 = vst.msk [vmem:[%s9632_s26 + $0xb8] sm:$0xff] %vm1781_vm3, %v4363_v62  ;;  %v4361_v48 = vsel %vm4297_vm2, %v4265_v37, %v4329_v40  ;;  %v4424_v27 = vpack.c.bf16 %v4363_v62, %v4362_v12 }
 0x444   : > { %4393 = vst.msk [vmem:[%s9632_s26 + $0xa8] sm:$0xff] %vm1781_vm3, %v4361_v48  ;;  %v4423_v38 = vpack.c.bf16 %v4361_v48, %v4360_v42  ;;  %v4641_v48 = vld [vmem:[%s9808_s25] sm:$0xff] }
 0x446   : > { %5142 = vmatprep.mubr.msk.bf16.mxu0 %vm1781_vm3, %v4423_v38  ;;  %v4644_v38 = vld [vmem:[%s9808_s25 + $0x18] sm:$0xff] }
 0x447   : > { %5143 = vmatmul.mubr.msk.bf16.gmra.mrb[36].mxu0 %vm1781_vm3, %v4424_v27 }
 0x459   : > { %v5114_v24 = vpop.f32.mrb[40].mxu1 }
 0x45a   : > { %v4216_v4 = vadd.f32 %v5114_v24, %v4018_v9  ;;  %v4207_v63 = vpop.f32.mrb[41].mxu1  ;;  %v4642_v24 = vld [vmem:[%s9808_s25 + $0x8] sm:$0xff] }
 0x45b   : > { %v4208_v19 = vadd.f32 %v4207_v63, %v4016_v55  ;;  %v5115_v23 = vpop.f32.mrb[42].mxu1 }
 0x45c   : > { %v4270_v57 = vadd.f32 %v9614_v59, %v4216_v4  ;;  %v4219_v25 = vadd.f32 %v5115_v23, %v4019_v47  ;;  %v4210_v53 = vpop.f32.mrb[43].mxu1  ;;  %v4647_v47 = vld [vmem:[%s9808_s25 + $0x30] sm:$0xff] }
 0x45d   : > { %v4268_v45 = vadd.f32 %v9614_v59, %v4208_v19  ;;  %v4211_v13 = vadd.f32 %v4210_v53, %v4017_v56  ;;  %v4645_v19 = vld [vmem:[%s9808_s25 + $0x20] sm:$0xff] }
 0x45e   : > { %vm4302_vm4 = vcmp.ge.f32.partialorder %v4270_v57, 0.0  ;;  %v4334_v10 = vmul.f32 0.2, %v4270_v57  ;;  %v4271_v58 = vadd.f32 %v9614_v59, %v4219_v25  ;;  %v4646_v25 = vld [vmem:[%s9808_s25 + $0x28] sm:$0xff] }
 0x45f   : > { %vm4300_vm0 = vcmp.ge.f32.partialorder %v4268_v45, 0.0  ;;  %v4332_v61 = vmul.f32 0.2, %v4268_v45  ;;  %v4269_v0 = vadd.f32 %v9614_v59, %v4211_v13 }
 0x460   : > { %v4366_v16 = vsel %vm4302_vm4, %v4270_v57, %v4334_v10  ;;  %vm4303_vm6 = vcmp.ge.f32.partialorder %v4271_v58, 0.0  ;;  %v4335_v20 = vmul.f32 0.2, %v4271_v58 }
 0x461   : > { %4398 = vst.msk [vmem:[%s9632_s26 + $0xd0] sm:$0xff] %vm1781_vm3, %v4366_v16  ;;  %v4364_v32 = vsel %vm4300_vm0, %v4268_v45, %v4332_v61  ;;  %vm4301_vm8 = vcmp.ge.f32.partialorder %v4269_v0, 0.0  ;;  %v4333_v1 = vmul.f32 0.2, %v4269_v0  ;;  %v4651_v61 = vld [vmem:[%s9808_s25 + $0x50] sm:$0xff] }
 0x462   : > { %4396 = vst.msk [vmem:[%s9632_s26 + $0xc0] sm:$0xff] %vm1781_vm3, %v4364_v32  ;;  %v4367_v5 = vsel %vm4303_vm6, %v4271_v58, %v4335_v20  ;;  %v4652_v20 = vld [vmem:[%s9808_s25 + $0x58] sm:$0xff] }
 0x463   : > { %4399 = vst.msk [vmem:[%s9632_s26 + $0xd8] sm:$0xff] %vm1781_vm3, %v4367_v5  ;;  %v4365_v2 = vsel %vm4301_vm8, %v4269_v0, %v4333_v1  ;;  %v4426_v31 = vpack.c.bf16 %v4367_v5, %v4366_v16  ;;  %v4649_v0 = vld [vmem:[%s9808_s25 + $0x40] sm:$0xff]  ;;  %v4650_v5 = vld [vmem:[%s9808_s25 + $0x48] sm:$0xff] }
 0x464   : > { %4397 = vst.msk [vmem:[%s9632_s26 + $0xc8] sm:$0xff] %vm1781_vm3, %v4365_v2  ;;  %v4425_v11 = vpack.c.bf16 %v4365_v2, %v4364_v32 }
 0x466   : > { %5146 = vmatprep.mubr.msk.bf16.mxu0 %vm1781_vm3, %v4425_v11 }
 0x467   : > { %5147 = vmatmul.mubr.msk.bf16.gmra.mrb[40].mxu0 %vm1781_vm3, %v4426_v31 }
 0x478   : > { %v5118_v28 = vpop.f32.mrb[44].mxu1 }
 0x479   : > { %v4232_v3 = vadd.f32 %v5118_v28, %v4022_v33  ;;  %v4223_v51 = vpop.f32.mrb[45].mxu1  ;;  %v4655_v28 = vld [vmem:[%s9808_s25 + $0x70] sm:$0xff] }
 0x47a   : > { %v4224_v35 = vadd.f32 %v4223_v51, %v4020_v21  ;;  %v5119_v26 = vpop.f32.mrb[46].mxu1 }
 0x47b   : > { %v4274_v29 = vadd.f32 %v9614_v59, %v4232_v3  ;;  %v4235_v54 = vadd.f32 %v5119_v26, %v4023_v34  ;;  %v4226_v49 = vpop.f32.mrb[47].mxu1  ;;  %v4656_v3 = vld [vmem:[%s9808_s25 + $0x78] sm:$0xff]  ;;  %v4654_v34 = vld [vmem:[%s9808_s25 + $0x68] sm:$0xff] }
 0x47c   : > { %v4272_v14 = vadd.f32 %v9614_v59, %v4224_v35  ;;  %v4227_v44 = vadd.f32 %v4226_v49, %v4021_v30  ;;  %v4657_v49 = vld [vmem:[%s9808_s25 + $0x80] sm:$0xff] }
 0x47d   : > { %vm4306_vm9 = vcmp.ge.f32.partialorder %v4274_v29, 0.0  ;;  %v4338_v41 = vmul.f32 0.2, %v4274_v29  ;;  %v4275_v39 = vadd.f32 %v9614_v59, %v4235_v54  ;;  %v4659_v54 = vld [vmem:[%s9808_s25 + $0x90] sm:$0xff] }
 0x47e   : > { %vm4304_vm11 = vcmp.ge.f32.partialorder %v4272_v14, 0.0  ;;  %v4336_v8 = vmul.f32 0.2, %v4272_v14  ;;  %v4273_v18 = vadd.f32 %v9614_v59, %v4227_v44  ;;  %v4643_v59 = vld [vmem:[%s9808_s25 + $0x10] sm:$0xff]  ;;  %v4660_v44 = vld [vmem:[%s9808_s25 + $0x98] sm:$0xff] }
 0x47f   : > { %v4370_v36 = vsel %vm4306_vm9, %v4274_v29, %v4338_v41  ;;  %vm4307_vm1 = vcmp.ge.f32.partialorder %v4275_v39, 0.0  ;;  %v4339_v17 = vmul.f32 0.2, %v4275_v39 }
 0x480   : > { %4402 = vst.msk [vmem:[%s9632_s26 + $0xf0] sm:$0xff] %vm1781_vm3, %v4370_v36  ;;  %v4368_v37 = vsel %vm4304_vm11, %v4272_v14, %v4336_v8  ;;  %vm4305_vm5 = vcmp.ge.f32.partialorder %v4273_v18, 0.0  ;;  %v4337_v12 = vmul.f32 0.2, %v4273_v18  ;;  %v4658_v8 = vld [vmem:[%s9808_s25 + $0x88] sm:$0xff] }
 0x481   : > { %4400 = vst.msk [vmem:[%s9632_s26 + $0xe0] sm:$0xff] %vm1781_vm3, %v4368_v37  ;;  %v4371_v22 = vsel %vm4307_vm1, %v4275_v39, %v4339_v17 }
 0x482   : > { %4403 = vst.msk [vmem:[%s9632_s26 + $0xf8] sm:$0xff] %vm1781_vm3, %v4371_v22  ;;  %v4369_v42 = vsel %vm4305_vm5, %v4273_v18, %v4337_v12  ;;  %v4428_v40 = vpack.c.bf16 %v4371_v22, %v4370_v36  ;;  %v4663_v22 = vld [vmem:[%s9808_s25 + $0xb0] sm:$0xff] }
 0x483   : > { %4401 = vst.msk [vmem:[%s9632_s26 + $0xe8] sm:$0xff] %vm1781_vm3, %v4369_v42  ;;  %v4427_v62 = vpack.c.bf16 %v4369_v42, %v4368_v37  ;;  %v4661_v42 = vld [vmem:[%s9808_s25 + $0xa0] sm:$0xff] }
 0x485   : > { %5150 = vmatprep.mubr.msk.bf16.mxu0 %vm1781_vm3, %v4427_v62  ;;  %v4664_v62 = vld [vmem:[%s9808_s25 + $0xb8] sm:$0xff] }
 0x486   : > { %5151 = vmatmul.mubr.msk.bf16.gmra.mrb[44].mxu0 %vm1781_vm3, %v4428_v40 }
 0x489   : > { %v5124_v27 = vpop.f32.mrb[16].mxu0 }
 0x48a   : > { %v4675_v6 = vadd.f32 %v5124_v27, %v4643_v59  ;;  %v4514_v9 = vpop.f32.mrb[17].mxu0  ;;  %v4662_v27 = vld [vmem:[%s9808_s25 + $0xa8] sm:$0xff] }
 0x48b   : > { %v4673_v43 = vadd.f32 %v4641_v48, %v4514_v9  ;;  %v5125_v55 = vpop.f32.mrb[18].mxu0 }
 0x48c   : > { %4708 = vst.msk [vmem:[%s9818_s18 + $0x10] sm:$0xff] %vm4705_vm7, %v4675_v6  ;;  %v4676_v4 = vadd.f32 %v5125_v55, %v4644_v38  ;;  %v4517_v63 = vpop.f32.mrb[19].mxu0  ;;  %v4667_v55 = vld [vmem:[%s9808_s25 + $0xd0] sm:$0xff] }
 0x48d   : > { %4706 = vst.msk [vmem:[%s9818_s18] sm:$0xff] %vm4705_vm7, %v4673_v43  ;;  %v4674_v7 = vadd.f32 %v4642_v24, %v4517_v63 }
 0x48e   : > { %4709 = vst.msk [vmem:[%s9818_s18 + $0x18] sm:$0xff] %vm4705_vm7, %v4676_v4  ;;  %v4665_v4 = vld [vmem:[%s9808_s25 + $0xc0] sm:$0xff] }
 0x48f   : > { %4707 = vst.msk [vmem:[%s9818_s18 + $0x8] sm:$0xff] %vm4705_vm7, %v4674_v7  ;;  %v4668_v7 = vld [vmem:[%s9808_s25 + $0xd8] sm:$0xff] }
 0x499   : > { %v5128_v23 = vpop.f32.mrb[20].mxu0 }
 0x49a   : > { %v4679_v56 = vadd.f32 %v5128_v23, %v4647_v47  ;;  %v4530_v57 = vpop.f32.mrb[21].mxu0  ;;  %v4666_v23 = vld [vmem:[%s9808_s25 + $0xc8] sm:$0xff] }
 0x49b   : > { %v4677_v53 = vadd.f32 %v4645_v19, %v4530_v57  ;;  %v5129_v45 = vpop.f32.mrb[22].mxu0 }
 0x49c   : > { %4712 = vst.msk [vmem:[%s9818_s18 + $0x30] sm:$0xff] %vm4705_vm7, %v4679_v56  ;;  %v4680_v13 = vadd.f32 %v5129_v45, %v4648_v50  ;;  %v4533_v10 = vpop.f32.mrb[23].mxu0  ;;  %v4671_v45 = vld [vmem:[%s9808_s25 + $0xf0] sm:$0xff] }
 0x49d   : > { %4710 = vst.msk [vmem:[%s9818_s18 + $0x20] sm:$0xff] %vm4705_vm7, %v4677_v53  ;;  %v4678_v58 = vadd.f32 %v4646_v25, %v4533_v10 }
 0x49e   : > { %4713 = vst.msk [vmem:[%s9818_s18 + $0x38] sm:$0xff] %vm4705_vm7, %v4680_v13  ;;  %v4669_v13 = vld [vmem:[%s9808_s25 + $0xe0] sm:$0xff] }
 0x49f   : > { %4711 = vst.msk [vmem:[%s9818_s18 + $0x28] sm:$0xff] %vm4705_vm7, %v4678_v58  ;;  %v4672_v58 = vld [vmem:[%s9808_s25 + $0xf8] sm:$0xff] }
 0x4b9   : > { %v5132_v16 = vpop.f32.mrb[24].mxu0 }
 0x4ba   : > { %v4683_v32 = vadd.f32 %v5132_v16, %v4651_v61  ;;  %v4546_v1 = vpop.f32.mrb[25].mxu0  ;;  %v4670_v16 = vld [vmem:[%s9808_s25 + $0xe8] sm:$0xff] }
 0x4bb   : > { %v4681_v2 = vadd.f32 %v4649_v0, %v4546_v1  ;;  %v5133_v31 = vpop.f32.mrb[26].mxu0 }
 0x4bc   : > { %4716 = vst.msk [vmem:[%s9818_s18 + $0x50] sm:$0xff] %vm4705_vm7, %v4683_v32  ;;  %v4684_v11 = vadd.f32 %v5133_v31, %v4652_v20  ;;  %v4549_v52 = vpop.f32.mrb[27].mxu0 }
 0x4bd   : > { %4714 = vst.msk [vmem:[%s9818_s18 + $0x40] sm:$0xff] %vm4705_vm7, %v4681_v2  ;;  %v4682_v33 = vadd.f32 %v4650_v5, %v4549_v52 }
 0x4be   : > { %4717 = vst.msk [vmem:[%s9818_s18 + $0x58] sm:$0xff] %vm4705_vm7, %v4684_v11 }
 0x4bf   : > { %4715 = vst.msk [vmem:[%s9818_s18 + $0x48] sm:$0xff] %vm4705_vm7, %v4682_v33 }
 0x4d9   : > { %v5136_v21 = vpop.f32.mrb[28].mxu0 }
 0x4da   : > { %v4687_v51 = vadd.f32 %v5136_v21, %v4655_v28  ;;  %v4562_v60 = vpop.f32.mrb[29].mxu0 }
 0x4db   : > { %v4685_v35 = vadd.f32 %v4653_v46, %v4562_v60  ;;  %v5137_v26 = vpop.f32.mrb[30].mxu0 }
 0x4dc   : > { %4720 = vst.msk [vmem:[%s9818_s18 + $0x70] sm:$0xff] %vm4705_vm7, %v4687_v51  ;;  %v4688_v15 = vadd.f32 %v5137_v26, %v4656_v3  ;;  %v4565_v30 = vpop.f32.mrb[31].mxu0 }
 0x4dd   : > { %4718 = vst.msk [vmem:[%s9818_s18 + $0x60] sm:$0xff] %vm4705_vm7, %v4685_v35  ;;  %v4686_v29 = vadd.f32 %v4654_v34, %v4565_v30 }
 0x4de   : > { %4721 = vst.msk [vmem:[%s9818_s18 + $0x78] sm:$0xff] %vm4705_vm7, %v4688_v15 }
 0x4df   : > { %4719 = vst.msk [vmem:[%s9818_s18 + $0x68] sm:$0xff] %vm4705_vm7, %v4686_v29 }
 0x4f9   : > { %v5140_v14 = vpop.f32.mrb[32].mxu0 }
 0x4fa   : > { %v4691_v41 = vadd.f32 %v5140_v14, %v4659_v54  ;;  %v4578_v39 = vpop.f32.mrb[33].mxu0 }
 0x4fb   : > { %v4689_v18 = vadd.f32 %v4657_v49, %v4578_v39  ;;  %v5141_v36 = vpop.f32.mrb[34].mxu0 }
 0x4fc   : > { %4724 = vst.msk [vmem:[%s9818_s18 + $0x90] sm:$0xff] %vm4705_vm7, %v4691_v41  ;;  %v4692_v17 = vadd.f32 %v5141_v36, %v4660_v44  ;;  %v4581_v37 = vpop.f32.mrb[35].mxu0 }
 0x4fd   : > { %4722 = vst.msk [vmem:[%s9818_s18 + $0x80] sm:$0xff] %vm4705_vm7, %v4689_v18  ;;  %v4690_v12 = vadd.f32 %v4658_v8, %v4581_v37 }
 0x4fe   : > { %4725 = vst.msk [vmem:[%s9818_s18 + $0x98] sm:$0xff] %vm4705_vm7, %v4692_v17 }
 0x4ff   : > { %4723 = vst.msk [vmem:[%s9818_s18 + $0x88] sm:$0xff] %vm4705_vm7, %v4690_v12 }
 0x51a   : > { %v5144_v40 = vpop.f32.mrb[36].mxu0 }
 0x51b   : > { %v4695_v59 = vadd.f32 %v5144_v40, %v4663_v22  ;;  %v4594_v48 = vpop.f32.mrb[37].mxu0 }
 0x51c   : > { %v4693_v38 = vadd.f32 %v4661_v42, %v4594_v48  ;;  %v5145_v6 = vpop.f32.mrb[38].mxu0 }
 0x51d   : > { %4728 = vst.msk [vmem:[%s9818_s18 + $0xb0] sm:$0xff] %vm4705_vm7, %v4695_v59  ;;  %v4696_v9 = vadd.f32 %v5145_v6, %v4664_v62  ;;  %v4597_v24 = vpop.f32.mrb[39].mxu0 }
 0x51e   : > { %4726 = vst.msk [vmem:[%s9818_s18 + $0xa0] sm:$0xff] %vm4705_vm7, %v4693_v38  ;;  %v4694_v43 = vadd.f32 %v4662_v27, %v4597_v24 }
 0x51f   : > { %4729 = vst.msk [vmem:[%s9818_s18 + $0xb8] sm:$0xff] %vm4705_vm7, %v4696_v9 }
 0x520   : > { %4727 = vst.msk [vmem:[%s9818_s18 + $0xa8] sm:$0xff] %vm4705_vm7, %v4694_v43 }
 0x53a   : > { %v5148_v63 = vpop.f32.mrb[40].mxu0 }
 0x53b   : > { %v4699_v47 = vadd.f32 %v5148_v63, %v4667_v55  ;;  %v4610_v19 = vpop.f32.mrb[41].mxu0 }
 0x53c   : > { %v4697_v50 = vadd.f32 %v4665_v4, %v4610_v19  ;;  %v5149_v56 = vpop.f32.mrb[42].mxu0 }
 0x53d   : > { %4732 = vst.msk [vmem:[%s9818_s18 + $0xd0] sm:$0xff] %vm4705_vm7, %v4699_v47  ;;  %v4700_v57 = vadd.f32 %v5149_v56, %v4668_v7  ;;  %v4613_v25 = vpop.f32.mrb[43].mxu0 }
 0x53e   : > { %4730 = vst.msk [vmem:[%s9818_s18 + $0xc0] sm:$0xff] %vm4705_vm7, %v4697_v50  ;;  %v4698_v53 = vadd.f32 %v4666_v23, %v4613_v25 }
 0x53f   : > { %4733 = vst.msk [vmem:[%s9818_s18 + $0xd8] sm:$0xff] %vm4705_vm7, %v4700_v57 }
 0x540   : > { %4731 = vst.msk [vmem:[%s9818_s18 + $0xc8] sm:$0xff] %vm4705_vm7, %v4698_v53 }
 0x559   : > { %v5152_v10 = vpop.f32.mrb[44].mxu0 }
 0x55a   : > { %v4703_v61 = vadd.f32 %v5152_v10, %v4671_v45  ;;  %v4626_v0 = vpop.f32.mrb[45].mxu0 }
 0x55b   : > { %v4701_v20 = vadd.f32 %v4669_v13, %v4626_v0  ;;  %v5153_v32 = vpop.f32.mrb[46].mxu0 }
 0x55c   : > { %4736 = vst.msk [vmem:[%s9818_s18 + $0xf0] sm:$0xff] %vm4705_vm7, %v4703_v61  ;;  %v4704_v1 = vadd.f32 %v5153_v32, %v4672_v58  ;;  %v4629_v5 = vpop.f32.mrb[47].mxu0 }
 0x55d   : > { %4734 = vst.msk [vmem:[%s9818_s18 + $0xe0] sm:$0xff] %vm4705_vm7, %v4701_v20  ;;  %v4702_v2 = vadd.f32 %v4670_v16, %v4629_v5 }
 0x55e   : > { %4737 = vst.msk [vmem:[%s9818_s18 + $0xf8] sm:$0xff] %vm4705_vm7, %v4704_v1 }
 0x55f   : > { %4735 = vst.msk [vmem:[%s9818_s18 + $0xe8] sm:$0xff] %vm4705_vm7, %v4702_v2 }
 0x560 PF: > { %s27_s21 = sadd.s32 1, %s6446_s21  }
 0x561   : > { %p24_p4 = scmp.ge.s32.totalorder %s27_s21, 4  }
 0x563   :  { %26 = sbr.rel (!%p24_p4) target bundleno = 2 (0x2), region = 143 }

</bundles_post_ra>
